<compile_context>
chip_gen: v7x
topology: tpu7x:2x2x1
jax: 0.10.0
libtpu: 0.0.40
codegen_flags: <defaults>
</compile_context>

<pallas_src>
import functools

import jax
import jax.numpy as jnp
from jax import lax
from jax.experimental import pallas as pl
from jax.experimental.pallas import tpu as pltpu

_LANES = 128
_BN_EPS = 1e-5


def _round_up(n, m):
    return (n + m - 1) // m * m


_VMEM_LIMIT = None


def _vmem_limit_bytes():
    """Per-generation scoped VMEM limit (v7x has 64 MiB, v5e/v6e 128 MiB)."""
    global _VMEM_LIMIT
    if _VMEM_LIMIT is None:
        cap = 64 * 1024 * 1024
        try:
            cap = int(getattr(pltpu.get_tpu_info(), "vmem_capacity_bytes", cap))
        except Exception:
            pass
        _VMEM_LIMIT = int(min(100 * 1024 * 1024,
                              max(32 * 1024 * 1024, cap * 3 // 4)))
    return _VMEM_LIMIT


# ---------------------------------------------------------------------------
# Pass-1 kernel (one grid step == one batch image):
#   [optional fused BN+ReLU of the input] -> AddCoords(with_r=True)
#   -> pad=1 halo in a lane-padded VMEM scratch
#   -> 3x3 conv as 9 lane-aligned bf16 MXU matmuls (f32 accumulation)
#   -> conv output tile (real channels only) + per-image partial BN stats.
# ---------------------------------------------------------------------------
def _conv_stats_kernel(x_ref, w_ref, scale_ref, shift_ref, conv_ref, stats_ref,
                       xs_ref, *, apply_bn_relu):
    H, W, cout = conv_ref.shape[1], conv_ref.shape[2], conv_ref.shape[3]
    coutp = stats_ref.shape[2]          # lane-dense compute width (128)
    ckp = xs_ref.shape[-1]              # per-tap K, padded to a lane width
    cin_real = x_ref.shape[-1]
    cin_aug = cin_real + 3              # real channels + (xx, yy, rr)
    rows = H * W

    # Input tile (real channels only; no 128-channel padding in HBM).
    x = x_ref[0]
    if apply_bn_relu:                   # fused BN+ReLU of the previous layer
        x = jnp.maximum(x * scale_ref[0] + shift_ref[0], 0.0)

    # Coordinate channels: xx varies along H, yy along W, both in [-1, 1].
    # (H==1 or W==1 produces inf/nan, matching the PyTorch CoordConv spec.)
    ii = lax.broadcasted_iota(jnp.int32, (H, W), 0).astype(jnp.float32)
    jj = lax.broadcasted_iota(jnp.int32, (H, W), 1).astype(jnp.float32)
    xx = ii / (H - 1.0) * 2.0 - 1.0
    yy = jj / (W - 1.0) * 2.0 - 1.0
    rr = jnp.sqrt(jnp.square(xx - 0.5) + jnp.square(yy - 0.5))

    xa = jnp.concatenate(
        [x, xx[..., None], yy[..., None], rr[..., None],
         jnp.zeros((H, W, ckp - cin_aug), jnp.float32)], axis=-1)

    # pad=1 halo: zero ONLY the 1-wide border ring; the interior is fully
    # overwritten below (a full memset per step is wasted store bandwidth).
    zrow = jnp.zeros((1, W + 2, ckp), jnp.float32)
    zcol = jnp.zeros((H + 2, 1, ckp), jnp.float32)
    xs_ref[pl.ds(0, 1), :, :] = zrow
    xs_ref[pl.ds(H + 1, 1), :, :] = zrow
    xs_ref[:, pl.ds(0, 1), :] = zcol
    xs_ref[:, pl.ds(W + 1, 1), :] = zcol
    xs_ref[pl.ds(1, H), pl.ds(1, W), :] = xa

    # 3x3 conv = 9 lane-aligned (rows, ckp) x (ckp, coutp) bf16 MXU matmuls,
    # accumulated in f32 (weight rows beyond the real channels are zero).
    acc = jnp.zeros((rows, coutp), jnp.float32)
    tap_idx = 0
    for kh in range(3):
        for kw in range(3):
            tap = xs_ref[pl.ds(kh, H), pl.ds(kw, W), :]
            tap = tap.reshape(rows, ckp).astype(jnp.bfloat16)
            acc = acc + jnp.dot(tap, w_ref[tap_idx],
                                preferred_element_type=jnp.float32)
            tap_idx += 1

    # Store only the real output channels (intermediate stays un-padded in HBM).
    conv_ref[0] = acc[:, :cout].reshape(H, W, cout)

    # Per-image partial BN statistics: row 0 = sum, row 1 = sum of squares.
    s = jnp.sum(acc, axis=0, keepdims=True)
    sq = jnp.sum(acc * acc, axis=0, keepdims=True)
    stats_ref[0] = jnp.concatenate([s, sq], axis=0)


def _conv_stats_pass(x, w_flat, scale, shift, *, apply_bn_relu, cout):
    B, H, W, cx = x.shape
    _, ckp, coutp = w_flat.shape
    kernel = functools.partial(_conv_stats_kernel, apply_bn_relu=apply_bn_relu)
    flops = 2 * B * H * W * 9 * ckp * coutp
    bytes_accessed = (4 * x.size + 2 * w_flat.size
                      + 4 * B * H * W * cout + 4 * B * 2 * coutp)
    return pl.pallas_call(
        kernel,
        out_shape=(jax.ShapeDtypeStruct((B, H, W, cout), jnp.float32),
                   jax.ShapeDtypeStruct((B, 2, coutp), jnp.float32)),
        grid=(B,),
        in_specs=[
            pl.BlockSpec((1, H, W, cx), lambda b: (b, 0, 0, 0)),
            pl.BlockSpec((9, ckp, coutp), lambda b: (0, 0, 0)),
            pl.BlockSpec((1, cx), lambda b: (0, 0)),
            pl.BlockSpec((1, cx), lambda b: (0, 0)),
        ],
        out_specs=(
            pl.BlockSpec((1, H, W, cout), lambda b: (b, 0, 0, 0)),
            pl.BlockSpec((1, 2, coutp), lambda b: (b, 0, 0)),
        ),
        scratch_shapes=[pltpu.VMEM((H + 2, W + 2, ckp), jnp.float32)],
        compiler_params=pltpu.CompilerParams(
            dimension_semantics=("parallel",),
            vmem_limit_bytes=_vmem_limit_bytes()),
        cost_estimate=pl.CostEstimate(flops=flops, transcendentals=B * H * W,
                                      bytes_accessed=bytes_accessed),
    )(x, w_flat, scale, shift)


# ---------------------------------------------------------------------------
# Pass-2 kernel (final layer only): y = relu(conv * scale + shift),
# emitting only the real cout channels (no wrapper-side slice).
# ---------------------------------------------------------------------------
def _bn_relu_kernel(c_ref, scale_ref, shift_ref, o_ref):
    o_ref[...] = jnp.maximum(c_ref[...] * scale_ref[0] + shift_ref[0], 0.0)


def _bn_relu_pass(conv, scale, shift):
    B, H, W, cout = conv.shape
    return pl.pallas_call(
        _bn_relu_kernel,
        out_shape=jax.ShapeDtypeStruct((B, H, W, cout), jnp.float32),
        grid=(B,),
        in_specs=[
            pl.BlockSpec((1, H, W, cout), lambda b: (b, 0, 0, 0)),
            pl.BlockSpec((1, cout), lambda b: (0, 0)),
            pl.BlockSpec((1, cout), lambda b: (0, 0)),
        ],
        out_specs=pl.BlockSpec((1, H, W, cout), lambda b: (b, 0, 0, 0)),
        compiler_params=pltpu.CompilerParams(
            dimension_semantics=("parallel",),
            vmem_limit_bytes=_vmem_limit_bytes()),
        cost_estimate=pl.CostEstimate(flops=2 * B * H * W * cout,
                                      transcendentals=0,
                                      bytes_accessed=8 * B * H * W * cout),
    )(conv, scale, shift)


def _fold_bn(stats, gamma_p, beta_p, count):
    """Reduce per-image partial stats; fold BN into per-channel scale/shift."""
    total = jnp.sum(stats[:, 0, :], axis=0)
    total_sq = jnp.sum(stats[:, 1, :], axis=0)
    mean = total / count
    var = jnp.maximum(total_sq / count - mean * mean, 0.0)  # biased (training)
    scale = gamma_p * lax.rsqrt(var + _BN_EPS)
    shift = beta_p - mean * scale
    return scale, shift


def _prep(w, g, bt, cin_real, cout, coutp):
    """Pad weights to lane-aligned K and N, reshape to 9 taps, cast to bf16."""
    cin_aug = cin_real + 3
    ckp = _round_up(cin_aug, _LANES)
    wp = jnp.pad(w, ((0, 0), (0, 0), (0, ckp - cin_aug), (0, coutp - cout)))
    wp = wp.reshape(9, ckp, coutp).astype(jnp.bfloat16)
    return wp, jnp.pad(g, (0, coutp - cout)), jnp.pad(bt, (0, coutp - cout))


# ---------------------------------------------------------------------------
# Forward pass (NCHW in / NCHW out, matching the PyTorch module).
# ---------------------------------------------------------------------------
@jax.jit
def acoor_conv_forward(x_nchw, params):
    (w1, _b1, g1, bt1), (w2, _b2, g2, bt2) = params
    # Conv bias is intentionally unused: a per-channel constant is exactly
    # cancelled by the training-mode BatchNorm mean subtraction that follows
    # each conv (validated against a reference that keeps the bias).

    x = jnp.transpose(x_nchw, (0, 2, 3, 1)).astype(jnp.float32)   # NCHW -> NHWC
    B, H, W, cin = x.shape
    cout = w1.shape[-1]
    coutp = _round_up(cout, _LANES)       # lane-dense compute / stats width
    count = float(B * H * W)

    w1f, g1p, bt1p = _prep(w1, g1, bt1, cin, cout, coutp)
    w2f, g2p, bt2p = _prep(w2, g2, bt2, cout, cout, coutp)

    ones = jnp.ones((1, cin), jnp.float32)
    zeros = jnp.zeros((1, cin), jnp.float32)

    # Layer 1: conv + partial BN stats (coords / halo built in-kernel).
    conv1, stats1 = _conv_stats_pass(x, w1f, ones, zeros,
                                     apply_bn_relu=False, cout=cout)
    scale1, shift1 = _fold_bn(stats1, g1p, bt1p, count)

    # Layer 2: BN1 + ReLU fused into the conv kernel, + partial BN stats.
    conv2, stats2 = _conv_stats_pass(conv1, w2f,
                                     scale1[None, :cout], shift1[None, :cout],
                                     apply_bn_relu=True, cout=cout)
    scale2, shift2 = _fold_bn(stats2, g2p, bt2p, count)

    # Final BN2 + ReLU (real channels only; no extra slice pass).
    y = _bn_relu_pass(conv2, scale2[None, :cout], shift2[None, :cout])
    return jnp.transpose(y, (0, 3, 1, 2))                         # NHWC -> NCHW


# ---------------------------------------------------------------------------
# Deterministic parameter init (conv sees C + 3 inputs because of CoordConv).
# ---------------------------------------------------------------------------
def init_params(key, in_ch, out_ch):
    def conv_init(k, cin, cnt_out):
        fan_in = cin * 9
        bound = 1.0 / jnp.sqrt(jnp.float32(fan_in))
        kw_, kb_ = jax.random.split(k)
        w = jax.random.uniform(kw_, (3, 3, cin, cnt_out), jnp.float32, -bound, bound)
        b = jax.random.uniform(kb_, (cnt_out,), jnp.float32, -bound, bound)
        return w, b

    k1, k2 = jax.random.split(key)
    w1, b1 = conv_init(k1, in_ch + 3, out_ch)
    w2, b2 = conv_init(k2, out_ch + 3, out_ch)
    g1 = jnp.ones((out_ch,), jnp.float32)
    bt1 = jnp.zeros((out_ch,), jnp.float32)
    g2 = jnp.ones((out_ch,), jnp.float32)
    bt2 = jnp.zeros((out_ch,), jnp.float32)
    return ((w1, b1, g1, bt1), (w2, b2, g2, bt2))


# ---------------------------------------------------------------------------
# Pure-JAX reference (keeps the conv bias, uses batch-stat BN).
# `conv_dtype=bf16` mirrors the kernel's MXU operand precision exactly
# (f32 accumulation); `conv_dtype=f32` + HIGHEST is the full-precision bound.
# ---------------------------------------------------------------------------
def _add_coords_ref(x):
    B, H, W, _ = x.shape
    ii = jnp.arange(H, dtype=jnp.float32) / (H - 1.0) * 2.0 - 1.0
    jj = jnp.arange(W, dtype=jnp.float32) / (W - 1.0) * 2.0 - 1.0
    xx = jnp.broadcast_to(ii[:, None], (H, W))
    yy = jnp.broadcast_to(jj[None, :], (H, W))
    rr = jnp.sqrt(jnp.square(xx - 0.5) + jnp.square(yy - 0.5))
    coords = jnp.broadcast_to(jnp.stack([xx, yy, rr], axis=-1)[None], (B, H, W, 3))
    return jnp.concatenate([x, coords], axis=-1)


def reference_forward(x_nchw, params, conv_dtype=jnp.float32):
    def layer(x, w, b, g, bt):
        xa = _add_coords_ref(x)
        y = lax.conv_general_dilated(
            xa.astype(conv_dtype), w.astype(conv_dtype),
            window_strides=(1, 1), padding=((1, 1), (1, 1)),
            dimension_numbers=("NHWC", "HWIO", "NHWC"),
            preferred_element_type=jnp.float32,
            precision=lax.Precision.HIGHEST)
        y = y + b[None, None, None, :]
        mean = jnp.mean(y, axis=(0, 1, 2), keepdims=True)
        var = jnp.mean(jnp.square(y - mean), axis=(0, 1, 2), keepdims=True)
        y = (y - mean) * lax.rsqrt(var + _BN_EPS)
        return jnp.maximum(y * g + bt, 0.0)

    x = jnp.transpose(x_nchw, (0, 2, 3, 1)).astype(jnp.float32)
    (w1, b1, g1, bt1), (w2, b2, g2, bt2) = params
    h = layer(x, w1, b1, g1, bt1)
    h = layer(h, w2, b2, g2, bt2)
    return jnp.transpose(h, (0, 3, 1, 2))


if __name__ == "__main__":
    key = jax.random.PRNGKey(0)
    k_x, k_p = jax.random.split(key)

    B, in_ch, out_ch, H, W = 2, 4, 8, 16, 16
    x = jax.random.normal(k_x, (B, in_ch, H, W), dtype=jnp.float32)   # NCHW
    params = init_params(k_p, in_ch, out_ch)

    out = jax.block_until_ready(acoor_conv_forward(x, params))
    assert out.shape == (B, out_ch, H, W)

    # Tight check: reference convs use the same bf16 operands / f32 accumulation
    # as the kernel's MXU path.
    ref_bf16 = reference_forward(x, params, conv_dtype=jnp.bfloat16)
    err_m = float(jnp.max(jnp.abs(out - ref_bf16)))
    assert jnp.allclose(out, ref_bf16, rtol=5e-3, atol=5e-3), err_m

    # Loose sanity check vs. a full-f32 reference (bounds the bf16 MXU error).
    ref_f32 = reference_forward(x, params, conv_dtype=jnp.float32)
    err_f = float(jnp.max(jnp.abs(out - ref_f32)))
    assert jnp.allclose(out, ref_f32, rtol=5e-2, atol=5e-2), err_f

    print("KERNEL_OK")
</pallas_src>

<mosaic_0001>
module attributes {stable_mosaic.version = 11 : i64} {
  func.func @_conv_stats_kernel(%arg0: i32, %arg1: memref<1x16x16x4xf32, #tpu.memory_space<vmem>>, %arg2: memref<9x128x128xbf16, #tpu.memory_space<vmem>>, %arg3: memref<1x4xf32, #tpu.memory_space<vmem>>, %arg4: memref<1x4xf32, #tpu.memory_space<vmem>>, %arg5: memref<1x16x16x8xf32, #tpu.memory_space<vmem>>, %arg6: memref<1x2x128xf32, #tpu.memory_space<vmem>>, %arg7: memref<18x18x128xf32, #tpu.memory_space<vmem>>) attributes {dimension_semantics = [#tpu.dimension_semantics<parallel>], iteration_bounds = array<i64: 2>, scalar_prefetch = 0 : i64, scratch_operands = 1 : i64, tpu.core_type = #tpu.core_type<tc>, window_params = [{transform_indices = @transform_0, window_bounds = array<i64: 1, 16, 16, 4>}, {pipeline_mode = #tpu.pipeline_mode<synchronous>, transform_indices = @transform_1, window_bounds = array<i64: 9, 128, 128>}, {pipeline_mode = #tpu.pipeline_mode<synchronous>, transform_indices = @transform_2, window_bounds = array<i64: 1, 4>}, {pipeline_mode = #tpu.pipeline_mode<synchronous>, transform_indices = @transform_3, window_bounds = array<i64: 1, 4>}, {transform_indices = @transform_4, window_bounds = array<i64: 1, 16, 16, 8>}, {transform_indices = @transform_5, window_bounds = array<i64: 1, 2, 128>}]} {
    %c0 = arith.constant 0 : index
    %c0_0 = arith.constant 0 : index
    %c0_1 = arith.constant 0 : index
    %c0_2 = arith.constant 0 : index
    %0 = vector.load %arg1[%c0, %c0_0, %c0_1, %c0_2] : memref<1x16x16x4xf32, #tpu.memory_space<vmem>>, vector<1x16x16x4xf32>
    %1 = vector.shape_cast %0 : vector<1x16x16x4xf32> to vector<16x16x4xf32>
    %2 = tpu.iota {dimensions = array<i32: 0>} : vector<16x16xi32>
    %3 = arith.sitofp %2 : vector<16x16xi32> to vector<16x16xf32>
    %4 = tpu.iota {dimensions = array<i32: 1>} : vector<16x16xi32>
    %5 = arith.sitofp %4 : vector<16x16xi32> to vector<16x16xf32>
    %cst = arith.constant 1.500000e+01 : f32
    %6 = vector.broadcast %cst : f32 to vector<16x16xf32>
    %7 = arith.divf %3, %6 : vector<16x16xf32>
    %cst_3 = arith.constant 2.000000e+00 : f32
    %8 = vector.broadcast %cst_3 : f32 to vector<16x16xf32>
    %9 = arith.mulf %7, %8 : vector<16x16xf32>
    %cst_4 = arith.constant 1.000000e+00 : f32
    %10 = vector.broadcast %cst_4 : f32 to vector<16x16xf32>
    %11 = arith.subf %9, %10 : vector<16x16xf32>
    %cst_5 = arith.constant 1.500000e+01 : f32
    %12 = vector.broadcast %cst_5 : f32 to vector<16x16xf32>
    %13 = arith.divf %5, %12 : vector<16x16xf32>
    %cst_6 = arith.constant 2.000000e+00 : f32
    %14 = vector.broadcast %cst_6 : f32 to vector<16x16xf32>
    %15 = arith.mulf %13, %14 : vector<16x16xf32>
    %cst_7 = arith.constant 1.000000e+00 : f32
    %16 = vector.broadcast %cst_7 : f32 to vector<16x16xf32>
    %17 = arith.subf %15, %16 : vector<16x16xf32>
    %cst_8 = arith.constant 5.000000e-01 : f32
    %18 = vector.broadcast %cst_8 : f32 to vector<16x16xf32>
    %19 = arith.subf %11, %18 : vector<16x16xf32>
    %20 = arith.mulf %19, %19 : vector<16x16xf32>
    %cst_9 = arith.constant 5.000000e-01 : f32
    %21 = vector.broadcast %cst_9 : f32 to vector<16x16xf32>
    %22 = arith.subf %17, %21 : vector<16x16xf32>
    %23 = arith.mulf %22, %22 : vector<16x16xf32>
    %24 = arith.addf %20, %23 : vector<16x16xf32>
    %25 = math.sqrt %24 : vector<16x16xf32>
    %26 = vector.shape_cast %11 : vector<16x16xf32> to vector<16x16x1xf32>
    %27 = vector.shape_cast %17 : vector<16x16xf32> to vector<16x16x1xf32>
    %28 = vector.shape_cast %25 : vector<16x16xf32> to vector<16x16x1xf32>
    %cst_10 = arith.constant 0.000000e+00 : f32
    %29 = vector.broadcast %cst_10 : f32 to vector<16x16x121xf32>
    %30 = tpu.concatenate %1, %26, %27, %28, %29 in 2 : vector<16x16x4xf32>, vector<16x16x1xf32>, vector<16x16x1xf32>, vector<16x16x1xf32>, vector<16x16x121xf32> -> vector<16x16x128xf32>
    %cst_11 = arith.constant 0.000000e+00 : f32
    %31 = vector.broadcast %cst_11 : f32 to vector<1x18x128xf32>
    %cst_12 = arith.constant 0.000000e+00 : f32
    %32 = vector.broadcast %cst_12 : f32 to vector<18x1x128xf32>
    %c0_13 = arith.constant 0 : index
    %c0_14 = arith.constant 0 : index
    %c0_15 = arith.constant 0 : index
    %33 = vector.load %arg7[%c0_13, %c0_14, %c0_15] : memref<18x18x128xf32, #tpu.memory_space<vmem>>, vector<1x18x128xf32>
    tpu.vector_store %arg7[%c0_13, %c0_14, %c0_15], %31 {strides = array<i32>} : memref<18x18x128xf32, #tpu.memory_space<vmem>>, vector<1x18x128xf32>,
    %c17 = arith.constant 17 : index
    %c0_16 = arith.constant 0 : index
    %c0_17 = arith.constant 0 : index
    %34 = vector.load %arg7[%c17, %c0_16, %c0_17] : memref<18x18x128xf32, #tpu.memory_space<vmem>>, vector<1x18x128xf32>
    tpu.vector_store %arg7[%c17, %c0_16, %c0_17], %31 {strides = array<i32>} : memref<18x18x128xf32, #tpu.memory_space<vmem>>, vector<1x18x128xf32>,
    %c0_18 = arith.constant 0 : index
    %c0_19 = arith.constant 0 : index
    %c0_20 = arith.constant 0 : index
    %35 = vector.load %arg7[%c0_18, %c0_19, %c0_20] : memref<18x18x128xf32, #tpu.memory_space<vmem>>, vector<18x1x128xf32>
    tpu.vector_store %arg7[%c0_18, %c0_19, %c0_20], %32 {strides = array<i32>} : memref<18x18x128xf32, #tpu.memory_space<vmem>>, vector<18x1x128xf32>,
    %c0_21 = arith.constant 0 : index
    %c17_22 = arith.constant 17 : index
    %c0_23 = arith.constant 0 : index
    %36 = vector.load %arg7[%c0_21, %c17_22, %c0_23] : memref<18x18x128xf32, #tpu.memory_space<vmem>>, vector<18x1x128xf32>
    tpu.vector_store %arg7[%c0_21, %c17_22, %c0_23], %32 {strides = array<i32>} : memref<18x18x128xf32, #tpu.memory_space<vmem>>, vector<18x1x128xf32>,
    %c1 = arith.constant 1 : index
    %c1_24 = arith.constant 1 : index
    %c0_25 = arith.constant 0 : index
    %37 = vector.load %arg7[%c1, %c1_24, %c0_25] : memref<18x18x128xf32, #tpu.memory_space<vmem>>, vector<16x16x128xf32>
    tpu.vector_store %arg7[%c1, %c1_24, %c0_25], %30 {strides = array<i32>} : memref<18x18x128xf32, #tpu.memory_space<vmem>>, vector<16x16x128xf32>,
    %cst_26 = arith.constant 0.000000e+00 : f32
    %38 = vector.broadcast %cst_26 : f32 to vector<256x128xf32>
    %c0_27 = arith.constant 0 : index
    %c0_28 = arith.constant 0 : index
    %c0_29 = arith.constant 0 : index
    %39 = vector.load %arg7[%c0_27, %c0_28, %c0_29] : memref<18x18x128xf32, #tpu.memory_space<vmem>>, vector<16x16x128xf32>
    %40 = vector.shape_cast %39 : vector<16x16x128xf32> to vector<256x128xf32>
    %41 = arith.truncf %40 : vector<256x128xf32> to vector<256x128xbf16>
    %c0_30 = arith.constant 0 : index
    %c0_31 = arith.constant 0 : index
    %c0_32 = arith.constant 0 : index
    %42 = vector.load %arg2[%c0_30, %c0_31, %c0_32] : memref<9x128x128xbf16, #tpu.memory_space<vmem>>, vector<1x128x128xbf16>
    %43 = vector.shape_cast %42 : vector<1x128x128xbf16> to vector<128x128xbf16>
    %cst_33 = arith.constant dense<0.000000e+00> : vector<256x128xf32>
    %44 = tpu.matmul %41, %43, %cst_33 {dimension_numbers = #tpu.dot_dimension_numbers<[1], [0], [0], [1], [0, 0, 1, 1], [], []>} : vector<256x128xbf16>, vector<128x128xbf16>, vector<256x128xf32> -> vector<256x128xf32>
    %45 = arith.addf %38, %44 : vector<256x128xf32>
    %c0_34 = arith.constant 0 : index
    %c1_35 = arith.constant 1 : index
    %c0_36 = arith.constant 0 : index
    %46 = vector.load %arg7[%c0_34, %c1_35, %c0_36] : memref<18x18x128xf32, #tpu.memory_space<vmem>>, vector<16x16x128xf32>
    %47 = vector.shape_cast %46 : vector<16x16x128xf32> to vector<256x128xf32>
    %48 = arith.truncf %47 : vector<256x128xf32> to vector<256x128xbf16>
    %c1_37 = arith.constant 1 : index
    %c0_38 = arith.constant 0 : index
    %c0_39 = arith.constant 0 : index
    %49 = vector.load %arg2[%c1_37, %c0_38, %c0_39] : memref<9x128x128xbf16, #tpu.memory_space<vmem>>, vector<1x128x128xbf16>
    %50 = vector.shape_cast %49 : vector<1x128x128xbf16> to vector<128x128xbf16>
    %cst_40 = arith.constant dense<0.000000e+00> : vector<256x128xf32>
    %51 = tpu.matmul %48, %50, %cst_40 {dimension_numbers = #tpu.dot_dimension_numbers<[1], [0], [0], [1], [0, 0, 1, 1], [], []>} : vector<256x128xbf16>, vector<128x128xbf16>, vector<256x128xf32> -> vector<256x128xf32>
    %52 = arith.addf %45, %51 : vector<256x128xf32>
    %c0_41 = arith.constant 0 : index
    %c2 = arith.constant 2 : index
    %c0_42 = arith.constant 0 : index
    %53 = vector.load %arg7[%c0_41, %c2, %c0_42] : memref<18x18x128xf32, #tpu.memory_space<vmem>>, vector<16x16x128xf32>
    %54 = vector.shape_cast %53 : vector<16x16x128xf32> to vector<256x128xf32>
    %55 = arith.truncf %54 : vector<256x128xf32> to vector<256x128xbf16>
    %c2_43 = arith.constant 2 : index
    %c0_44 = arith.constant 0 : index
    %c0_45 = arith.constant 0 : index
    %56 = vector.load %arg2[%c2_43, %c0_44, %c0_45] : memref<9x128x128xbf16, #tpu.memory_space<vmem>>, vector<1x128x128xbf16>
    %57 = vector.shape_cast %56 : vector<1x128x128xbf16> to vector<128x128xbf16>
    %cst_46 = arith.constant dense<0.000000e+00> : vector<256x128xf32>
    %58 = tpu.matmul %55, %57, %cst_46 {dimension_numbers = #tpu.dot_dimension_numbers<[1], [0], [0], [1], [0, 0, 1, 1], [], []>} : vector<256x128xbf16>, vector<128x128xbf16>, vector<256x128xf32> -> vector<256x128xf32>
    %59 = arith.addf %52, %58 : vector<256x128xf32>
    %c1_47 = arith.constant 1 : index
    %c0_48 = arith.constant 0 : index
    %c0_49 = arith.constant 0 : index
    %60 = vector.load %arg7[%c1_47, %c0_48, %c0_49] : memref<18x18x128xf32, #tpu.memory_space<vmem>>, vector<16x16x128xf32>
    %61 = vector.shape_cast %60 : vector<16x16x128xf32> to vector<256x128xf32>
    %62 = arith.truncf %61 : vector<256x128xf32> to vector<256x128xbf16>
    %c3 = arith.constant 3 : index
    %c0_50 = arith.constant 0 : index
    %c0_51 = arith.constant 0 : index
    %63 = vector.load %arg2[%c3, %c0_50, %c0_51] : memref<9x128x128xbf16, #tpu.memory_space<vmem>>, vector<1x128x128xbf16>
    %64 = vector.shape_cast %63 : vector<1x128x128xbf16> to vector<128x128xbf16>
    %cst_52 = arith.constant dense<0.000000e+00> : vector<256x128xf32>
    %65 = tpu.matmul %62, %64, %cst_52 {dimension_numbers = #tpu.dot_dimension_numbers<[1], [0], [0], [1], [0, 0, 1, 1], [], []>} : vector<256x128xbf16>, vector<128x128xbf16>, vector<256x128xf32> -> vector<256x128xf32>
    %66 = arith.addf %59, %65 : vector<256x128xf32>
    %c1_53 = arith.constant 1 : index
    %c1_54 = arith.constant 1 : index
    %c0_55 = arith.constant 0 : index
    %67 = vector.load %arg7[%c1_53, %c1_54, %c0_55] : memref<18x18x128xf32, #tpu.memory_space<vmem>>, vector<16x16x128xf32>
    %68 = vector.shape_cast %67 : vector<16x16x128xf32> to vector<256x128xf32>
    %69 = arith.truncf %68 : vector<256x128xf32> to vector<256x128xbf16>
    %c4 = arith.constant 4 : index
    %c0_56 = arith.constant 0 : index
    %c0_57 = arith.constant 0 : index
    %70 = vector.load %arg2[%c4, %c0_56, %c0_57] : memref<9x128x128xbf16, #tpu.memory_space<vmem>>, vector<1x128x128xbf16>
    %71 = vector.shape_cast %70 : vector<1x128x128xbf16> to vector<128x128xbf16>
    %cst_58 = arith.constant dense<0.000000e+00> : vector<256x128xf32>
    %72 = tpu.matmul %69, %71, %cst_58 {dimension_numbers = #tpu.dot_dimension_numbers<[1], [0], [0], [1], [0, 0, 1, 1], [], []>} : vector<256x128xbf16>, vector<128x128xbf16>, vector<256x128xf32> -> vector<256x128xf32>
    %73 = arith.addf %66, %72 : vector<256x128xf32>
    %c1_59 = arith.constant 1 : index
    %c2_60 = arith.constant 2 : index
    %c0_61 = arith.constant 0 : index
    %74 = vector.load %arg7[%c1_59, %c2_60, %c0_61] : memref<18x18x128xf32, #tpu.memory_space<vmem>>, vector<16x16x128xf32>
    %75 = vector.shape_cast %74 : vector<16x16x128xf32> to vector<256x128xf32>
    %76 = arith.truncf %75 : vector<256x128xf32> to vector<256x128xbf16>
    %c5 = arith.constant 5 : index
    %c0_62 = arith.constant 0 : index
    %c0_63 = arith.constant 0 : index
    %77 = vector.load %arg2[%c5, %c0_62, %c0_63] : memref<9x128x128xbf16, #tpu.memory_space<vmem>>, vector<1x128x128xbf16>
    %78 = vector.shape_cast %77 : vector<1x128x128xbf16> to vector<128x128xbf16>
    %cst_64 = arith.constant dense<0.000000e+00> : vector<256x128xf32>
    %79 = tpu.matmul %76, %78, %cst_64 {dimension_numbers = #tpu.dot_dimension_numbers<[1], [0], [0], [1], [0, 0, 1, 1], [], []>} : vector<256x128xbf16>, vector<128x128xbf16>, vector<256x128xf32> -> vector<256x128xf32>
    %80 = arith.addf %73, %79 : vector<256x128xf32>
    %c2_65 = arith.constant 2 : index
    %c0_66 = arith.constant 0 : index
    %c0_67 = arith.constant 0 : index
    %81 = vector.load %arg7[%c2_65, %c0_66, %c0_67] : memref<18x18x128xf32, #tpu.memory_space<vmem>>, vector<16x16x128xf32>
    %82 = vector.shape_cast %81 : vector<16x16x128xf32> to vector<256x128xf32>
    %83 = arith.truncf %82 : vector<256x128xf32> to vector<256x128xbf16>
    %c6 = arith.constant 6 : index
    %c0_68 = arith.constant 0 : index
    %c0_69 = arith.constant 0 : index
    %84 = vector.load %arg2[%c6, %c0_68, %c0_69] : memref<9x128x128xbf16, #tpu.memory_space<vmem>>, vector<1x128x128xbf16>
    %85 = vector.shape_cast %84 : vector<1x128x128xbf16> to vector<128x128xbf16>
    %cst_70 = arith.constant dense<0.000000e+00> : vector<256x128xf32>
    %86 = tpu.matmul %83, %85, %cst_70 {dimension_numbers = #tpu.dot_dimension_numbers<[1], [0], [0], [1], [0, 0, 1, 1], [], []>} : vector<256x128xbf16>, vector<128x128xbf16>, vector<256x128xf32> -> vector<256x128xf32>
    %87 = arith.addf %80, %86 : vector<256x128xf32>
    %c2_71 = arith.constant 2 : index
    %c1_72 = arith.constant 1 : index
    %c0_73 = arith.constant 0 : index
    %88 = vector.load %arg7[%c2_71, %c1_72, %c0_73] : memref<18x18x128xf32, #tpu.memory_space<vmem>>, vector<16x16x128xf32>
    %89 = vector.shape_cast %88 : vector<16x16x128xf32> to vector<256x128xf32>
    %90 = arith.truncf %89 : vector<256x128xf32> to vector<256x128xbf16>
    %c7 = arith.constant 7 : index
    %c0_74 = arith.constant 0 : index
    %c0_75 = arith.constant 0 : index
    %91 = vector.load %arg2[%c7, %c0_74, %c0_75] : memref<9x128x128xbf16, #tpu.memory_space<vmem>>, vector<1x128x128xbf16>
    %92 = vector.shape_cast %91 : vector<1x128x128xbf16> to vector<128x128xbf16>
    %cst_76 = arith.constant dense<0.000000e+00> : vector<256x128xf32>
    %93 = tpu.matmul %90, %92, %cst_76 {dimension_numbers = #tpu.dot_dimension_numbers<[1], [0], [0], [1], [0, 0, 1, 1], [], []>} : vector<256x128xbf16>, vector<128x128xbf16>, vector<256x128xf32> -> vector<256x128xf32>
    %94 = arith.addf %87, %93 : vector<256x128xf32>
    %c2_77 = arith.constant 2 : index
    %c2_78 = arith.constant 2 : index
    %c0_79 = arith.constant 0 : index
    %95 = vector.load %arg7[%c2_77, %c2_78, %c0_79] : memref<18x18x128xf32, #tpu.memory_space<vmem>>, vector<16x16x128xf32>
    %96 = vector.shape_cast %95 : vector<16x16x128xf32> to vector<256x128xf32>
    %97 = arith.truncf %96 : vector<256x128xf32> to vector<256x128xbf16>
    %c8 = arith.constant 8 : index
    %c0_80 = arith.constant 0 : index
    %c0_81 = arith.constant 0 : index
    %98 = vector.load %arg2[%c8, %c0_80, %c0_81] : memref<9x128x128xbf16, #tpu.memory_space<vmem>>, vector<1x128x128xbf16>
    %99 = vector.shape_cast %98 : vector<1x128x128xbf16> to vector<128x128xbf16>
    %cst_82 = arith.constant dense<0.000000e+00> : vector<256x128xf32>
    %100 = tpu.matmul %97, %99, %cst_82 {dimension_numbers = #tpu.dot_dimension_numbers<[1], [0], [0], [1], [0, 0, 1, 1], [], []>} : vector<256x128xbf16>, vector<128x128xbf16>, vector<256x128xf32> -> vector<256x128xf32>
    %101 = arith.addf %94, %100 : vector<256x128xf32>
    %102 = vector.extract_strided_slice %101 {offsets = [0, 0], sizes = [256, 8], strides = [1, 1]} : vector<256x128xf32> to vector<256x8xf32>
    %103 = vector.shape_cast %102 : vector<256x8xf32> to vector<16x16x8xf32>
    %c0_83 = arith.constant 0 : index
    %c0_84 = arith.constant 0 : index
    %c0_85 = arith.constant 0 : index
    %c0_86 = arith.constant 0 : index
    %104 = vector.load %arg5[%c0_83, %c0_84, %c0_85, %c0_86] : memref<1x16x16x8xf32, #tpu.memory_space<vmem>>, vector<1x16x16x8xf32>
    %105 = vector.shape_cast %104 : vector<1x16x16x8xf32> to vector<16x16x8xf32>
    %106 = vector.shape_cast %103 : vector<16x16x8xf32> to vector<1x16x16x8xf32>
    tpu.vector_store %arg5[%c0_83, %c0_84, %c0_85, %c0_86], %106 {strides = array<i32>} : memref<1x16x16x8xf32, #tpu.memory_space<vmem>>, vector<1x16x16x8xf32>,
    %cst_87 = arith.constant dense<0.000000e+00> : vector<128xf32>
    %107 = vector.multi_reduction <add>, %101, %cst_87 [0] : vector<256x128xf32> to vector<128xf32>
    %108 = vector.shape_cast %107 : vector<128xf32> to vector<1x128xf32>
    %109 = arith.mulf %101, %101 : vector<256x128xf32>
    %cst_88 = arith.constant dense<0.000000e+00> : vector<128xf32>
    %110 = vector.multi_reduction <add>, %109, %cst_88 [0] : vector<256x128xf32> to vector<128xf32>
    %111 = vector.shape_cast %110 : vector<128xf32> to vector<1x128xf32>
    %112 = tpu.concatenate %108, %111 in 0 : vector<1x128xf32>, vector<1x128xf32> -> vector<2x128xf32>
    %c0_89 = arith.constant 0 : index
    %c0_90 = arith.constant 0 : index
    %c0_91 = arith.constant 0 : index
    %113 = vector.load %arg6[%c0_89, %c0_90, %c0_91] : memref<1x2x128xf32, #tpu.memory_space<vmem>>, vector<1x2x128xf32>
    %114 = vector.shape_cast %113 : vector<1x2x128xf32> to vector<2x128xf32>
    %115 = vector.shape_cast %112 : vector<2x128xf32> to vector<1x2x128xf32>
    tpu.vector_store %arg6[%c0_89, %c0_90, %c0_91], %115 {strides = array<i32>} : memref<1x2x128xf32, #tpu.memory_space<vmem>>, vector<1x2x128xf32>,
    return
  }
  func.func @transform_0(%arg0: i32) -> (i32, i32, i32, i32) {
    %c0_i32 = arith.constant 0 : i32
    %c0_i32_0 = arith.constant 0 : i32
    %c0_i32_1 = arith.constant 0 : i32
    %c0_i32_2 = arith.constant 0 : i32
    return %arg0, %c0_i32, %c0_i32_0, %c0_i32_1 : i32, i32, i32, i32
  }
  func.func @transform_1(%arg0: i32) -> (i32, i32, i32) {
    %c0_i32 = arith.constant 0 : i32
    %c0_i32_0 = arith.constant 0 : i32
    %c0_i32_1 = arith.constant 0 : i32
    %c0_i32_2 = arith.constant 0 : i32
    return %c0_i32, %c0_i32_0, %c0_i32_1 : i32, i32, i32
  }
  func.func @transform_2(%arg0: i32) -> (i32, i32) {
    %c0_i32 = arith.constant 0 : i32
    %c0_i32_0 = arith.constant 0 : i32
    %c0_i32_1 = arith.constant 0 : i32
    return %c0_i32, %c0_i32_0 : i32, i32
  }
  func.func @transform_3(%arg0: i32) -> (i32, i32) {
    %c0_i32 = arith.constant 0 : i32
    %c0_i32_0 = arith.constant 0 : i32
    %c0_i32_1 = arith.constant 0 : i32
    return %c0_i32, %c0_i32_0 : i32, i32
  }
  func.func @transform_4(%arg0: i32) -> (i32, i32, i32, i32) {
    %c0_i32 = arith.constant 0 : i32
    %c0_i32_0 = arith.constant 0 : i32
    %c0_i32_1 = arith.constant 0 : i32
    %c0_i32_2 = arith.constant 0 : i32
    return %arg0, %c0_i32, %c0_i32_0, %c0_i32_1 : i32, i32, i32, i32
  }
  func.func @transform_5(%arg0: i32) -> (i32, i32, i32) {
    %c0_i32 = arith.constant 0 : i32
    %c0_i32_0 = arith.constant 0 : i32
    %c0_i32_1 = arith.constant 0 : i32
    return %arg0, %c0_i32, %c0_i32_0 : i32, i32, i32
  }
}

module attributes {stable_mosaic.version = 11 : i64} {
  func.func @_bn_relu_kernel(%arg0: i32, %arg1: memref<1x16x16x8xf32, #tpu.memory_space<vmem>>, %arg2: memref<1x8xf32, #tpu.memory_space<vmem>>, %arg3: memref<1x8xf32, #tpu.memory_space<vmem>>, %arg4: memref<1x16x16x8xf32, #tpu.memory_space<vmem>>) attributes {dimension_semantics = [#tpu.dimension_semantics<parallel>], iteration_bounds = array<i64: 2>, scalar_prefetch = 0 : i64, scratch_operands = 0 : i64, tpu.core_type = #tpu.core_type<tc>, window_params = [{transform_indices = @transform_0, window_bounds = array<i64: 1, 16, 16, 8>}, {pipeline_mode = #tpu.pipeline_mode<synchronous>, transform_indices = @transform_1, window_bounds = array<i64: 1, 8>}, {pipeline_mode = #tpu.pipeline_mode<synchronous>, transform_indices = @transform_2, window_bounds = array<i64: 1, 8>}, {transform_indices = @transform_3, window_bounds = array<i64: 1, 16, 16, 8>}]} {
    %c0 = arith.constant 0 : index
    %c0_0 = arith.constant 0 : index
    %c0_1 = arith.constant 0 : index
    %c0_2 = arith.constant 0 : index
    %0 = vector.load %arg1[%c0, %c0_0, %c0_1, %c0_2] : memref<1x16x16x8xf32, #tpu.memory_space<vmem>>, vector<1x16x16x8xf32>
    %c0_3 = arith.constant 0 : index
    %c0_4 = arith.constant 0 : index
    %1 = vector.load %arg2[%c0_3, %c0_4] : memref<1x8xf32, #tpu.memory_space<vmem>>, vector<1x8xf32>
    %2 = vector.shape_cast %1 : vector<1x8xf32> to vector<8xf32>
    %3 = vector.shape_cast %2 : vector<8xf32> to vector<1x1x1x8xf32>
    %4 = vector.broadcast %3 : vector<1x1x1x8xf32> to vector<1x16x16x8xf32>
    %5 = arith.mulf %0, %4 : vector<1x16x16x8xf32>
    %c0_5 = arith.constant 0 : index
    %c0_6 = arith.constant 0 : index
    %6 = vector.load %arg3[%c0_5, %c0_6] : memref<1x8xf32, #tpu.memory_space<vmem>>, vector<1x8xf32>
    %7 = vector.shape_cast %6 : vector<1x8xf32> to vector<8xf32>
    %8 = vector.shape_cast %7 : vector<8xf32> to vector<1x1x1x8xf32>
    %9 = vector.broadcast %8 : vector<1x1x1x8xf32> to vector<1x16x16x8xf32>
    %10 = arith.addf %5, %9 : vector<1x16x16x8xf32>
    %cst = arith.constant 0.000000e+00 : f32
    %11 = vector.broadcast %cst : f32 to vector<1x16x16x8xf32>
    %12 = arith.maximumf %10, %11 : vector<1x16x16x8xf32>
    %c0_7 = arith.constant 0 : index
    %c0_8 = arith.constant 0 : index
    %c0_9 = arith.constant 0 : index
    %c0_10 = arith.constant 0 : index
    %13 = vector.load %arg4[%c0_7, %c0_8, %c0_9, %c0_10] : memref<1x16x16x8xf32, #tpu.memory_space<vmem>>, vector<1x16x16x8xf32>
    tpu.vector_store %arg4[%c0_7, %c0_8, %c0_9, %c0_10], %12 {strides = array<i32>} : memref<1x16x16x8xf32, #tpu.memory_space<vmem>>, vector<1x16x16x8xf32>,
    return
  }
  func.func @transform_0(%arg0: i32) -> (i32, i32, i32, i32) {
    %c0_i32 = arith.constant 0 : i32
    %c0_i32_0 = arith.constant 0 : i32
    %c0_i32_1 = arith.constant 0 : i32
    %c0_i32_2 = arith.constant 0 : i32
    return %arg0, %c0_i32, %c0_i32_0, %c0_i32_1 : i32, i32, i32, i32
  }
  func.func @transform_1(%arg0: i32) -> (i32, i32) {
    %c0_i32 = arith.constant 0 : i32
    %c0_i32_0 = arith.constant 0 : i32
    %c0_i32_1 = arith.constant 0 : i32
    return %c0_i32, %c0_i32_0 : i32, i32
  }
  func.func @transform_2(%arg0: i32) -> (i32, i32) {
    %c0_i32 = arith.constant 0 : i32
    %c0_i32_0 = arith.constant 0 : i32
    %c0_i32_1 = arith.constant 0 : i32
    return %c0_i32, %c0_i32_0 : i32, i32
  }
  func.func @transform_3(%arg0: i32) -> (i32, i32, i32, i32) {
    %c0_i32 = arith.constant 0 : i32
    %c0_i32_0 = arith.constant 0 : i32
    %c0_i32_1 = arith.constant 0 : i32
    %c0_i32_2 = arith.constant 0 : i32
    return %arg0, %c0_i32, %c0_i32_0, %c0_i32_1 : i32, i32, i32, i32
  }
}

module attributes {stable_mosaic.version = 11 : i64} {
  func.func @_conv_stats_kernel(%arg0: i32, %arg1: memref<1x16x16x8xf32, #tpu.memory_space<vmem>>, %arg2: memref<9x128x128xbf16, #tpu.memory_space<vmem>>, %arg3: memref<1x8xf32, #tpu.memory_space<vmem>>, %arg4: memref<1x8xf32, #tpu.memory_space<vmem>>, %arg5: memref<1x16x16x8xf32, #tpu.memory_space<vmem>>, %arg6: memref<1x2x128xf32, #tpu.memory_space<vmem>>, %arg7: memref<18x18x128xf32, #tpu.memory_space<vmem>>) attributes {dimension_semantics = [#tpu.dimension_semantics<parallel>], iteration_bounds = array<i64: 2>, scalar_prefetch = 0 : i64, scratch_operands = 1 : i64, tpu.core_type = #tpu.core_type<tc>, window_params = [{transform_indices = @transform_0, window_bounds = array<i64: 1, 16, 16, 8>}, {pipeline_mode = #tpu.pipeline_mode<synchronous>, transform_indices = @transform_1, window_bounds = array<i64: 9, 128, 128>}, {pipeline_mode = #tpu.pipeline_mode<synchronous>, transform_indices = @transform_2, window_bounds = array<i64: 1, 8>}, {pipeline_mode = #tpu.pipeline_mode<synchronous>, transform_indices = @transform_3, window_bounds = array<i64: 1, 8>}, {transform_indices = @transform_4, window_bounds = array<i64: 1, 16, 16, 8>}, {transform_indices = @transform_5, window_bounds = array<i64: 1, 2, 128>}]} {
    %c0 = arith.constant 0 : index
    %c0_0 = arith.constant 0 : index
    %c0_1 = arith.constant 0 : index
    %c0_2 = arith.constant 0 : index
    %0 = vector.load %arg1[%c0, %c0_0, %c0_1, %c0_2] : memref<1x16x16x8xf32, #tpu.memory_space<vmem>>, vector<1x16x16x8xf32>
    %1 = vector.shape_cast %0 : vector<1x16x16x8xf32> to vector<16x16x8xf32>
    %c0_3 = arith.constant 0 : index
    %c0_4 = arith.constant 0 : index
    %2 = vector.load %arg3[%c0_3, %c0_4] : memref<1x8xf32, #tpu.memory_space<vmem>>, vector<1x8xf32>
    %3 = vector.shape_cast %2 : vector<1x8xf32> to vector<8xf32>
    %4 = vector.shape_cast %3 : vector<8xf32> to vector<1x1x8xf32>
    %5 = vector.broadcast %4 : vector<1x1x8xf32> to vector<16x16x8xf32>
    %6 = arith.mulf %1, %5 : vector<16x16x8xf32>
    %c0_5 = arith.constant 0 : index
    %c0_6 = arith.constant 0 : index
    %7 = vector.load %arg4[%c0_5, %c0_6] : memref<1x8xf32, #tpu.memory_space<vmem>>, vector<1x8xf32>
    %8 = vector.shape_cast %7 : vector<1x8xf32> to vector<8xf32>
    %9 = vector.shape_cast %8 : vector<8xf32> to vector<1x1x8xf32>
    %10 = vector.broadcast %9 : vector<1x1x8xf32> to vector<16x16x8xf32>
    %11 = arith.addf %6, %10 : vector<16x16x8xf32>
    %cst = arith.constant 0.000000e+00 : f32
    %12 = vector.broadcast %cst : f32 to vector<16x16x8xf32>
    %13 = arith.maximumf %11, %12 : vector<16x16x8xf32>
    %14 = tpu.iota {dimensions = array<i32: 0>} : vector<16x16xi32>
    %15 = arith.sitofp %14 : vector<16x16xi32> to vector<16x16xf32>
    %16 = tpu.iota {dimensions = array<i32: 1>} : vector<16x16xi32>
    %17 = arith.sitofp %16 : vector<16x16xi32> to vector<16x16xf32>
    %cst_7 = arith.constant 1.500000e+01 : f32
    %18 = vector.broadcast %cst_7 : f32 to vector<16x16xf32>
    %19 = arith.divf %15, %18 : vector<16x16xf32>
    %cst_8 = arith.constant 2.000000e+00 : f32
    %20 = vector.broadcast %cst_8 : f32 to vector<16x16xf32>
    %21 = arith.mulf %19, %20 : vector<16x16xf32>
    %cst_9 = arith.constant 1.000000e+00 : f32
    %22 = vector.broadcast %cst_9 : f32 to vector<16x16xf32>
    %23 = arith.subf %21, %22 : vector<16x16xf32>
    %cst_10 = arith.constant 1.500000e+01 : f32
    %24 = vector.broadcast %cst_10 : f32 to vector<16x16xf32>
    %25 = arith.divf %17, %24 : vector<16x16xf32>
    %cst_11 = arith.constant 2.000000e+00 : f32
    %26 = vector.broadcast %cst_11 : f32 to vector<16x16xf32>
    %27 = arith.mulf %25, %26 : vector<16x16xf32>
    %cst_12 = arith.constant 1.000000e+00 : f32
    %28 = vector.broadcast %cst_12 : f32 to vector<16x16xf32>
    %29 = arith.subf %27, %28 : vector<16x16xf32>
    %cst_13 = arith.constant 5.000000e-01 : f32
    %30 = vector.broadcast %cst_13 : f32 to vector<16x16xf32>
    %31 = arith.subf %23, %30 : vector<16x16xf32>
    %32 = arith.mulf %31, %31 : vector<16x16xf32>
    %cst_14 = arith.constant 5.000000e-01 : f32
    %33 = vector.broadcast %cst_14 : f32 to vector<16x16xf32>
    %34 = arith.subf %29, %33 : vector<16x16xf32>
    %35 = arith.mulf %34, %34 : vector<16x16xf32>
    %36 = arith.addf %32, %35 : vector<16x16xf32>
    %37 = math.sqrt %36 : vector<16x16xf32>
    %38 = vector.shape_cast %23 : vector<16x16xf32> to vector<16x16x1xf32>
    %39 = vector.shape_cast %29 : vector<16x16xf32> to vector<16x16x1xf32>
    %40 = vector.shape_cast %37 : vector<16x16xf32> to vector<16x16x1xf32>
    %cst_15 = arith.constant 0.000000e+00 : f32
    %41 = vector.broadcast %cst_15 : f32 to vector<16x16x117xf32>
    %42 = tpu.concatenate %13, %38, %39, %40, %41 in 2 : vector<16x16x8xf32>, vector<16x16x1xf32>, vector<16x16x1xf32>, vector<16x16x1xf32>, vector<16x16x117xf32> -> vector<16x16x128xf32>
    %cst_16 = arith.constant 0.000000e+00 : f32
    %43 = vector.broadcast %cst_16 : f32 to vector<1x18x128xf32>
    %cst_17 = arith.constant 0.000000e+00 : f32
    %44 = vector.broadcast %cst_17 : f32 to vector<18x1x128xf32>
    %c0_18 = arith.constant 0 : index
    %c0_19 = arith.constant 0 : index
    %c0_20 = arith.constant 0 : index
    %45 = vector.load %arg7[%c0_18, %c0_19, %c0_20] : memref<18x18x128xf32, #tpu.memory_space<vmem>>, vector<1x18x128xf32>
    tpu.vector_store %arg7[%c0_18, %c0_19, %c0_20], %43 {strides = array<i32>} : memref<18x18x128xf32, #tpu.memory_space<vmem>>, vector<1x18x128xf32>,
    %c17 = arith.constant 17 : index
    %c0_21 = arith.constant 0 : index
    %c0_22 = arith.constant 0 : index
    %46 = vector.load %arg7[%c17, %c0_21, %c0_22] : memref<18x18x128xf32, #tpu.memory_space<vmem>>, vector<1x18x128xf32>
    tpu.vector_store %arg7[%c17, %c0_21, %c0_22], %43 {strides = array<i32>} : memref<18x18x128xf32, #tpu.memory_space<vmem>>, vector<1x18x128xf32>,
    %c0_23 = arith.constant 0 : index
    %c0_24 = arith.constant 0 : index
    %c0_25 = arith.constant 0 : index
    %47 = vector.load %arg7[%c0_23, %c0_24, %c0_25] : memref<18x18x128xf32, #tpu.memory_space<vmem>>, vector<18x1x128xf32>
    tpu.vector_store %arg7[%c0_23, %c0_24, %c0_25], %44 {strides = array<i32>} : memref<18x18x128xf32, #tpu.memory_space<vmem>>, vector<18x1x128xf32>,
    %c0_26 = arith.constant 0 : index
    %c17_27 = arith.constant 17 : index
    %c0_28 = arith.constant 0 : index
    %48 = vector.load %arg7[%c0_26, %c17_27, %c0_28] : memref<18x18x128xf32, #tpu.memory_space<vmem>>, vector<18x1x128xf32>
    tpu.vector_store %arg7[%c0_26, %c17_27, %c0_28], %44 {strides = array<i32>} : memref<18x18x128xf32, #tpu.memory_space<vmem>>, vector<18x1x128xf32>,
    %c1 = arith.constant 1 : index
    %c1_29 = arith.constant 1 : index
    %c0_30 = arith.constant 0 : index
    %49 = vector.load %arg7[%c1, %c1_29, %c0_30] : memref<18x18x128xf32, #tpu.memory_space<vmem>>, vector<16x16x128xf32>
    tpu.vector_store %arg7[%c1, %c1_29, %c0_30], %42 {strides = array<i32>} : memref<18x18x128xf32, #tpu.memory_space<vmem>>, vector<16x16x128xf32>,
    %cst_31 = arith.constant 0.000000e+00 : f32
    %50 = vector.broadcast %cst_31 : f32 to vector<256x128xf32>
    %c0_32 = arith.constant 0 : index
    %c0_33 = arith.constant 0 : index
    %c0_34 = arith.constant 0 : index
    %51 = vector.load %arg7[%c0_32, %c0_33, %c0_34] : memref<18x18x128xf32, #tpu.memory_space<vmem>>, vector<16x16x128xf32>
    %52 = vector.shape_cast %51 : vector<16x16x128xf32> to vector<256x128xf32>
    %53 = arith.truncf %52 : vector<256x128xf32> to vector<256x128xbf16>
    %c0_35 = arith.constant 0 : index
    %c0_36 = arith.constant 0 : index
    %c0_37 = arith.constant 0 : index
    %54 = vector.load %arg2[%c0_35, %c0_36, %c0_37] : memref<9x128x128xbf16, #tpu.memory_space<vmem>>, vector<1x128x128xbf16>
    %55 = vector.shape_cast %54 : vector<1x128x128xbf16> to vector<128x128xbf16>
    %cst_38 = arith.constant dense<0.000000e+00> : vector<256x128xf32>
    %56 = tpu.matmul %53, %55, %cst_38 {dimension_numbers = #tpu.dot_dimension_numbers<[1], [0], [0], [1], [0, 0, 1, 1], [], []>} : vector<256x128xbf16>, vector<128x128xbf16>, vector<256x128xf32> -> vector<256x128xf32>
    %57 = arith.addf %50, %56 : vector<256x128xf32>
    %c0_39 = arith.constant 0 : index
    %c1_40 = arith.constant 1 : index
    %c0_41 = arith.constant 0 : index
    %58 = vector.load %arg7[%c0_39, %c1_40, %c0_41] : memref<18x18x128xf32, #tpu.memory_space<vmem>>, vector<16x16x128xf32>
    %59 = vector.shape_cast %58 : vector<16x16x128xf32> to vector<256x128xf32>
    %60 = arith.truncf %59 : vector<256x128xf32> to vector<256x128xbf16>
    %c1_42 = arith.constant 1 : index
    %c0_43 = arith.constant 0 : index
    %c0_44 = arith.constant 0 : index
    %61 = vector.load %arg2[%c1_42, %c0_43, %c0_44] : memref<9x128x128xbf16, #tpu.memory_space<vmem>>, vector<1x128x128xbf16>
    %62 = vector.shape_cast %61 : vector<1x128x128xbf16> to vector<128x128xbf16>
    %cst_45 = arith.constant dense<0.000000e+00> : vector<256x128xf32>
    %63 = tpu.matmul %60, %62, %cst_45 {dimension_numbers = #tpu.dot_dimension_numbers<[1], [0], [0], [1], [0, 0, 1, 1], [], []>} : vector<256x128xbf16>, vector<128x128xbf16>, vector<256x128xf32> -> vector<256x128xf32>
    %64 = arith.addf %57, %63 : vector<256x128xf32>
    %c0_46 = arith.constant 0 : index
    %c2 = arith.constant 2 : index
    %c0_47 = arith.constant 0 : index
    %65 = vector.load %arg7[%c0_46, %c2, %c0_47] : memref<18x18x128xf32, #tpu.memory_space<vmem>>, vector<16x16x128xf32>
    %66 = vector.shape_cast %65 : vector<16x16x128xf32> to vector<256x128xf32>
    %67 = arith.truncf %66 : vector<256x128xf32> to vector<256x128xbf16>
    %c2_48 = arith.constant 2 : index
    %c0_49 = arith.constant 0 : index
    %c0_50 = arith.constant 0 : index
    %68 = vector.load %arg2[%c2_48, %c0_49, %c0_50] : memref<9x128x128xbf16, #tpu.memory_space<vmem>>, vector<1x128x128xbf16>
    %69 = vector.shape_cast %68 : vector<1x128x128xbf16> to vector<128x128xbf16>
    %cst_51 = arith.constant dense<0.000000e+00> : vector<256x128xf32>
    %70 = tpu.matmul %67, %69, %cst_51 {dimension_numbers = #tpu.dot_dimension_numbers<[1], [0], [0], [1], [0, 0, 1, 1], [], []>} : vector<256x128xbf16>, vector<128x128xbf16>, vector<256x128xf32> -> vector<256x128xf32>
    %71 = arith.addf %64, %70 : vector<256x128xf32>
    %c1_52 = arith.constant 1 : index
    %c0_53 = arith.constant 0 : index
    %c0_54 = arith.constant 0 : index
    %72 = vector.load %arg7[%c1_52, %c0_53, %c0_54] : memref<18x18x128xf32, #tpu.memory_space<vmem>>, vector<16x16x128xf32>
    %73 = vector.shape_cast %72 : vector<16x16x128xf32> to vector<256x128xf32>
    %74 = arith.truncf %73 : vector<256x128xf32> to vector<256x128xbf16>
    %c3 = arith.constant 3 : index
    %c0_55 = arith.constant 0 : index
    %c0_56 = arith.constant 0 : index
    %75 = vector.load %arg2[%c3, %c0_55, %c0_56] : memref<9x128x128xbf16, #tpu.memory_space<vmem>>, vector<1x128x128xbf16>
    %76 = vector.shape_cast %75 : vector<1x128x128xbf16> to vector<128x128xbf16>
    %cst_57 = arith.constant dense<0.000000e+00> : vector<256x128xf32>
    %77 = tpu.matmul %74, %76, %cst_57 {dimension_numbers = #tpu.dot_dimension_numbers<[1], [0], [0], [1], [0, 0, 1, 1], [], []>} : vector<256x128xbf16>, vector<128x128xbf16>, vector<256x128xf32> -> vector<256x128xf32>
    %78 = arith.addf %71, %77 : vector<256x128xf32>
    %c1_58 = arith.constant 1 : index
    %c1_59 = arith.constant 1 : index
    %c0_60 = arith.constant 0 : index
    %79 = vector.load %arg7[%c1_58, %c1_59, %c0_60] : memref<18x18x128xf32, #tpu.memory_space<vmem>>, vector<16x16x128xf32>
    %80 = vector.shape_cast %79 : vector<16x16x128xf32> to vector<256x128xf32>
    %81 = arith.truncf %80 : vector<256x128xf32> to vector<256x128xbf16>
    %c4 = arith.constant 4 : index
    %c0_61 = arith.constant 0 : index
    %c0_62 = arith.constant 0 : index
    %82 = vector.load %arg2[%c4, %c0_61, %c0_62] : memref<9x128x128xbf16, #tpu.memory_space<vmem>>, vector<1x128x128xbf16>
    %83 = vector.shape_cast %82 : vector<1x128x128xbf16> to vector<128x128xbf16>
    %cst_63 = arith.constant dense<0.000000e+00> : vector<256x128xf32>
    %84 = tpu.matmul %81, %83, %cst_63 {dimension_numbers = #tpu.dot_dimension_numbers<[1], [0], [0], [1], [0, 0, 1, 1], [], []>} : vector<256x128xbf16>, vector<128x128xbf16>, vector<256x128xf32> -> vector<256x128xf32>
    %85 = arith.addf %78, %84 : vector<256x128xf32>
    %c1_64 = arith.constant 1 : index
    %c2_65 = arith.constant 2 : index
    %c0_66 = arith.constant 0 : index
    %86 = vector.load %arg7[%c1_64, %c2_65, %c0_66] : memref<18x18x128xf32, #tpu.memory_space<vmem>>, vector<16x16x128xf32>
    %87 = vector.shape_cast %86 : vector<16x16x128xf32> to vector<256x128xf32>
    %88 = arith.truncf %87 : vector<256x128xf32> to vector<256x128xbf16>
    %c5 = arith.constant 5 : index
    %c0_67 = arith.constant 0 : index
    %c0_68 = arith.constant 0 : index
    %89 = vector.load %arg2[%c5, %c0_67, %c0_68] : memref<9x128x128xbf16, #tpu.memory_space<vmem>>, vector<1x128x128xbf16>
    %90 = vector.shape_cast %89 : vector<1x128x128xbf16> to vector<128x128xbf16>
    %cst_69 = arith.constant dense<0.000000e+00> : vector<256x128xf32>
    %91 = tpu.matmul %88, %90, %cst_69 {dimension_numbers = #tpu.dot_dimension_numbers<[1], [0], [0], [1], [0, 0, 1, 1], [], []>} : vector<256x128xbf16>, vector<128x128xbf16>, vector<256x128xf32> -> vector<256x128xf32>
    %92 = arith.addf %85, %91 : vector<256x128xf32>
    %c2_70 = arith.constant 2 : index
    %c0_71 = arith.constant 0 : index
    %c0_72 = arith.constant 0 : index
    %93 = vector.load %arg7[%c2_70, %c0_71, %c0_72] : memref<18x18x128xf32, #tpu.memory_space<vmem>>, vector<16x16x128xf32>
    %94 = vector.shape_cast %93 : vector<16x16x128xf32> to vector<256x128xf32>
    %95 = arith.truncf %94 : vector<256x128xf32> to vector<256x128xbf16>
    %c6 = arith.constant 6 : index
    %c0_73 = arith.constant 0 : index
    %c0_74 = arith.constant 0 : index
    %96 = vector.load %arg2[%c6, %c0_73, %c0_74] : memref<9x128x128xbf16, #tpu.memory_space<vmem>>, vector<1x128x128xbf16>
    %97 = vector.shape_cast %96 : vector<1x128x128xbf16> to vector<128x128xbf16>
    %cst_75 = arith.constant dense<0.000000e+00> : vector<256x128xf32>
    %98 = tpu.matmul %95, %97, %cst_75 {dimension_numbers = #tpu.dot_dimension_numbers<[1], [0], [0], [1], [0, 0, 1, 1], [], []>} : vector<256x128xbf16>, vector<128x128xbf16>, vector<256x128xf32> -> vector<256x128xf32>
    %99 = arith.addf %92, %98 : vector<256x128xf32>
    %c2_76 = arith.constant 2 : index
    %c1_77 = arith.constant 1 : index
    %c0_78 = arith.constant 0 : index
    %100 = vector.load %arg7[%c2_76, %c1_77, %c0_78] : memref<18x18x128xf32, #tpu.memory_space<vmem>>, vector<16x16x128xf32>
    %101 = vector.shape_cast %100 : vector<16x16x128xf32> to vector<256x128xf32>
    %102 = arith.truncf %101 : vector<256x128xf32> to vector<256x128xbf16>
    %c7 = arith.constant 7 : index
    %c0_79 = arith.constant 0 : index
    %c0_80 = arith.constant 0 : index
    %103 = vector.load %arg2[%c7, %c0_79, %c0_80] : memref<9x128x128xbf16, #tpu.memory_space<vmem>>, vector<1x128x128xbf16>
    %104 = vector.shape_cast %103 : vector<1x128x128xbf16> to vector<128x128xbf16>
    %cst_81 = arith.constant dense<0.000000e+00> : vector<256x128xf32>
    %105 = tpu.matmul %102, %104, %cst_81 {dimension_numbers = #tpu.dot_dimension_numbers<[1], [0], [0], [1], [0, 0, 1, 1], [], []>} : vector<256x128xbf16>, vector<128x128xbf16>, vector<256x128xf32> -> vector<256x128xf32>
    %106 = arith.addf %99, %105 : vector<256x128xf32>
    %c2_82 = arith.constant 2 : index
    %c2_83 = arith.constant 2 : index
    %c0_84 = arith.constant 0 : index
    %107 = vector.load %arg7[%c2_82, %c2_83, %c0_84] : memref<18x18x128xf32, #tpu.memory_space<vmem>>, vector<16x16x128xf32>
    %108 = vector.shape_cast %107 : vector<16x16x128xf32> to vector<256x128xf32>
    %109 = arith.truncf %108 : vector<256x128xf32> to vector<256x128xbf16>
    %c8 = arith.constant 8 : index
    %c0_85 = arith.constant 0 : index
    %c0_86 = arith.constant 0 : index
    %110 = vector.load %arg2[%c8, %c0_85, %c0_86] : memref<9x128x128xbf16, #tpu.memory_space<vmem>>, vector<1x128x128xbf16>
    %111 = vector.shape_cast %110 : vector<1x128x128xbf16> to vector<128x128xbf16>
    %cst_87 = arith.constant dense<0.000000e+00> : vector<256x128xf32>
    %112 = tpu.matmul %109, %111, %cst_87 {dimension_numbers = #tpu.dot_dimension_numbers<[1], [0], [0], [1], [0, 0, 1, 1], [], []>} : vector<256x128xbf16>, vector<128x128xbf16>, vector<256x128xf32> -> vector<256x128xf32>
    %113 = arith.addf %106, %112 : vector<256x128xf32>
    %114 = vector.extract_strided_slice %113 {offsets = [0, 0], sizes = [256, 8], strides = [1, 1]} : vector<256x128xf32> to vector<256x8xf32>
    %115 = vector.shape_cast %114 : vector<256x8xf32> to vector<16x16x8xf32>
    %c0_88 = arith.constant 0 : index
    %c0_89 = arith.constant 0 : index
    %c0_90 = arith.constant 0 : index
    %c0_91 = arith.constant 0 : index
    %116 = vector.load %arg5[%c0_88, %c0_89, %c0_90, %c0_91] : memref<1x16x16x8xf32, #tpu.memory_space<vmem>>, vector<1x16x16x8xf32>
    %117 = vector.shape_cast %116 : vector<1x16x16x8xf32> to vector<16x16x8xf32>
    %118 = vector.shape_cast %115 : vector<16x16x8xf32> to vector<1x16x16x8xf32>
    tpu.vector_store %arg5[%c0_88, %c0_89, %c0_90, %c0_91], %118 {strides = array<i32>} : memref<1x16x16x8xf32, #tpu.memory_space<vmem>>, vector<1x16x16x8xf32>,
    %cst_92 = arith.constant dense<0.000000e+00> : vector<128xf32>
    %119 = vector.multi_reduction <add>, %113, %cst_92 [0] : vector<256x128xf32> to vector<128xf32>
    %120 = vector.shape_cast %119 : vector<128xf32> to vector<1x128xf32>
    %121 = arith.mulf %113, %113 : vector<256x128xf32>
    %cst_93 = arith.constant dense<0.000000e+00> : vector<128xf32>
    %122 = vector.multi_reduction <add>, %121, %cst_93 [0] : vector<256x128xf32> to vector<128xf32>
    %123 = vector.shape_cast %122 : vector<128xf32> to vector<1x128xf32>
    %124 = tpu.concatenate %120, %123 in 0 : vector<1x128xf32>, vector<1x128xf32> -> vector<2x128xf32>
    %c0_94 = arith.constant 0 : index
    %c0_95 = arith.constant 0 : index
    %c0_96 = arith.constant 0 : index
    %125 = vector.load %arg6[%c0_94, %c0_95, %c0_96] : memref<1x2x128xf32, #tpu.memory_space<vmem>>, vector<1x2x128xf32>
    %126 = vector.shape_cast %125 : vector<1x2x128xf32> to vector<2x128xf32>
    %127 = vector.shape_cast %124 : vector<2x128xf32> to vector<1x2x128xf32>
    tpu.vector_store %arg6[%c0_94, %c0_95, %c0_96], %127 {strides = array<i32>} : memref<1x2x128xf32, #tpu.memory_space<vmem>>, vector<1x2x128xf32>,
    return
  }
  func.func @transform_0(%arg0: i32) -> (i32, i32, i32, i32) {
    %c0_i32 = arith.constant 0 : i32
    %c0_i32_0 = arith.constant 0 : i32
    %c0_i32_1 = arith.constant 0 : i32
    %c0_i32_2 = arith.constant 0 : i32
    return %arg0, %c0_i32, %c0_i32_0, %c0_i32_1 : i32, i32, i32, i32
  }
  func.func @transform_1(%arg0: i32) -> (i32, i32, i32) {
    %c0_i32 = arith.constant 0 : i32
    %c0_i32_0 = arith.constant 0 : i32
    %c0_i32_1 = arith.constant 0 : i32
    %c0_i32_2 = arith.constant 0 : i32
    return %c0_i32, %c0_i32_0, %c0_i32_1 : i32, i32, i32
  }
  func.func @transform_2(%arg0: i32) -> (i32, i32) {
    %c0_i32 = arith.constant 0 : i32
    %c0_i32_0 = arith.constant 0 : i32
    %c0_i32_1 = arith.constant 0 : i32
    return %c0_i32, %c0_i32_0 : i32, i32
  }
  func.func @transform_3(%arg0: i32) -> (i32, i32) {
    %c0_i32 = arith.constant 0 : i32
    %c0_i32_0 = arith.constant 0 : i32
    %c0_i32_1 = arith.constant 0 : i32
    return %c0_i32, %c0_i32_0 : i32, i32
  }
  func.func @transform_4(%arg0: i32) -> (i32, i32, i32, i32) {
    %c0_i32 = arith.constant 0 : i32
    %c0_i32_0 = arith.constant 0 : i32
    %c0_i32_1 = arith.constant 0 : i32
    %c0_i32_2 = arith.constant 0 : i32
    return %arg0, %c0_i32, %c0_i32_0, %c0_i32_1 : i32, i32, i32, i32
  }
  func.func @transform_5(%arg0: i32) -> (i32, i32, i32) {
    %c0_i32 = arith.constant 0 : i32
    %c0_i32_0 = arith.constant 0 : i32
    %c0_i32_1 = arith.constant 0 : i32
    return %arg0, %c0_i32, %c0_i32_0 : i32, i32, i32
  }
}

</mosaic_0001>

<bundles_post_ra>
// kernel: acoor_conv_forward.5
= control target key start
LH: loop header
LB: loop body
LE: loop exit
PB: predicated region body
PF: predicated region fallthrough
CT: control target
= control target key end

     0   :  { %s452_s12 = smov 0   ;;  %s643_s0 = inlined_call_operand.vmem [shape: f32[2,16,16,8], index: 0, kind: input, shape index: {}]   ;;  %s644_s1 = inlined_call_operand.vmem [shape: f32[1,8], index: 1, kind: input, shape index: {}]   ;;  %s645_s2 = inlined_call_operand.vmem [shape: f32[1,8], index: 2, kind: input, shape index: {}]   ;;  %s646_s3 = inlined_call_operand.vmem [shape: f32[2,16,16,8], index: 3, kind: output, shape index: {}]  }
   0x1 LB: > { %s401_s13 = sadd.s32 4294967295, %s430_s12   ;;  %p405_p0 = scmp.ge.s32.totalorder %s430_s12, 1  ;;  %s430_s12 = sphi %s452_s12, %s13_s12  }
   0x2   : > { %p137_p1 = scmp.lt.s32.totalorder %s430_s12, 3 }
   0x4   : > { %p138_p2 = pnand %p405_p0, %p137_p1 }
   0x5   : > { %p161_p3 = scmp.lt.s32.totalorder (!%p138_p2), %s401_s13, 1  ;;  %v463_v0 = vld [vmem:[%s644_s1] ss:$0 sm:$0xff] (!%p138_p2)  ;;  %vm313_vm0 = vcmask (!%p138_p2), 64512  }
   0x6   : > { %141 = sbr.rel (%p138_p2) target bundleno = 46 (0x2e), region = 32  ;;  %v473_v1 = vld [vmem:[%s645_s2] ss:$0 sm:$0xff] (!%p138_p2) }
   0xd   : > { %s648_s13 = smov (!%p161_p3, %s401_s13), 1 }
   0xe   : > { %s414_s14 = sshll.u32 %s648_s13, 8 }
   0xf   : > { %s468_s19 = scalar_lea.vmem %s643_s0, %s414_s14  ;;  %s496_s24 = scalar_lea.vmem %s646_s3, %s414_s14 }
  0x10   : > { %v171_v2 = vld [vmem:[%s468_s19] sm:$0xff]  ;;  %v172_v3 = vld [vmem:[%s468_s19 + $0x8] sm:$0xff]  ;;  %v173_v4 = vld [vmem:[%s468_s19 + $0x10] sm:$0xff] }
  0x11   : > { %v210_v5 = vmul.f32 %v463_v0, %v171_v2  ;;  %v211_v6 = vmul.f32 %v463_v0, %v172_v3  ;;  %v212_v7 = vmul.f32 %v463_v0, %v173_v4  ;;  %v174_v8 = vld [vmem:[%s468_s19 + $0x18] sm:$0xff]  ;;  %v175_v9 = vld [vmem:[%s468_s19 + $0x20] sm:$0xff]  ;;  %v176_v10 = vld [vmem:[%s468_s19 + $0x28] sm:$0xff] }
  0x12   : > { %v213_v11 = vmul.f32 %v463_v0, %v174_v8  ;;  %v214_v12 = vmul.f32 %v463_v0, %v175_v9  ;;  %v215_v13 = vmul.f32 %v463_v0, %v176_v10  ;;  %v177_v14 = vld [vmem:[%s468_s19 + $0x30] sm:$0xff]  ;;  %v178_v15 = vld [vmem:[%s468_s19 + $0x38] sm:$0xff]  ;;  %v179_v24 = vld [vmem:[%s468_s19 + $0x40] sm:$0xff] }
  0x13   : > { %v249_v16 = vadd.f32 %v473_v1, %v210_v5  ;;  %v250_v17 = vadd.f32 %v473_v1, %v211_v6  ;;  %v251_v18 = vadd.f32 %v473_v1, %v212_v7  ;;  %v216_v19 = vmul.f32 %v463_v0, %v177_v14  ;;  %v180_v25 = vld [vmem:[%s468_s19 + $0x48] sm:$0xff]  ;;  %v181_v26 = vld [vmem:[%s468_s19 + $0x50] sm:$0xff]  ;;  %v182_v31 = vld [vmem:[%s468_s19 + $0x58] sm:$0xff] }
  0x14   : > { %v252_v20 = vadd.f32 %v473_v1, %v213_v11  ;;  %v253_v21 = vadd.f32 %v473_v1, %v214_v12  ;;  %v254_v22 = vadd.f32 %v473_v1, %v215_v13  ;;  %v217_v23 = vmul.f32 %v463_v0, %v178_v15  ;;  %v183_v32 = vld [vmem:[%s468_s19 + $0x60] sm:$0xff]  ;;  %v184_v33 = vld [vmem:[%s468_s19 + $0x68] sm:$0xff]  ;;  %v185_v38 = vld [vmem:[%s468_s19 + $0x70] sm:$0xff] }
  0x15   : > { %v281_v27 = vmax.f32 %v249_v16, 0.0  ;;  %v282_v28 = vmax.f32 %v250_v17, 0.0  ;;  %v283_v29 = vmax.f32 %v251_v18, 0.0  ;;  %v255_v30 = vadd.f32 %v473_v1, %v216_v19  ;;  %v186_v43 = vld [vmem:[%s468_s19 + $0x78] sm:$0xff]  ;;  %v187_v56 = vld [vmem:[%s468_s19 + $0x80] sm:$0xff]  ;;  %v188_v57 = vld [vmem:[%s468_s19 + $0x88] sm:$0xff] }
  0x16   : > { %v284_v34 = vmax.f32 %v252_v20, 0.0  ;;  %v285_v35 = vmax.f32 %v253_v21, 0.0  ;;  %v286_v36 = vmax.f32 %v254_v22, 0.0  ;;  %v256_v37 = vadd.f32 %v473_v1, %v217_v23  ;;  %v189_v58 = vld [vmem:[%s468_s19 + $0x90] sm:$0xff]  ;;  %v190_v63 = vld [vmem:[%s468_s19 + $0x98] sm:$0xff]  ;;  %v191_v2 = vld [vmem:[%s468_s19 + $0xa0] sm:$0xff] }
  0x17   : > { %314 = vst.msk [vmem:[%s496_s24] sm:$0xff] %vm313_vm0, %v281_v27  ;;  %315 = vst.msk [vmem:[%s496_s24 + $0x8] sm:$0xff] %vm313_vm0, %v282_v28  ;;  %v287_v39 = vmax.f32 %v255_v30, 0.0  ;;  %v218_v40 = vmul.f32 %v463_v0, %v179_v24  ;;  %v219_v41 = vmul.f32 %v463_v0, %v180_v25  ;;  %v220_v42 = vmul.f32 %v463_v0, %v181_v26  ;;  %v192_v3 = vld [vmem:[%s468_s19 + $0xa8] sm:$0xff]  ;;  %v193_v8 = vld [vmem:[%s468_s19 + $0xb0] sm:$0xff] }
  0x18   : > { %316 = vst.msk [vmem:[%s496_s24 + $0x10] sm:$0xff] %vm313_vm0, %v283_v29  ;;  %317 = vst.msk [vmem:[%s496_s24 + $0x18] sm:$0xff] %vm313_vm0, %v284_v34  ;;  %v288_v44 = vmax.f32 %v256_v37, 0.0  ;;  %v221_v45 = vmul.f32 %v463_v0, %v182_v31  ;;  %v222_v46 = vmul.f32 %v463_v0, %v183_v32  ;;  %v223_v47 = vmul.f32 %v463_v0, %v184_v33  ;;  %v194_v13 = vld [vmem:[%s468_s19 + $0xb8] sm:$0xff]  ;;  %v195_v26 = vld [vmem:[%s468_s19 + $0xc0] sm:$0xff] }
  0x19   : > { %318 = vst.msk [vmem:[%s496_s24 + $0x20] sm:$0xff] %vm313_vm0, %v285_v35  ;;  %319 = vst.msk [vmem:[%s496_s24 + $0x28] sm:$0xff] %vm313_vm0, %v286_v36  ;;  %v257_v48 = vadd.f32 %v473_v1, %v218_v40  ;;  %v258_v49 = vadd.f32 %v473_v1, %v219_v41  ;;  %v259_v50 = vadd.f32 %v473_v1, %v220_v42  ;;  %v196_v27 = vld [vmem:[%s468_s19 + $0xc8] sm:$0xff]  ;;  %v197_v28 = vld [vmem:[%s468_s19 + $0xd0] sm:$0xff] }
  0x1a   : > { %320 = vst.msk [vmem:[%s496_s24 + $0x30] sm:$0xff] %vm313_vm0, %v287_v39  ;;  %v224_v51 = vmul.f32 %v463_v0, %v185_v38  ;;  %321 = vst.msk [vmem:[%s496_s24 + $0x38] sm:$0xff] %vm313_vm0, %v288_v44  ;;  %v260_v52 = vadd.f32 %v473_v1, %v221_v45  ;;  %v261_v53 = vadd.f32 %v473_v1, %v222_v46  ;;  %v198_v33 = vld [vmem:[%s468_s19 + $0xd8] sm:$0xff]  ;;  %v199_v34 = vld [vmem:[%s468_s19 + $0xe0] sm:$0xff] }
  0x1b   : > { %v262_v54 = vadd.f32 %v473_v1, %v223_v47  ;;  %v225_v55 = vmul.f32 %v463_v0, %v186_v43  ;;  %v289_v59 = vmax.f32 %v257_v48, 0.0  ;;  %v290_v60 = vmax.f32 %v258_v49, 0.0  ;;  %v200_v35 = vld [vmem:[%s468_s19 + $0xe8] sm:$0xff]  ;;  %v201_v40 = vld [vmem:[%s468_s19 + $0xf0] sm:$0xff]  ;;  %v202_v45 = vld [vmem:[%s468_s19 + $0xf8] sm:$0xff] }
  0x1c   : > { %v291_v61 = vmax.f32 %v259_v50, 0.0  ;;  %v263_v62 = vadd.f32 %v473_v1, %v224_v51  ;;  %v292_v4 = vmax.f32 %v260_v52, 0.0  ;;  %v293_v5 = vmax.f32 %v261_v53, 0.0 }
  0x1d   : > { %v294_v6 = vmax.f32 %v262_v54, 0.0  ;;  %v264_v7 = vadd.f32 %v473_v1, %v225_v55  ;;  %322 = vst.msk [vmem:[%s496_s24 + $0x40] sm:$0xff] %vm313_vm0, %v289_v59  ;;  %323 = vst.msk [vmem:[%s496_s24 + $0x48] sm:$0xff] %vm313_vm0, %v290_v60  ;;  %v226_v10 = vmul.f32 %v463_v0, %v187_v56  ;;  %v227_v11 = vmul.f32 %v463_v0, %v188_v57 }
  0x1e   : > { %324 = vst.msk [vmem:[%s496_s24 + $0x50] sm:$0xff] %vm313_vm0, %v291_v61  ;;  %v295_v9 = vmax.f32 %v263_v62, 0.0  ;;  %v228_v12 = vmul.f32 %v463_v0, %v189_v58  ;;  %325 = vst.msk [vmem:[%s496_s24 + $0x58] sm:$0xff] %vm313_vm0, %v292_v4  ;;  %v229_v15 = vmul.f32 %v463_v0, %v190_v63  ;;  %v230_v16 = vmul.f32 %v463_v0, %v191_v2 }
  0x1f   : > { %326 = vst.msk [vmem:[%s496_s24 + $0x60] sm:$0xff] %vm313_vm0, %v293_v5  ;;  %327 = vst.msk [vmem:[%s496_s24 + $0x68] sm:$0xff] %vm313_vm0, %v294_v6  ;;  %v296_v14 = vmax.f32 %v264_v7, 0.0  ;;  %v231_v17 = vmul.f32 %v463_v0, %v192_v3  ;;  %v265_v18 = vadd.f32 %v473_v1, %v226_v10  ;;  %v266_v19 = vadd.f32 %v473_v1, %v227_v11 }
  0x20   : > { %328 = vst.msk [vmem:[%s496_s24 + $0x70] sm:$0xff] %vm313_vm0, %v295_v9  ;;  %v267_v20 = vadd.f32 %v473_v1, %v228_v12  ;;  %v232_v21 = vmul.f32 %v463_v0, %v193_v8  ;;  %v268_v22 = vadd.f32 %v473_v1, %v229_v15  ;;  %v269_v23 = vadd.f32 %v473_v1, %v230_v16 }
  0x21   : > { %329 = vst.msk [vmem:[%s496_s24 + $0x78] sm:$0xff] %vm313_vm0, %v296_v14  ;;  %v270_v24 = vadd.f32 %v473_v1, %v231_v17  ;;  %v233_v25 = vmul.f32 %v463_v0, %v194_v13  ;;  %v297_v29 = vmax.f32 %v265_v18, 0.0  ;;  %v298_v30 = vmax.f32 %v266_v19, 0.0 }
  0x22   : > { %v299_v31 = vmax.f32 %v267_v20, 0.0  ;;  %v271_v32 = vadd.f32 %v473_v1, %v232_v21  ;;  %v300_v36 = vmax.f32 %v268_v22, 0.0  ;;  %v301_v37 = vmax.f32 %v269_v23, 0.0 }
  0x23   : > { %v302_v38 = vmax.f32 %v270_v24, 0.0  ;;  %v272_v39 = vadd.f32 %v473_v1, %v233_v25  ;;  %330 = vst.msk [vmem:[%s496_s24 + $0x80] sm:$0xff] %vm313_vm0, %v297_v29  ;;  %331 = vst.msk [vmem:[%s496_s24 + $0x88] sm:$0xff] %vm313_vm0, %v298_v30  ;;  %v234_v42 = vmul.f32 %v463_v0, %v195_v26  ;;  %v235_v43 = vmul.f32 %v463_v0, %v196_v27 }
  0x24   : > { %332 = vst.msk [vmem:[%s496_s24 + $0x90] sm:$0xff] %vm313_vm0, %v299_v31  ;;  %v303_v41 = vmax.f32 %v271_v32, 0.0  ;;  %v236_v44 = vmul.f32 %v463_v0, %v197_v28  ;;  %333 = vst.msk [vmem:[%s496_s24 + $0x98] sm:$0xff] %vm313_vm0, %v300_v36  ;;  %v237_v47 = vmul.f32 %v463_v0, %v198_v33  ;;  %v238_v48 = vmul.f32 %v463_v0, %v199_v34 }
  0x25   : > { %334 = vst.msk [vmem:[%s496_s24 + $0xa0] sm:$0xff] %vm313_vm0, %v301_v37  ;;  %335 = vst.msk [vmem:[%s496_s24 + $0xa8] sm:$0xff] %vm313_vm0, %v302_v38  ;;  %v304_v46 = vmax.f32 %v272_v39, 0.0  ;;  %v239_v49 = vmul.f32 %v463_v0, %v200_v35  ;;  %v273_v50 = vadd.f32 %v473_v1, %v234_v42  ;;  %v274_v51 = vadd.f32 %v473_v1, %v235_v43 }
  0x26   : > { %336 = vst.msk [vmem:[%s496_s24 + $0xb0] sm:$0xff] %vm313_vm0, %v303_v41  ;;  %v275_v52 = vadd.f32 %v473_v1, %v236_v44  ;;  %v240_v53 = vmul.f32 %v463_v0, %v201_v40  ;;  %v276_v54 = vadd.f32 %v473_v1, %v237_v47  ;;  %v277_v55 = vadd.f32 %v473_v1, %v238_v48 }
  0x27   : > { %337 = vst.msk [vmem:[%s496_s24 + $0xb8] sm:$0xff] %vm313_vm0, %v304_v46  ;;  %v278_v56 = vadd.f32 %v473_v1, %v239_v49  ;;  %v241_v57 = vmul.f32 %v463_v0, %v202_v45  ;;  %v305_v58 = vmax.f32 %v273_v50, 0.0  ;;  %v306_v59 = vmax.f32 %v274_v51, 0.0 }
  0x28   : > { %v307_v60 = vmax.f32 %v275_v52, 0.0  ;;  %v279_v61 = vadd.f32 %v473_v1, %v240_v53  ;;  %v308_v62 = vmax.f32 %v276_v54, 0.0  ;;  %v309_v63 = vmax.f32 %v277_v55, 0.0 }
  0x29   : > { %v310_v2 = vmax.f32 %v278_v56, 0.0  ;;  %v280_v3 = vadd.f32 %v473_v1, %v241_v57  ;;  %338 = vst.msk [vmem:[%s496_s24 + $0xc0] sm:$0xff] %vm313_vm0, %v305_v58  ;;  %339 = vst.msk [vmem:[%s496_s24 + $0xc8] sm:$0xff] %vm313_vm0, %v306_v59 }
  0x2a   : > { %340 = vst.msk [vmem:[%s496_s24 + $0xd0] sm:$0xff] %vm313_vm0, %v307_v60  ;;  %v311_v4 = vmax.f32 %v279_v61, 0.0  ;;  %341 = vst.msk [vmem:[%s496_s24 + $0xd8] sm:$0xff] %vm313_vm0, %v308_v62 }
  0x2b   : > { %342 = vst.msk [vmem:[%s496_s24 + $0xe0] sm:$0xff] %vm313_vm0, %v309_v63  ;;  %343 = vst.msk [vmem:[%s496_s24 + $0xe8] sm:$0xff] %vm313_vm0, %v310_v2  ;;  %v312_v0 = vmax.f32 %v280_v3, 0.0 }
  0x2c   : > { %344 = vst.msk [vmem:[%s496_s24 + $0xf0] sm:$0xff] %vm313_vm0, %v311_v4 }
  0x2d   : > { %345 = vst.msk [vmem:[%s496_s24 + $0xf8] sm:$0xff] %vm313_vm0, %v312_v0 }
  0x2e PF: > { %s13_s12 = sadd.s32 1, %s430_s12  }
  0x2f   : > { %p10_p4 = scmp.ge.s32.totalorder %s13_s12, 4  }
  0x31   :  { %12 = sbr.rel (!%p10_p4) target bundleno = 1 (0x1), region = 62 }

// kernel: acoor_conv_forward.3
= control target key start
LH: loop header
LB: loop body
LE: loop exit
PB: predicated region body
PF: predicated region fallthrough
CT: control target
= control target key end

     0   :  { %s5024_s18 = smov 0   ;;  %s6026_s0 = inlined_call_operand.vmem [shape: f32[2,16,16,4], index: 0, kind: input, shape index: {}]   ;;  %s6027_s1 = inlined_call_operand.vmem [shape: bf16[9,128,128], index: 1, kind: input, shape index: {}]   ;;  %s6028_s2 = inlined_call_operand.vmem [shape: f32[1,4], index: 2, kind: input, shape index: {}]   ;;  %s6029_s3 = inlined_call_operand.vmem [shape: f32[1,4], index: 3, kind: input, shape index: {}]   ;;  %s6030_s4 = inlined_call_operand.vmem [shape: f32[2,16,16,8], index: 4, kind: output, shape index: {0}]   ;;  %s6031_s5 = inlined_call_operand.vmem [shape: f32[2,2,128], index: 5, kind: output, shape index: {1}]  }
   0x1 LB: > { %s3682_s2 = sadd.s32 4294967295, %s4991_s18   ;;  %p3686_p0 = scmp.ge.s32.totalorder %s4991_s18, 1  ;;  %s4991_s18 = sphi %s5024_s18, %s16_s18  }
   0x2   : > { %p190_p1 = scmp.lt.s32.totalorder %s4991_s18, 3 }
   0x4   : > { %p191_p2 = pnand %p3686_p0, %p190_p1 }
   0x5   : > { %v269_v0 = vlaneseq (!%p191_p2)  ;;  %v4831_v1 = vld [vmem:[%s6027_s1 + $0x40] sm:$0xff] (!%p191_p2)   ;;  %v4833_v5 = vld [vmem:[%s6027_s1 + $0x48] sm:$0xff] (!%p191_p2)   ;;  %v4835_v10 = vld [vmem:[%s6027_s1 + $0x50] sm:$0xff] (!%p191_p2)   ;;  %v4993_v49 = vmov (!%p191_p2), 0.0   ;;  %p222_p3 = scmp.lt.s32.totalorder (!%p191_p2), %s3682_s2, 1  ;;  %vm556_vm2 = vcmask (!%p191_p2), 31744  }
   0x6   : > { %194 = sbr.rel (%p191_p2) target bundleno = 685 (0x2ad), region = 36  ;;  %v4832_v2 = vld [vmem:[%s6027_s1 + $0x100] sm:$0xff] (!%p191_p2)   ;;  %4118 = vmatprep.subr.bf16.mxu1 (!%p191_p2), %v4831_v1  ;;  %v4834_v9 = vld [vmem:[%s6027_s1 + $0x108] sm:$0xff] (!%p191_p2)   ;;  %v4836_v13 = vld [vmem:[%s6027_s1 + $0x110] sm:$0xff] (!%p191_p2)   ;;  %688 = vst [vmem:[#allocation2] sm:$0xff] (!%p191_p2), %v4993_v49  ;;  %vm589_vm5 = vcmask (!%p191_p2), 39936  }
   0x7   : > { %v275_v3 = vand.u32 (!%p191_p2), 127, %v269_v0  ;;  %v270_v4 = vshrl.u32 (!%p191_p2), %v269_v0, 7  ;;  %4119 = vmatpush3.bf16.msra.mxu1 (!%p191_p2), %v4831_v1  ;;  %4310 = vmatprep.subr.bf16.mxu0 (!%p191_p2), %v4832_v2  ;;  %v4837_v17 = vld [vmem:[%s6027_s1 + $0x58] sm:$0xff] (!%p191_p2)   ;;  %v4839_v26 = vld [vmem:[%s6027_s1 + $0x60] sm:$0xff] (!%p191_p2)   ;;  %v4841_v33 = vld [vmem:[%s6027_s1 + $0x68] sm:$0xff] (!%p191_p2)   ;;  %689 = vst [vmem:[#allocation2 + $0x8] sm:$0xff] (!%p191_p2), %v4993_v49 }
   0x8   : > { %4311 = vmatpush3.bf16.msra.mxu0 (!%p191_p2), %v4832_v2  ;;  %4120 = vmatprep.subr.bf16.mxu1 (!%p191_p2), %v4833_v5  ;;  %v4838_v21 = vld [vmem:[%s6027_s1 + $0x118] sm:$0xff] (!%p191_p2)   ;;  %v4840_v32 = vld [vmem:[%s6027_s1 + $0x120] sm:$0xff] (!%p191_p2)   ;;  %v4842_v43 = vld [vmem:[%s6027_s1 + $0x128] sm:$0xff] (!%p191_p2)   ;;  %690 = vst [vmem:[#allocation2 + $0x10] sm:$0x3] (!%p191_p2), %v4993_v49  ;;  %vm622_vm6 = vcmask (!%p191_p2), 48128  }
   0x9   : > { %v276_v6 = vcvt.s32.f32 (!%p191_p2), %v275_v3  ;;  %v271_v7 = vadd.s32 (!%p191_p2), 8, %v270_v4  ;;  %v272_v8 = vcvt.s32.f32 (!%p191_p2), %v270_v4  ;;  %4312 = vmatprep.subr.bf16.mxu0 (!%p191_p2), %v4834_v9  ;;  %v5055_v20 = vsub.s32 (!%p191_p2), 1, %v270_v4  ;;  %v5114_v45 = vld [vmem:[%s6027_s1 + $0x70] sm:$0xff] (!%p191_p2)   ;;  %692 = vst [vmem:[#allocation2 + $0x198] sm:$0xff] (!%p191_p2), %v4993_v49  ;;  %693 = vst [vmem:[#allocation2 + $0x1a0] sm:$0xff] (!%p191_p2), %v4993_v49  ;;  %v4845_v57 = vld [vmem:[%s6027_s1 + $0x78] sm:$0xff] (!%p191_p2)  }
   0xa   : > { %v5070_v29 = vsub.s32 (!%p191_p2), 0, %v270_v4  ;;  %v5081_v34 = vsub.s32 (!%p191_p2), 2, %v270_v4  ;;  %v5083_v35 = vsub.s32 (!%p191_p2), 3, %v270_v4  ;;  %v5086_v36 = vsub.s32 (!%p191_p2), 4, %v270_v4  ;;  %694 = vst [vmem:[#allocation2 + $0x1a8] sm:$0x3] (!%p191_p2), %v4993_v49 }
   0xb   : > { %v284_v11 = vmul.f32 (!%p191_p2), 0.06666667, %v276_v6  ;;  %v278_v12 = vmul.f32 (!%p191_p2), 0.06666667, %v272_v8  ;;  %4121 = vmatpush3.bf16.msra.mxu1 (!%p191_p2), %v4833_v5  ;;  %v273_v15 = vcvt.s32.f32 (!%p191_p2), %v271_v7  ;;  %v5102_v41 = vsub.s32 (!%p191_p2), 5, %v270_v4  ;;  %v4844_v54 = vld [vmem:[%s6027_s1 + $0x130] sm:$0xff] (!%p191_p2)  }
   0xc   : > { %4122 = vmatprep.subr.bf16.mxu1 (!%p191_p2), %v4835_v10  ;;  %4313 = vmatpush3.bf16.msra.mxu0 (!%p191_p2), %v4834_v9  ;;  %v5104_v42 = vsub.s32 (!%p191_p2), 6, %v270_v4  ;;  %v5109_v44 = vsub.s32 (!%p191_p2), 7, %v270_v4  ;;  %696 = vst [vmem:[#allocation2 + $0x18] sm:$0x1] (!%p191_p2), %v4993_v49  ;;  %697 = vst [vmem:[#allocation2 + $0x30] sm:$0x1] (!%p191_p2), %v4993_v49 }
   0xd   : > { %v285_v14 = vmul.f32 2.0, %v284_v11  ;;  %v280_v16 = vmul.f32 2.0, %v278_v12  ;;  %4314 = vmatprep.subr.bf16.mxu0 %v4836_v13  ;;  %v279_v22 = vmul.f32 0.06666667, %v273_v15  ;;  %698 = vst [vmem:[#allocation2 + $0x48] sm:$0x1] %v4993_v49 }
   0xe   : > { %699 = vst [vmem:[#allocation2 + $0x60] sm:$0x1] %v4993_v49  ;;  %700 = vst [vmem:[#allocation2 + $0x78] sm:$0x1] %v4993_v49  ;;  %v4846_v1 = vld [vmem:[%s6027_s1 + $0x138] sm:$0xff]   ;;  %v828_v3 = vld [vmem:[#allocation2 + $0x1] sm:$0xff] }
   0xf   : > { %v3694_v18 = vadd.f32 -1.0, %v285_v14  ;;  %v5053_v19 = vadd.f32 -1.0, %v280_v16  ;;  %4123 = vmatpush3.bf16.msra.mxu1 %v4835_v10  ;;  %v281_v30 = vmul.f32 2.0, %v279_v22  ;;  %701 = vst [vmem:[#allocation2 + $0x90] sm:$0x1] %v4993_v49  ;;  %v829_v4 = vld [vmem:[#allocation2 + $0x9] sm:$0xff] }
  0x10   : > { %4124 = vmatprep.subr.bf16.mxu1 %v4837_v17  ;;  %4315 = vmatpush3.bf16.msra.mxu0 %v4836_v13  ;;  %702 = vst [vmem:[#allocation2 + $0xa8] sm:$0x1] %v4993_v49  ;;  %703 = vst [vmem:[#allocation2 + $0xc0] sm:$0x1] %v4993_v49  ;;  %v860_v6 = vpack.c.bf16 %v829_v4, %v828_v3  ;;  %v5187_v9 = vld [vmem:[%s6027_s1 + $0x140] sm:$0xff]   ;;  %s6035_s2 = smov (!%p222_p3, %s3682_s2), 1 }
  0x11   : > { %374 = vbcast.lane.b32.xlu0 %v3694_v18, 256  ;;  %v3695_v23 = vadd.f32 -0.5, %v5053_v19  ;;  %v3697_v24 = vadd.f32 -0.5, %v3694_v18  ;;  %v5063_v25 = vrot.slane %v5053_v19, %v5055_v20  ;;  %4316 = vmatprep.subr.bf16.mxu0 %v4838_v21  ;;  %v5090_v37 = vrot.slane %v5053_v19, %v5070_v29  ;;  %704 = vst [vmem:[#allocation2 + $0xd8] sm:$0x1] %v4993_v49  ;;  %v5201_v14 = vld [vmem:[%s6027_s1] sm:$0xff]  }
  0x12   : > { %v5094_v38 = vrot.slane %v5053_v19, %v5081_v34  ;;  %v5098_v39 = vrot.slane %v5053_v19, %v5083_v35  ;;  %v5100_v40 = vadd.f32 -1.0, %v281_v30  ;;  %v5118_v46 = vrot.slane %v5053_v19, %v5086_v36  ;;  %705 = vst [vmem:[#allocation2 + $0xf0] sm:$0x1] %v4993_v49  ;;  %706 = vst [vmem:[#allocation2 + $0x108] sm:$0x1] %v4993_v49  ;;  %s3900_s29 = sshll.u32 %s6035_s2, 8 }
  0x13   : > { %v289_v27 = vmul.f32 %v3695_v23, %v3695_v23  ;;  %v5068_v28 = vmul.f32 %v3697_v24, %v3697_v24  ;;  %4125 = vmatpush3.bf16.msra.mxu1 %v4837_v17  ;;  %v5122_v47 = vrot.slane %v5053_v19, %v5102_v41  ;;  %v5126_v48 = vrot.slane %v5053_v19, %v5104_v42  ;;  %s5211_s7 = scalar_lea.vmem %s6026_s0, %s3900_s29  ;;  %s5948_s15 = scalar_lea.vmem %s6030_s4, %s3900_s29 }
  0x14   : > { %4126 = vmatprep.subr.bf16.mxu1 %v4839_v26  ;;  %4317 = vmatpush3.bf16.msra.mxu0 %v4838_v21  ;;  %707 = vst [vmem:[#allocation2 + $0x120] sm:$0x1] %v4993_v49  ;;  %708 = vst [vmem:[#allocation2 + $0x138] sm:$0x1] %v4993_v49  ;;  %v5130_v50 = vrot.slane %v5053_v19, %v5109_v44  ;;  %v5134_v51 = vrot.slane %v5100_v40, %v5070_v29  ;;  %v3696_v53 = vadd.f32 -0.5, %v5100_v40  ;;  %v268_v16 = vld [vmem:[%s5211_s7 + $0xf8] sm:$0xff] }
  0x15   : > { %v5073_v31 = vadd.f32 %v5068_v28, %v289_v27  ;;  %378 = vbcast.lane.b32.xlu0 %v3694_v18, 264  ;;  %4318 = vmatprep.subr.bf16.mxu0 %v4840_v32  ;;  %709 = vst [vmem:[#allocation2 + $0x150] sm:$0x1] %v4993_v49  ;;  %710 = vst [vmem:[#allocation2 + $0x168] sm:$0x1] %v4993_v49  ;;  %v5138_v52 = vrot.slane %v5100_v40, %v5055_v20  ;;  %vm655_vm7 = vcmask 56320  }
  0x16   : > { %711 = vst [vmem:[#allocation2 + $0x180] sm:$0x1] %v4993_v49  ;;  %714 = vst [vmem:[#allocation2 + $0x29] sm:$0x1] %v4993_v49  ;;  %v5147_v55 = vrot.slane %v5100_v40, %v5081_v34  ;;  %v5151_v56 = vrot.slane %v5100_v40, %v5083_v35  ;;  %v5158_v58 = vrot.slane %v5100_v40, %v5086_v36  ;;  %4134 = vmatprep.mubr.bf16.mxu1 %v860_v6  ;;  %v243_v6 = vld [vmem:[%s5211_s7 + $0x30] sm:$0xff]  ;;  %vm3454_vm9 = vcmask 64512  }
  0x17   : > { %4903 = vrsqrt.f32 %v5073_v31  ;;  %4127 = vmatpush3.bf16.msra.mxu1 %v4839_v26  ;;  %715 = vst [vmem:[#allocation2 + $0x41] sm:$0x1] %v4993_v49  ;;  %716 = vst [vmem:[#allocation2 + $0x59] sm:$0x1] %v4993_v49  ;;  %v5162_v59 = vrot.slane %v5100_v40, %v5102_v41  ;;  %v5166_v60 = vrot.slane %v5100_v40, %v5104_v42  ;;  %vm297_vm0 = vcmp.eq.f32.partialorder %v5073_v31, inf  ;;  %s3691_s29 = sshll.u32 %s6035_s2, 1 }
  0x18   : > { %4128 = vmatprep.subr.bf16.mxu1 %v4841_v33  ;;  %4319 = vmatpush3.bf16.msra.mxu0 %v4840_v32  ;;  %717 = vst [vmem:[#allocation2 + $0x71] sm:$0x1] %v4993_v49  ;;  %718 = vst [vmem:[#allocation2 + $0x89] sm:$0x1] %v4993_v49  ;;  %v5170_v61 = vrot.slane %v5100_v40, %v5109_v44  ;;  %v290_v63 = vmul.f32 %v3696_v53, %v3696_v53  ;;  %vm299_vm1 = vcmp.eq.f32.partialorder %v5073_v31, 0.0  ;;  %vm3593_vm10 = vcmask 1040384   ;;  %s235_s3 = scalar_lea.vmem %s6031_s5, %s3691_s29 }
  0x19   : > { %4320 = vmatprep.subr.bf16.mxu0 %v4842_v43  ;;  %719 = vst [vmem:[#allocation2 + $0xa1] sm:$0x1] %v4993_v49  ;;  %720 = vst [vmem:[#allocation2 + $0xb9] sm:$0x1] %v4993_v49  ;;  %v300_v0 = vand.u32 2147483648, %v5073_v31 }
  0x1a   : > { %721 = vst [vmem:[#allocation2 + $0xd1] sm:$0x1] %v4993_v49  ;;  %722 = vst [vmem:[#allocation2 + $0xe9] sm:$0x1] %v4993_v49  ;;  %v294_v7 = vadd.f32 %v5068_v28, %v290_v63  ;;  %v588_v18 = vsel %vm556_vm2, %v268_v16, %v5170_v61  ;;  %v245_v16 = vld [vmem:[%s5211_s7 + $0x40] sm:$0xff] }
  0x1b   : > { %4129 = vmatpush3.bf16.msra.mxu1 %v4841_v33  ;;  %723 = vst [vmem:[#allocation2 + $0x101] sm:$0x1] %v4993_v49  ;;  %724 = vst [vmem:[#allocation2 + $0x119] sm:$0x1] %v4993_v49 }
  0x1c   : > { %725 = vst [vmem:[#allocation2 + $0x131] sm:$0x1] %v4993_v49  ;;  %726 = vst [vmem:[#allocation2 + $0x149] sm:$0x1] %v4993_v49  ;;  %4130 = vmatprep.subr.bf16.mxu1 %v5114_v45  ;;  %4321 = vmatpush3.bf16.msra.mxu0 %v4842_v43  ;;  %4905 = vrsqrt.f32 %v294_v7  ;;  %vm304_vm3 = vcmp.eq.f32.partialorder %v294_v7, inf  ;;  %vm306_vm4 = vcmp.eq.f32.partialorder %v294_v7, 0.0 }
  0x1d   : > { %727 = vst [vmem:[#allocation2 + $0x161] sm:$0x1] %v4993_v49  ;;  %728 = vst [vmem:[#allocation2 + $0x179] sm:$0x1] %v4993_v49  ;;  %4322 = vmatprep.subr.bf16.mxu0 %v4844_v54  ;;  %v307_v23 = vand.u32 2147483648, %v294_v7 }
  0x1e   : > { %729 = vst [vmem:[#allocation2 + $0x191] sm:$0x1] %v4993_v49  ;;  %713 = vst [vmem:[#allocation2 + $0x11] sm:$0x1] %v4993_v49 }
  0x1f   : > { %695 = vst [vmem:[#allocation2] sm:$0x1] %v4993_v49  ;;  %712 = vst [vmem:[#allocation2 + $0x198] sm:$0x1] %v4993_v49  ;;  %4131 = vmatpush3.bf16.msra.mxu1 %v5114_v45  ;;  %v238_v45 = vld [vmem:[%s5211_s7 + $0x8] sm:$0xff] }
  0x20   : > { %730 = vst [vmem:[#allocation2 + $0x1a9] sm:$0x1] %v4993_v49  ;;  %4132 = vmatprep.subr.bf16.mxu1 %v4845_v57  ;;  %4323 = vmatpush3.bf16.msra.mxu0 %v4844_v54  ;;  %v241_v54 = vld [vmem:[%s5211_s7 + $0x20] sm:$0xff]  ;;  %vm5292_vm8 = vmpackc.low %vm655_vm7, %vm655_vm7 }
  0x21   : > { %v4904_v62 = vpop.eup %4903  ;;  %4324 = vmatprep.subr.bf16.mxu0 %v4846_v1 }
  0x22   : > { %v296_v2 = vmul.f32 %v4904_v62, %v5073_v31 }
  0x23   : > { %4133 = vmatpush3.bf16.msra.mxu1 %v4845_v57  ;;  %v558_v57 = vsel %vm556_vm2, %v238_v45, %v5090_v37 }
  0x24   : > { %v298_v5 = vsel %vm297_vm0, %v5073_v31, %v296_v2  ;;  %4325 = vmatpush3.bf16.msra.mxu0 %v4846_v1  ;;  %4166 = vmatprep.subr.bf16.mxu1 %v5201_v14  ;;  %v561_v2 = vsel %vm556_vm2, %v241_v54, %v5094_v38 }
  0x25   : > { %v301_v8 = vsel %vm299_vm1, %v300_v0, %v298_v5  ;;  %4358 = vmatprep.subr.bf16.mxu0 %v5187_v9 }
  0x26   : > { %v394_v10 = vrot.slane %v301_v8, %v5055_v20  ;;  %v383_v11 = vrot.slane %v301_v8, %v5070_v29  ;;  %v405_v12 = vrot.slane %v301_v8, %v5081_v34  ;;  %v416_v13 = vrot.slane %v301_v8, %v5083_v35  ;;  %v4906_v17 = vpop.eup %4905 }
  0x27   : > { %v427_v15 = vrot.slane %v301_v8, %v5086_v36  ;;  %v438_v19 = vrot.slane %v301_v8, %v5102_v41  ;;  %v303_v21 = vmul.f32 %v4906_v17, %v294_v7  ;;  %v449_v22 = vrot.slane %v301_v8, %v5104_v42 }
  0x28   : > { %396 = vbcast.lane.b32.xlu0 %v394_v10, 256  ;;  %385 = vbcast.lane.b32.xlu1 %v383_v11, 256  ;;  %v460_v26 = vrot.slane %v301_v8, %v5109_v44 }
  0x29   : > { %v305_v24 = vsel %vm304_vm3, %v294_v7, %v303_v21  ;;  %v4850_v21 = vld [vmem:[%s6027_s1 + $0x8] sm:$0xff]  }
  0x2a   : > { %v308_v27 = vsel %vm306_vm4, %v307_v23, %v305_v24 }
  0x2b   : > { %v471_v28 = vrot.slane %v308_v27, %v5070_v29  ;;  %v482_v30 = vrot.slane %v308_v27, %v5055_v20  ;;  %v493_v31 = vrot.slane %v308_v27, %v5081_v34  ;;  %v504_v32 = vrot.slane %v308_v27, %v5083_v35 }
  0x2c   : > { %407 = vbcast.lane.b32.xlu0 %v405_v12, 256  ;;  %389 = vbcast.lane.b32.xlu1 %v383_v11, 264  ;;  %v515_v33 = vrot.slane %v308_v27, %v5086_v36  ;;  %v526_v29 = vrot.slane %v308_v27, %v5102_v41  ;;  %v537_v20 = vrot.slane %v308_v27, %v5104_v42  ;;  %v239_v41 = vld [vmem:[%s5211_s7 + $0x10] sm:$0xff]  ;;  %v237_v42 = vld [vmem:[%s5211_s7] sm:$0xff] }
  0x2d   : > { %v548_v34 = vrot.slane %v308_v27, %v5109_v44  ;;  %v559_v43 = vsel %vm556_vm2, %v239_v41, %v5063_v25  ;;  %v557_v44 = vsel %vm556_vm2, %v237_v42, %v5090_v37  ;;  %v240_v37 = vld [vmem:[%s5211_s7 + $0x18] sm:$0xff]  ;;  %v4853_v41 = vld [vmem:[%s6027_s1 + $0x10] sm:$0xff]  }
  0x30   : > { %418 = vbcast.lane.b32.xlu0 %v416_v13, 256  ;;  %400 = vbcast.lane.b32.xlu1 %v394_v10, 264 }
  0x34   : > { %429 = vbcast.lane.b32.xlu0 %v427_v15, 256  ;;  %411 = vbcast.lane.b32.xlu1 %v405_v12, 264 }
  0x38   : > { %440 = vbcast.lane.b32.xlu0 %v438_v19, 256  ;;  %422 = vbcast.lane.b32.xlu1 %v416_v13, 264  ;;  %v563_v13 = vsel %vm556_vm2, %v243_v6, %v5098_v39 }
  0x3c   : > { %451 = vbcast.lane.b32.xlu0 %v449_v22, 256  ;;  %433 = vbcast.lane.b32.xlu1 %v427_v15, 264  ;;  %v560_v15 = vsel %vm556_vm2, %v240_v37, %v5063_v25 }
  0x40   : > { %462 = vbcast.lane.b32.xlu0 %v460_v26, 256  ;;  %444 = vbcast.lane.b32.xlu1 %v438_v19, 264  ;;  %v242_v19 = vld [vmem:[%s5211_s7 + $0x28] sm:$0xff] }
  0x44   : > { %455 = vbcast.lane.b32.xlu1 %v449_v22, 264  ;;  %473 = vbcast.lane.b32.xlu0 %v471_v28, 256 }
  0x48   : > { %466 = vbcast.lane.b32.xlu1 %v460_v26, 264  ;;  %484 = vbcast.lane.b32.xlu0 %v482_v30, 256  ;;  %v565_v26 = vsel %vm556_vm2, %v245_v16, %v5118_v46  ;;  %v248_v16 = vld [vmem:[%s5211_s7 + $0x58] sm:$0xff] }
  0x4c   : > { %477 = vbcast.lane.b32.xlu1 %v471_v28, 264  ;;  %495 = vbcast.lane.b32.xlu0 %v493_v31, 256 }
  0x50   : > { %488 = vbcast.lane.b32.xlu1 %v482_v30, 264  ;;  %506 = vbcast.lane.b32.xlu0 %v504_v32, 256  ;;  %v562_v30 = vsel %vm556_vm2, %v242_v19, %v5094_v38  ;;  %v244_v38 = vld [vmem:[%s5211_s7 + $0x38] sm:$0xff] }
  0x51   : > { %v564_v54 = vsel %vm556_vm2, %v244_v38, %v5098_v39  ;;  %v4851_v39 = vld [vmem:[%s6027_s1 + $0x150] sm:$0xff]  }
  0x54   : > { %499 = vbcast.lane.b32.xlu1 %v493_v31, 264  ;;  %517 = vbcast.lane.b32.xlu0 %v515_v33, 256  ;;  %v247_v31 = vld [vmem:[%s5211_s7 + $0x50] sm:$0xff] }
  0x55   : > { %v567_v45 = vsel %vm556_vm2, %v247_v31, %v5122_v47 }
  0x58   : > { %510 = vbcast.lane.b32.xlu1 %v504_v32, 264  ;;  %528 = vbcast.lane.b32.xlu0 %v526_v29, 256 }
  0x5c   : > { %521 = vbcast.lane.b32.xlu1 %v515_v33, 264  ;;  %539 = vbcast.lane.b32.xlu0 %v537_v20, 256 }
  0x60   : > { %532 = vbcast.lane.b32.xlu1 %v526_v29, 264  ;;  %550 = vbcast.lane.b32.xlu0 %v548_v34, 256 }
  0x64   : > { %543 = vbcast.lane.b32.xlu1 %v537_v20, 264 }
  0x68   : > { %554 = vbcast.lane.b32.xlu1 %v548_v34, 264  ;;  %v4849_v34 = vld [vmem:[%s6027_s1 + $0x148] sm:$0xff]  }
  0x83   : > { %v5227_v35 = vpop.permute.xlu0 %374 }
  0x84   : > { %v592_v49 = vsel %vm589_vm5, %v559_v43, %v5227_v35  ;;  %v590_v53 = vsel %vm589_vm5, %v557_v44, %v5227_v35  ;;  %v594_v8 = vsel %vm589_vm5, %v561_v2, %v5227_v35  ;;  %v596_v23 = vsel %vm589_vm5, %v563_v13, %v5227_v35  ;;  %v246_v2 = vld [vmem:[%s5211_s7 + $0x48] sm:$0xff] }
  0x85   : > { %v598_v43 = vsel %vm589_vm5, %v565_v26, %v5227_v35  ;;  %v250_v26 = vld [vmem:[%s5211_s7 + $0x68] sm:$0xff] }
  0x87   : > { %v5229_v36 = vpop.permute.xlu0 %378 }
  0x88   : > { %v5233_v40 = vsel %vm589_vm5, %v588_v18, %v5229_v36  ;;  %v591_v5 = vsel %vm589_vm5, %v558_v57, %v5229_v36  ;;  %v593_v24 = vsel %vm589_vm5, %v560_v15, %v5229_v36  ;;  %v249_v57 = vld [vmem:[%s5211_s7 + $0x60] sm:$0xff] }
  0x89   : > { %v569_v6 = vsel %vm556_vm2, %v249_v57, %v5126_v48  ;;  %v4863_v57 = vld [vmem:[%s6027_s1 + $0x30] sm:$0xff]  }
  0x9a   : > { %v397_v62 = vpop.permute.xlu0 %396  ;;  %v386_v63 = vpop.permute.xlu1 %385 }
  0x9b   : > { %v625_v0 = vsel %vm622_vm6, %v592_v49, %v397_v62  ;;  %v623_v1 = vsel %vm622_vm6, %v590_v53, %v386_v63 }
  0x9c   : > { %v658_v3 = vsel %vm655_vm7, %v625_v0, 0.0  ;;  %v656_v4 = vsel %vm655_vm7, %v623_v1, 0.0 }
  0x9d   : > { %734 = vst [vmem:[#allocation2 + $0x31] sm:$0xff] %v658_v3  ;;  %732 = vst [vmem:[#allocation2 + $0x19] sm:$0xff] %v656_v4  ;;  %v600_v4 = vsel %vm589_vm5, %v567_v45, %v5227_v35 }
  0x9e   : > { %v408_v7 = vpop.permute.xlu0 %407  ;;  %v390_v10 = vpop.permute.xlu1 %389 }
  0x9f   : > { %v5262_v11 = vsel %vm622_vm6, %v594_v8, %v408_v7  ;;  %v624_v12 = vsel %vm622_vm6, %v591_v5, %v390_v10  ;;  %v597_v5 = vsel %vm589_vm5, %v564_v54, %v5229_v36  ;;  %v566_v8 = vsel %vm556_vm2, %v246_v2, %v5118_v46  ;;  %v251_v10 = vld [vmem:[%s5211_s7 + $0x70] sm:$0xff]  ;;  %v4852_v46 = vld [vmem:[%s6027_s1 + $0x158] sm:$0xff]  }
  0xa0   : > { %v660_v17 = vsel %vm655_vm7, %v5262_v11, 0.0  ;;  %v657_v18 = vsel %vm655_vm7, %v624_v12, 0.0  ;;  %v4917_v33 = vpack.c.bf16 %v624_v12, %v623_v1  ;;  %v255_v54 = vld [vmem:[%s5211_s7 + $0x90] sm:$0xff] }
  0xa1   : > { %736 = vst [vmem:[#allocation2 + $0x49] sm:$0xff] %v660_v17  ;;  %733 = vst [vmem:[#allocation2 + $0x21] sm:$0xff] %v657_v18  ;;  %v602_v18 = vsel %vm589_vm5, %v569_v6, %v5227_v35 }
  0xa2   : > { %v419_v22 = vpop.permute.xlu0 %418  ;;  %v401_v25 = vpop.permute.xlu1 %400  ;;  %4918 = vmatmul.mubr.msk.bf16.vlgmr.msra.gmra.mrb[0].mxu1 %vm5292_vm8, %v4917_v33  ;;  %4921 = vmatprep.mubr.msk.bf16.mxu0 %vm5292_vm8, %v4917_v33  ;;  %v253_v33 = vld [vmem:[%s5211_s7 + $0x80] sm:$0xff] }
  0xa3   : > { %v5284_v27 = vsel %vm622_vm6, %v596_v23, %v419_v22  ;;  %v626_v28 = vsel %vm622_vm6, %v593_v24, %v401_v25  ;;  %4167 = vmatpush3.bf16.msra.mxu1 %v5201_v14  ;;  %v595_v14 = vsel %vm589_vm5, %v562_v30, %v5229_v36  ;;  %v571_v22 = vsel %vm556_vm2, %v251_v10, %v5130_v50 }
  0xa4   : > { %v662_v29 = vsel %vm655_vm7, %v5284_v27, 0.0  ;;  %v659_v20 = vsel %vm655_vm7, %v626_v28, 0.0  ;;  %4168 = vmatprep.subr.bf16.mxu1 %v4850_v21  ;;  %v4923_v62 = vpack.c.bf16 %v626_v28, %v625_v0  ;;  %v4856_v0 = vld [vmem:[%s6027_s1 + $0x18] sm:$0xff]   ;;  %v568_v24 = vsel %vm556_vm2, %v248_v16, %v5122_v47  ;;  %v4854_v47 = vld [vmem:[%s6027_s1 + $0x160] sm:$0xff]  }
  0xa5   : > { %738 = vst [vmem:[#allocation2 + $0x61] sm:$0xff] %v662_v29  ;;  %735 = vst [vmem:[#allocation2 + $0x39] sm:$0xff] %v659_v20  ;;  %v604_v20 = vsel %vm589_vm5, %v571_v22, %v5227_v35 }
  0xa6   : > { %v430_v42 = vpop.permute.xlu0 %429  ;;  %v412_v44 = vpop.permute.xlu1 %411  ;;  %4924 = vmatprep.mubr.msk.bf16.mxu1 %vm5292_vm8, %v4923_v62  ;;  %4927 = vmatmul.mubr.msk.bf16.vlgmr.msra.gmra.mrb[0].mxu0 %vm5292_vm8, %v4923_v62 }
  0xa7   : > { %v5318_v49 = vsel %vm622_vm6, %v598_v43, %v430_v42  ;;  %v628_v53 = vsel %vm622_vm6, %v595_v14, %v412_v44  ;;  %4359 = vmatpush3.bf16.msra.mxu0 %v5187_v9  ;;  %4169 = vmatpush3.bf16.msra.mxu1 %v4850_v21  ;;  %v599_v21 = vsel %vm589_vm5, %v566_v8, %v5229_v36  ;;  %v252_v14 = vld [vmem:[%s5211_s7 + $0x78] sm:$0xff] }
  0xa8   : > { %v664_v63 = vsel %vm655_vm7, %v5318_v49, 0.0  ;;  %v661_v1 = vsel %vm655_vm7, %v628_v53, 0.0  ;;  %4360 = vmatprep.subr.bf16.mxu0 %v4849_v34  ;;  %4170 = vmatprep.subr.bf16.mxu1 %v4853_v41  ;;  %v4929_v12 = vpack.c.bf16 %v628_v53, %v5262_v11  ;;  %v4859_v11 = vld [vmem:[%s6027_s1 + $0x20] sm:$0xff]   ;;  %v573_v44 = vsel %vm556_vm2, %v253_v33, %v5134_v51  ;;  %v4865_v8 = vld [vmem:[%s6027_s1 + $0x38] sm:$0xff]  }
  0xa9   : > { %740 = vst [vmem:[#allocation2 + $0x79] sm:$0xff] %v664_v63  ;;  %737 = vst [vmem:[#allocation2 + $0x51] sm:$0xff] %v661_v1  ;;  %v606_v2 = vsel %vm589_vm5, %v573_v44, %v5227_v35  ;;  %v2230_v22 = vld [vmem:[#allocation2 + $0x22] sm:$0xff] }
  0xaa   : > { %v441_v3 = vpop.permute.xlu0 %440  ;;  %v423_v9 = vpop.permute.xlu1 %422  ;;  %4930 = vmatmul.mubr.msk.bf16.gmra.mrb[4].mxu1 %vm5292_vm8, %v4929_v12  ;;  %4933 = vmatprep.mubr.msk.bf16.mxu0 %vm5292_vm8, %v4929_v12  ;;  %v261_v44 = vld [vmem:[%s5211_s7 + $0xc0] sm:$0xff] }
  0xab   : > { %v5346_v37 = vsel %vm622_vm6, %v600_v4, %v441_v3  ;;  %v630_v7 = vsel %vm622_vm6, %v597_v5, %v423_v9  ;;  %4361 = vmatpush3.bf16.msra.mxu0 %v4849_v34  ;;  %4171 = vmatpush3.bf16.msra.mxu1 %v4853_v41  ;;  %v601_v34 = vsel %vm589_vm5, %v568_v24, %v5229_v36  ;;  %v254_v9 = vld [vmem:[%s5211_s7 + $0x88] sm:$0xff]  ;;  %v259_v24 = vld [vmem:[%s5211_s7 + $0xb0] sm:$0xff] }
  0xac   : > { %v666_v13 = vsel %vm655_vm7, %v5346_v37, 0.0  ;;  %v663_v15 = vsel %vm655_vm7, %v630_v7, 0.0  ;;  %4362 = vmatprep.subr.bf16.mxu0 %v4851_v39  ;;  %4172 = vmatprep.subr.bf16.mxu1 %v4856_v0  ;;  %v4935_v28 = vpack.c.bf16 %v630_v7, %v5284_v27  ;;  %v4861_v27 = vld [vmem:[%s6027_s1 + $0x28] sm:$0xff]   ;;  %v570_v41 = vsel %vm556_vm2, %v250_v26, %v5126_v48  ;;  %v257_v7 = vld [vmem:[%s5211_s7 + $0xa0] sm:$0xff]  ;;  %v769_v32 = vld [vmem:[#allocation2 + $0x38] sm:$0xff] }
  0xad   : > { %742 = vst [vmem:[#allocation2 + $0x91] sm:$0xff] %v666_v13  ;;  %739 = vst [vmem:[#allocation2 + $0x69] sm:$0xff] %v663_v15  ;;  %v603_v63 = vsel %vm589_vm5, %v570_v41, %v5229_v36  ;;  %v575_v4 = vsel %vm556_vm2, %v255_v54, %v5138_v52  ;;  %v574_v16 = vsel %vm556_vm2, %v254_v9, %v5134_v51  ;;  %v2231_v54 = vld [vmem:[#allocation2 + $0x32] sm:$0xff] }
  0xae   : > { %v452_v17 = vpop.permute.xlu0 %451  ;;  %v434_v19 = vpop.permute.xlu1 %433  ;;  %4936 = vmatprep.mubr.msk.bf16.mxu1 %vm5292_vm8, %v4935_v28  ;;  %4939 = vmatmul.mubr.msk.bf16.gmra.mrb[4].mxu0 %vm5292_vm8, %v4935_v28  ;;  %v608_v15 = vsel %vm589_vm5, %v575_v4, %v5227_v35  ;;  %v607_v28 = vsel %vm589_vm5, %v574_v16, %v5229_v36 }
  0xaf   : > { %v5374_v23 = vsel %vm622_vm6, %v602_v18, %v452_v17  ;;  %v632_v25 = vsel %vm622_vm6, %v599_v21, %v434_v19  ;;  %4363 = vmatpush3.bf16.msra.mxu0 %v4851_v39  ;;  %4173 = vmatpush3.bf16.msra.mxu1 %v4856_v0  ;;  %v572_v39 = vsel %vm556_vm2, %v252_v14, %v5130_v50  ;;  %v256_v18 = vld [vmem:[%s5211_s7 + $0x98] sm:$0xff] }
  0xb0   : > { %v668_v30 = vsel %vm655_vm7, %v5374_v23, 0.0  ;;  %v665_v31 = vsel %vm655_vm7, %v632_v25, 0.0  ;;  %4364 = vmatprep.subr.bf16.mxu0 %v4852_v46  ;;  %4174 = vmatprep.subr.bf16.mxu1 %v4859_v11  ;;  %v4941_v45 = vpack.c.bf16 %v632_v25, %v5318_v49  ;;  %v4855_v49 = vld [vmem:[%s6027_s1 + $0x168] sm:$0xff]   ;;  %v605_v12 = vsel %vm589_vm5, %v572_v39, %v5229_v36  ;;  %v2229_v21 = vld [vmem:[#allocation2 + $0x1a] sm:$0xff]  ;;  %v2234_v4 = vld [vmem:[#allocation2 + $0x52] sm:$0xff] }
  0xb1   : > { %744 = vst [vmem:[#allocation2 + $0xa9] sm:$0xff] %v668_v30  ;;  %741 = vst [vmem:[#allocation2 + $0x81] sm:$0xff] %v665_v31  ;;  %v577_v17 = vsel %vm556_vm2, %v257_v7, %v5147_v55  ;;  %v576_v33 = vsel %vm556_vm2, %v256_v18, %v5138_v52  ;;  %v262_v18 = vld [vmem:[%s5211_s7 + $0xc8] sm:$0xff] }
  0xb2   : > { %v463_v29 = vpop.permute.xlu0 %462  ;;  %v445_v38 = vpop.permute.xlu1 %444  ;;  %4942 = vmatmul.mubr.msk.bf16.gmra.mrb[8].mxu1 %vm5292_vm8, %v4941_v45  ;;  %4945 = vmatprep.mubr.msk.bf16.mxu0 %vm5292_vm8, %v4941_v45  ;;  %v610_v31 = vsel %vm589_vm5, %v577_v17, %v5227_v35  ;;  %v609_v45 = vsel %vm589_vm5, %v576_v33, %v5229_v36  ;;  %v264_v33 = vld [vmem:[%s5211_s7 + $0xd8] sm:$0xff] }
  0xb3   : > { %v5402_v42 = vsel %vm622_vm6, %v604_v20, %v463_v29  ;;  %v634_v43 = vsel %vm622_vm6, %v601_v34, %v445_v38  ;;  %4365 = vmatpush3.bf16.msra.mxu0 %v4852_v46  ;;  %4175 = vmatpush3.bf16.msra.mxu1 %v4859_v11  ;;  %v579_v38 = vsel %vm556_vm2, %v259_v24, %v5151_v56 }
  0xb4   : > { %v670_v48 = vsel %vm655_vm7, %v5402_v42, 0.0  ;;  %v667_v53 = vsel %vm655_vm7, %v634_v43, 0.0  ;;  %4366 = vmatprep.subr.bf16.mxu0 %v4854_v47  ;;  %4176 = vmatprep.subr.bf16.mxu1 %v4861_v27  ;;  %v4947_v5 = vpack.c.bf16 %v634_v43, %v5346_v37  ;;  %v4857_v37 = vld [vmem:[%s6027_s1 + $0x170] sm:$0xff]   ;;  %v258_v43 = vld [vmem:[%s5211_s7 + $0xa8] sm:$0xff] }
  0xb5   : > { %746 = vst [vmem:[#allocation2 + $0xc1] sm:$0xff] %v670_v48  ;;  %743 = vst [vmem:[#allocation2 + $0x99] sm:$0xff] %v667_v53  ;;  %v612_v53 = vsel %vm589_vm5, %v579_v38, %v5227_v35  ;;  %v2235_v24 = vld [vmem:[#allocation2 + $0x62] sm:$0xff] }
  0xb6   : > { %v456_v62 = vpop.permute.xlu1 %455  ;;  %v474_v1 = vpop.permute.xlu0 %473  ;;  %4948 = vmatprep.mubr.msk.bf16.mxu1 %vm5292_vm8, %v4947_v5  ;;  %4951 = vmatmul.mubr.msk.bf16.gmra.mrb[8].mxu0 %vm5292_vm8, %v4947_v5 }
  0xb7   : > { %v636_v0 = vsel %vm622_vm6, %v603_v63, %v456_v62  ;;  %v5431_v3 = vsel %vm622_vm6, %v606_v2, %v474_v1  ;;  %4367 = vmatpush3.bf16.msra.mxu0 %v4854_v47  ;;  %4177 = vmatpush3.bf16.msra.mxu1 %v4861_v27  ;;  %v5482_v47 = vpack.c.bf16 %v2230_v22, %v2229_v21  ;;  %v5487_v27 = vld [vmem:[%s6027_s1 + $0x80] sm:$0xff]   ;;  %v260_v2 = vld [vmem:[%s5211_s7 + $0xb8] sm:$0xff] }
  0xb8   : > { %v669_v6 = vsel %vm655_vm7, %v636_v0, 0.0  ;;  %v672_v50 = vsel %vm655_vm7, %v5431_v3, 0.0  ;;  %4368 = vmatprep.subr.bf16.mxu0 %v4855_v49  ;;  %4178 = vmatprep.subr.bf16.mxu1 %v4863_v57  ;;  %v4953_v19 = vpack.c.bf16 %v636_v0, %v5374_v23  ;;  %v4858_v23 = vld [vmem:[%s6027_s1 + $0x178] sm:$0xff]   ;;  %v578_v63 = vsel %vm556_vm2, %v258_v43, %v5147_v55  ;;  %v2233_v0 = vld [vmem:[#allocation2 + $0x4a] sm:$0xff] }
  0xb9   : > { %745 = vst [vmem:[#allocation2 + $0xb1] sm:$0xff] %v669_v6  ;;  %748 = vst [vmem:[#allocation2 + $0xd9] sm:$0xff] %v672_v50  ;;  %v581_v1 = vsel %vm556_vm2, %v261_v44, %v5158_v58  ;;  %v263_v6 = vld [vmem:[%s5211_s7 + $0xd0] sm:$0xff]  ;;  %v611_v7 = vsel %vm589_vm5, %v578_v63, %v5229_v36  ;;  %v2237_v38 = vld [vmem:[#allocation2 + $0x7a] sm:$0xff] }
  0xba   : > { %v467_v10 = vpop.permute.xlu1 %466  ;;  %v485_v13 = vpop.permute.xlu0 %484  ;;  %4954 = vmatmul.mubr.msk.bf16.gmra.mrb[12].mxu1 %vm5292_vm8, %v4953_v19  ;;  %4957 = vmatprep.mubr.msk.bf16.mxu0 %vm5292_vm8, %v4953_v19  ;;  %v583_v16 = vsel %vm556_vm2, %v263_v6, %v5162_v59  ;;  %v265_v19 = vld [vmem:[%s5211_s7 + $0xe0] sm:$0xff]  ;;  %v267_v43 = vld [vmem:[%s5211_s7 + $0xf0] sm:$0xff] }
  0xbb   : > { %v638_v46 = vsel %vm622_vm6, %v605_v12, %v467_v10  ;;  %v5459_v11 = vsel %vm622_vm6, %v608_v15, %v485_v13  ;;  %4369 = vmatpush3.bf16.msra.mxu0 %v4855_v49  ;;  %4179 = vmatpush3.bf16.msra.mxu1 %v4863_v57  ;;  %v2232_v49 = vld [vmem:[#allocation2 + $0x3a] sm:$0xff]  ;;  %v580_v10 = vsel %vm556_vm2, %v260_v2, %v5151_v56  ;;  %v266_v2 = vld [vmem:[%s5211_s7 + $0xe8] sm:$0xff] }
  0xbc   : > { %v671_v51 = vsel %vm655_vm7, %v638_v46, 0.0  ;;  %v674_v25 = vsel %vm655_vm7, %v5459_v11, 0.0  ;;  %4370 = vmatprep.subr.bf16.mxu0 %v4857_v37  ;;  %4180 = vmatprep.subr.bf16.mxu1 %v4865_v8  ;;  %v4959_v34 = vpack.c.bf16 %v638_v46, %v5402_v42  ;;  %v4860_v42 = vld [vmem:[%s6027_s1 + $0x180] sm:$0xff]   ;;  %v5530_v55 = vpack.c.bf16 %v2232_v49, %v2231_v54 }
  0xbd   : > { %747 = vst [vmem:[#allocation2 + $0xc9] sm:$0xff] %v671_v51  ;;  %750 = vst [vmem:[#allocation2 + $0xf1] sm:$0xff] %v674_v25  ;;  %v5541_v12 = vpack.c.bf16 %v2234_v4, %v2233_v0  ;;  %v613_v22 = vsel %vm589_vm5, %v580_v10, %v5229_v36  ;;  %v616_v25 = vsel %vm589_vm5, %v583_v16, %v5227_v35  ;;  %v764_v16 = vld [vmem:[#allocation2] sm:$0xff] }
  0xbe   : > { %v478_v26 = vpop.permute.xlu1 %477  ;;  %v496_v30 = vpop.permute.xlu0 %495  ;;  %4960 = vmatprep.mubr.msk.bf16.mxu1 %vm5292_vm8, %v4959_v34  ;;  %4963 = vmatmul.mubr.msk.bf16.gmra.mrb[12].mxu0 %vm5292_vm8, %v4959_v34  ;;  %v2238_v34 = vld [vmem:[#allocation2 + $0x82] sm:$0xff] }
  0xbf   : > { %v640_v29 = vsel %vm622_vm6, %v607_v28, %v478_v26  ;;  %v5491_v20 = vsel %vm622_vm6, %v610_v31, %v496_v30  ;;  %4371 = vmatpush3.bf16.msra.mxu0 %v4857_v37  ;;  %4374 = vmatprep.mubr.bf16.mxu0 %v5482_v47  ;;  %v582_v30 = vsel %vm556_vm2, %v262_v18, %v5158_v58 }
  0xc0   : > { %v673_v52 = vsel %vm655_vm7, %v640_v29, 0.0  ;;  %v676_v41 = vsel %vm655_vm7, %v5491_v20, 0.0  ;;  %4372 = vmatprep.subr.bf16.mxu0 %v4858_v23  ;;  %4181 = vmatpush3.bf16.msra.mxu1 %v4865_v8  ;;  %v4965_v39 = vpack.c.bf16 %v640_v29, %v5431_v3  ;;  %v4862_v3 = vld [vmem:[%s6027_s1 + $0x188] sm:$0xff]   ;;  %v614_v8 = vsel %vm589_vm5, %v581_v1, %v5227_v35 }
  0xc1   : > { %749 = vst [vmem:[#allocation2 + $0xe1] sm:$0xff] %v673_v52  ;;  %752 = vst [vmem:[#allocation2 + $0x109] sm:$0xff] %v676_v41  ;;  %4214 = vmatprep.subr.bf16.mxu1 %v5487_v27  ;;  %v585_v31 = vsel %vm556_vm2, %v265_v19, %v5166_v60 }
  0xc2   : > { %v489_v14 = vpop.permute.xlu1 %488  ;;  %v507_v48 = vpop.permute.xlu0 %506  ;;  %4966 = vmatmul.mubr.msk.bf16.gmra.mrb[16].mxu1 %vm5292_vm8, %v4965_v39 }
  0xc3   : > { %v642_v57 = vsel %vm622_vm6, %v609_v45, %v489_v14  ;;  %v5516_v62 = vsel %vm622_vm6, %v612_v53, %v507_v48  ;;  %4373 = vmatpush3.bf16.msra.mxu0 %v4858_v23  ;;  %v2236_v23 = vld [vmem:[#allocation2 + $0x6a] sm:$0xff]  ;;  %v618_v45 = vsel %vm589_vm5, %v585_v31, %v5227_v35  ;;  %v584_v48 = vsel %vm556_vm2, %v264_v33, %v5162_v59  ;;  %v4874_v33 = vld [vmem:[%s6027_s1 + $0x1b8] sm:$0xff]  }
  0xc4   : > { %v675_v9 = vsel %vm655_vm7, %v642_v57, 0.0  ;;  %v678_v5 = vsel %vm655_vm7, %v5516_v62, 0.0  ;;  %4406 = vmatprep.subr.bf16.mxu0 %v4860_v42  ;;  %v4968_v46 = vpack.c.bf16 %v642_v57, %v5459_v11  ;;  %v4864_v11 = vld [vmem:[%s6027_s1 + $0x190] sm:$0xff]   ;;  %v5582_v58 = vpack.c.bf16 %v2236_v23, %v2235_v24 }
  0xc5   : > { %751 = vst [vmem:[#allocation2 + $0xf9] sm:$0xff] %v675_v9  ;;  %754 = vst [vmem:[#allocation2 + $0x121] sm:$0xff] %v678_v5  ;;  %v5593_v53 = vpack.c.bf16 %v2238_v34, %v2237_v38  ;;  %v587_v57 = vsel %vm556_vm2, %v267_v43, %v5170_v61  ;;  %v4868_v61 = vld [vmem:[%s6027_s1 + $0x1a0] sm:$0xff]   ;;  %v617_v39 = vsel %vm589_vm5, %v584_v48, %v5229_v36  ;;  %v2239_v9 = vld [vmem:[#allocation2 + $0x92] sm:$0xff] }
  0xc6   : > { %v500_v50 = vpop.permute.xlu1 %499  ;;  %v518_v37 = vpop.permute.xlu0 %517  ;;  %4969 = vmatprep.mubr.msk.bf16.mxu1 %vm5292_vm8, %v4968_v46  ;;  %4375 = vmatmul.mubr.bf16.vlgmr.msra.gmra.mrb[0].mxu0 %v5530_v55  ;;  %v620_v4 = vsel %vm589_vm5, %v587_v57, %v5227_v35  ;;  %v2240_v5 = vld [vmem:[#allocation2 + $0x9a] sm:$0xff]  ;;  %v771_v57 = vld [vmem:[#allocation2 + $0x50] sm:$0xff] }
  0xc7   : > { %v644_v13 = vsel %vm622_vm6, %v611_v7, %v500_v50  ;;  %v5545_v15 = vsel %vm622_vm6, %v614_v8, %v518_v37  ;;  %4407 = vmatpush3.bf16.msra.mxu0 %v4860_v42  ;;  %4378 = vmatprep.mubr.bf16.mxu0 %v5541_v12  ;;  %v615_v42 = vsel %vm589_vm5, %v582_v30, %v5229_v36  ;;  %v2241_v37 = vld [vmem:[#allocation2 + $0xaa] sm:$0xff]  ;;  %v2242_v8 = vld [vmem:[#allocation2 + $0xb2] sm:$0xff] }
  0xc8   : > { %v677_v17 = vsel %vm655_vm7, %v644_v13, 0.0  ;;  %v680_v56 = vsel %vm655_vm7, %v5545_v15, 0.0  ;;  %4408 = vmatprep.subr.bf16.mxu0 %v4862_v3  ;;  %v4971_v29 = vpack.c.bf16 %v644_v13, %v5491_v20  ;;  %v4866_v20 = vld [vmem:[%s6027_s1 + $0x198] sm:$0xff]   ;;  %v586_v50 = vsel %vm556_vm2, %v266_v2, %v5166_v60  ;;  %v4870_v60 = vld [vmem:[%s6027_s1 + $0x1a8] sm:$0xff]  }
  0xc9   : > { %753 = vst [vmem:[#allocation2 + $0x111] sm:$0xff] %v677_v17  ;;  %756 = vst [vmem:[#allocation2 + $0x139] sm:$0xff] %v680_v56  ;;  %v5623_v13 = vpack.c.bf16 %v2240_v5, %v2239_v9  ;;  %v619_v46 = vsel %vm589_vm5, %v586_v50, %v5229_v36  ;;  %v5630_v17 = vpack.c.bf16 %v2242_v8, %v2241_v37  ;;  %v4872_v36 = vld [vmem:[%s6027_s1 + $0x1b0] sm:$0xff]   ;;  %v766_v38 = vld [vmem:[#allocation2 + $0x18] sm:$0xff] }
  0xca   : > { %v511_v21 = vpop.permute.xlu1 %510  ;;  %v529_v51 = vpop.permute.xlu0 %528  ;;  %4972 = vmatmul.mubr.msk.bf16.gmra.mrb[20].mxu1 %vm5292_vm8, %v4971_v29  ;;  %v4873_v2 = vld [vmem:[%s6027_s1 + $0x98] sm:$0xff]   ;;  %v4875_v5 = vld [vmem:[%s6027_s1 + $0xa0] sm:$0xff]   ;;  %v776_v8 = vld [vmem:[#allocation2 + $0x90] sm:$0xff] }
  0xcb   : > { %v646_v26 = vsel %vm622_vm6, %v613_v22, %v511_v21  ;;  %v5568_v28 = vsel %vm622_vm6, %v616_v25, %v529_v51  ;;  %4409 = vmatpush3.bf16.msra.mxu0 %v4862_v3  ;;  %v2243_v51 = vld [vmem:[#allocation2 + $0xc2] sm:$0xff]  ;;  %v2244_v25 = vld [vmem:[#allocation2 + $0xca] sm:$0xff]  ;;  %v777_v50 = vld [vmem:[#allocation2 + $0x98] sm:$0xff] }
  0xcc   : > { %v679_v52 = vsel %vm655_vm7, %v646_v26, 0.0  ;;  %v682_v41 = vsel %vm655_vm7, %v5568_v28, 0.0  ;;  %4410 = vmatprep.subr.bf16.mxu0 %v4864_v11  ;;  %v4974_v63 = vpack.c.bf16 %v646_v26, %v5516_v62  ;;  %v2245_v26 = vld [vmem:[#allocation2 + $0xda] sm:$0xff]  ;;  %v5650_v31 = vpack.c.bf16 %v2244_v25, %v2243_v51 }
  0xcd   : > { %755 = vst [vmem:[#allocation2 + $0x129] sm:$0xff] %v679_v52  ;;  %758 = vst [vmem:[#allocation2 + $0x151] sm:$0xff] %v682_v41  ;;  %v768_v52 = vld [vmem:[#allocation2 + $0x30] sm:$0xff]  ;;  %v4869_v41 = vld [vmem:[%s6027_s1 + $0x88] sm:$0xff]  }
  0xce   : > { %v522_v44 = vpop.permute.xlu1 %521  ;;  %v540_v14 = vpop.permute.xlu0 %539  ;;  %4975 = vmatprep.mubr.msk.bf16.mxu1 %vm5292_vm8, %v4974_v63  ;;  %4379 = vmatmul.mubr.bf16.gmra.mrb[4].mxu0 %v5582_v58  ;;  %v5664_v43 = vpack.c.bf16 %v769_v32, %v768_v52  ;;  %v773_v63 = vld [vmem:[#allocation2 + $0x68] sm:$0xff]  ;;  %v780_v25 = vld [vmem:[#allocation2 + $0xc0] sm:$0xff]  ;;  %v785_v32 = vld [vmem:[#allocation2 + $0xf8] sm:$0xff] }
  0xcf   : > { %v648_v54 = vsel %vm622_vm6, %v615_v42, %v522_v44  ;;  %v651_v49 = vsel %vm622_vm6, %v618_v45, %v540_v14  ;;  %4382 = vmatprep.mubr.bf16.mxu0 %v5593_v53  ;;  %4411 = vmatpush3.bf16.msra.mxu0 %v4864_v11  ;;  %v5639_v11 = vld [vmem:[#allocation2 + $0x8] sm:$0xff]  ;;  %v2248_v44 = vld [vmem:[#allocation2 + $0xfa] sm:$0xff] }
  0xd0   : > { %v681_v1 = vsel %vm655_vm7, %v648_v54, 0.0  ;;  %v684_v59 = vsel %vm655_vm7, %v651_v49, 0.0  ;;  %4412 = vmatprep.subr.bf16.mxu0 %v4866_v20  ;;  %v4977_v7 = vpack.c.bf16 %v648_v54, %v5545_v15  ;;  %v796_v21 = vpack.c.bf16 %v5639_v11, %v764_v16  ;;  %v5669_v42 = vld [vmem:[%s6027_s1 + $0x1c0] sm:$0xff]   ;;  %v2249_v14 = vld [vmem:[#allocation2 + $0x10a] sm:$0xff]  ;;  %v2250_v45 = vld [vmem:[#allocation2 + $0x112] sm:$0xff] }
  0xd1   : > { %757 = vst [vmem:[#allocation2 + $0x141] sm:$0xff] %v681_v1  ;;  %760 = vst [vmem:[#allocation2 + $0x169] sm:$0xff] %v684_v59  ;;  %v4871_v54 = vld [vmem:[%s6027_s1 + $0x90] sm:$0xff]   ;;  %v770_v1 = vld [vmem:[#allocation2 + $0x48] sm:$0xff] }
  0xd2   : > { %v533_v62 = vpop.permute.xlu1 %532  ;;  %v551_v0 = vpop.permute.xlu0 %550  ;;  %4978 = vmatmul.mubr.msk.bf16.gmra.mrb[24].mxu1 %vm5292_vm8, %v4977_v7  ;;  %v772_v59 = vld [vmem:[#allocation2 + $0x60] sm:$0xff]  ;;  %v774_v7 = vld [vmem:[#allocation2 + $0x78] sm:$0xff] }
  0xd3   : > { %v650_v6 = vsel %vm622_vm6, %v617_v39, %v533_v62  ;;  %v653_v3 = vsel %vm622_vm6, %v620_v4, %v551_v0  ;;  %4413 = vmatpush3.bf16.msra.mxu0 %v4866_v20  ;;  %v2247_v20 = vld [vmem:[#allocation2 + $0xf2] sm:$0xff] }
  0xd4   : > { %v683_v10 = vsel %vm655_vm7, %v650_v6, 0.0  ;;  %v686_v35 = vsel %vm655_vm7, %v653_v3, 0.0  ;;  %4414 = vmatprep.subr.bf16.mxu0 %v4868_v61  ;;  %v4980_v18 = vpack.c.bf16 %v650_v6, %v5568_v28  ;;  %v2246_v28 = vld [vmem:[#allocation2 + $0xe2] sm:$0xff]  ;;  %v5674_v48 = vpack.c.bf16 %v2248_v44, %v2247_v20  ;;  %v2252_v39 = vld [vmem:[#allocation2 + $0x12a] sm:$0xff] }
  0xd5   : > { %759 = vst [vmem:[#allocation2 + $0x159] sm:$0xff] %v683_v10  ;;  %762 = vst [vmem:[#allocation2 + $0x181] sm:$0xff] %v686_v35  ;;  %v5655_v29 = vpack.c.bf16 %v2246_v28, %v2245_v26  ;;  %v2251_v62 = vld [vmem:[#allocation2 + $0x122] sm:$0xff]  ;;  %v5707_v35 = vpack.c.bf16 %v777_v50, %v776_v8 }
  0xd6   : > { %v544_v15 = vpop.permute.xlu1 %543  ;;  %4981 = vmatprep.mubr.msk.bf16.mxu1 %vm5292_vm8, %v4980_v18  ;;  %4383 = vmatmul.mubr.bf16.gmra.mrb[8].mxu0 %v5623_v13  ;;  %v5693_v9 = vpack.c.bf16 %v2252_v39, %v2251_v62  ;;  %v775_v3 = vld [vmem:[#allocation2 + $0x80] sm:$0xff]  ;;  %v4877_v10 = vld [vmem:[%s6027_s1 + $0xa8] sm:$0xff]   ;;  %v4879_v18 = vld [vmem:[%s6027_s1 + $0xb0] sm:$0xff]  }
  0xd7   : > { %v652_v56 = vsel %vm622_vm6, %v619_v46, %v544_v15  ;;  %4386 = vmatprep.mubr.bf16.mxu0 %v5630_v17  ;;  %4415 = vmatpush3.bf16.msra.mxu0 %v4868_v61  ;;  %v5689_v61 = vpack.c.bf16 %v773_v63, %v772_v59  ;;  %v5702_v37 = vpack.c.bf16 %v775_v3, %v774_v7  ;;  %v4878_v44 = vld [vmem:[%s6027_s1 + $0x1c8] sm:$0xff]   ;;  %v788_v63 = vld [vmem:[#allocation2 + $0x120] sm:$0xff]  ;;  %v790_v39 = vld [vmem:[#allocation2 + $0x138] sm:$0xff] }
  0xd8   : > { %v685_v19 = vsel %vm655_vm7, %v652_v56, 0.0  ;;  %4416 = vmatprep.subr.bf16.mxu0 %v4870_v60  ;;  %v4983_v23 = vpack.c.bf16 %v652_v56, %v651_v49  ;;  %v5679_v49 = vpack.c.bf16 %v2250_v45, %v2249_v14  ;;  %v2253_v0 = vld [vmem:[#allocation2 + $0x13a] sm:$0xff]  ;;  %v2254_v4 = vld [vmem:[#allocation2 + $0x142] sm:$0xff]  ;;  %v787_v14 = vld [vmem:[#allocation2 + $0x110] sm:$0xff] }
  0xd9   : > { %761 = vst [vmem:[#allocation2 + $0x171] sm:$0xff] %v685_v19  ;;  %v5698_v6 = vpack.c.bf16 %v2254_v4, %v2253_v0  ;;  %v789_v45 = vld [vmem:[#allocation2 + $0x128] sm:$0xff]  ;;  %v792_v4 = vld [vmem:[#allocation2 + $0x150] sm:$0xff] }
  0xda   : > { %v555_v22 = vpop.permute.xlu1 %554  ;;  %4984 = vmatmul.mubr.msk.bf16.gmra.mrb[28].mxu1 %vm5292_vm8, %v4983_v23  ;;  %v5753_v59 = vpack.c.bf16 %v789_v45, %v788_v63  ;;  %v1311_v50 = vld [vmem:[#allocation2 + $0x2] sm:$0xff]  ;;  %v1312_v7 = vld [vmem:[#allocation2 + $0xa] sm:$0xff] }
  0xdb   : > { %v654_v24 = vsel %vm622_vm6, %v5233_v40, %v555_v22  ;;  %4182 = vmatprep.mubr.bf16.mxu1 %v796_v21  ;;  %4417 = vmatpush3.bf16.msra.mxu0 %v4870_v60  ;;  %v767_v40 = vld [vmem:[#allocation2 + $0x20] sm:$0xff]  ;;  %v779_v21 = vld [vmem:[#allocation2 + $0xb0] sm:$0xff]  ;;  %v778_v22 = vld [vmem:[#allocation2 + $0xa8] sm:$0xff] }
  0xdc   : > { %v687_v30 = vsel %vm655_vm7, %v654_v24, 0.0  ;;  %4418 = vmatprep.subr.bf16.mxu0 %v4872_v36  ;;  %v5659_v34 = vpack.c.bf16 %v767_v40, %v766_v38  ;;  %v2255_v16 = vld [vmem:[#allocation2 + $0x152] sm:$0xff]  ;;  %v2256_v60 = vld [vmem:[#allocation2 + $0x15a] sm:$0xff]  ;;  %v5720_v51 = vpack.c.bf16 %v779_v21, %v778_v22  ;;  %v4886_v8 = vld [vmem:[%s6027_s1 + $0x1e8] sm:$0xff]  }
  0xdd   : > { %763 = vst [vmem:[#allocation2 + $0x189] sm:$0xff] %v687_v30  ;;  %v5711_v56 = vpack.c.bf16 %v2256_v60, %v2255_v16  ;;  %v4881_v24 = vld [vmem:[%s6027_s1 + $0xb8] sm:$0xff]   ;;  %v783_v40 = vld [vmem:[#allocation2 + $0xe0] sm:$0xff]  ;;  %v794_v16 = vld [vmem:[#allocation2 + $0x168] sm:$0xff]  ;;  %v1343_v60 = vpack.c.bf16 %v1312_v7, %v1311_v50 }
  0xde   : > { %4387 = vmatmul.mubr.bf16.gmra.mrb[12].mxu0 %v5650_v31  ;;  %v782_v38 = vld [vmem:[#allocation2 + $0xd8] sm:$0xff]  ;;  %v4885_v21 = vld [vmem:[%s6027_s1 + $0xc8] sm:$0xff]   ;;  %v4887_v22 = vld [vmem:[%s6027_s1 + $0xd0] sm:$0xff]  }
  0xdf   : > { %4390 = vmatprep.mubr.bf16.mxu0 %v5655_v29  ;;  %4419 = vmatpush3.bf16.msra.mxu0 %v4872_v36  ;;  %v781_v36 = vld [vmem:[#allocation2 + $0xc8] sm:$0xff]  ;;  %v5735_v52 = vpack.c.bf16 %v783_v40, %v782_v38  ;;  %v793_v62 = vld [vmem:[#allocation2 + $0x158] sm:$0xff]  ;;  %v4896_v45 = vld [vmem:[%s6027_s1 + $0x210] sm:$0xff]  }
  0xe0   : > { %4420 = vmatprep.subr.bf16.mxu0 %v4874_v33  ;;  %v2257_v15 = vld [vmem:[#allocation2 + $0x16a] sm:$0xff]  ;;  %v2258_v46 = vld [vmem:[#allocation2 + $0x172] sm:$0xff]  ;;  %v5725_v23 = vpack.c.bf16 %v781_v36, %v780_v25  ;;  %v5767_v3 = vpack.c.bf16 %v793_v62, %v792_v4  ;;  %v4892_v36 = vld [vmem:[%s6027_s1 + $0x200] sm:$0xff]  }
  0xe1   : > { %v5716_v19 = vpack.c.bf16 %v2258_v46, %v2257_v15  ;;  %v4888_v46 = vld [vmem:[%s6027_s1 + $0x1f0] sm:$0xff]   ;;  %v4893_v25 = vld [vmem:[%s6027_s1 + $0xe8] sm:$0xff]  }
  0xe2   : > { %4183 = vmatmul.mubr.bf16.vlgmr.msra.gmra.mrb[0].mxu1 %v5659_v34  ;;  %v2853_v62 = vld [vmem:[#allocation2 + $0xb1] sm:$0xff]  ;;  %v4900_v50 = vld [vmem:[%s6027_s1 + $0x228] sm:$0xff]  }
  0xe3   : > { %4186 = vmatprep.mubr.bf16.mxu1 %v5664_v43  ;;  %4215 = vmatpush3.bf16.msra.mxu1 %v5487_v27  ;;  %v5684_v27 = vpack.c.bf16 %v771_v57, %v770_v1  ;;  %v4880_v1 = vld [vmem:[%s6027_s1 + $0x1d0] sm:$0xff]  }
  0xe4   : > { %4216 = vmatprep.subr.bf16.mxu1 %v4869_v41  ;;  %4421 = vmatpush3.bf16.msra.mxu0 %v4874_v33  ;;  %v2259_v26 = vld [vmem:[#allocation2 + $0x182] sm:$0xff]  ;;  %v2260_v28 = vld [vmem:[#allocation2 + $0x18a] sm:$0xff] }
  0xe5   : > { %4454 = vmatprep.subr.bf16.mxu0 %v5669_v42  ;;  %v2276_v30 = vpack.c.bf16 %v2260_v28, %v2259_v26  ;;  %v5732_v33 = vld [vmem:[%s6027_s1 + $0xc0] sm:$0xff]   ;;  %v2566_v28 = vld [vmem:[#allocation2 + $0x198] sm:$0xff] }
  0xe6   : > { %4391 = vmatmul.mubr.bf16.gmra.mrb[16].mxu0 %v5674_v48 }
  0xe7   : > { %4394 = vmatprep.mubr.bf16.mxu0 %v5679_v49  ;;  %4217 = vmatpush3.bf16.msra.mxu1 %v4869_v41  ;;  %v784_v41 = vld [vmem:[#allocation2 + $0xf0] sm:$0xff] }
  0xe8   : > { %4218 = vmatprep.subr.bf16.mxu1 %v4871_v54  ;;  %v5738_v20 = vpack.c.bf16 %v785_v32, %v784_v41  ;;  %v5832_v32 = vld [vmem:[%s6027_s1 + $0x100] sm:$0xff]  }
  0xe9   : > { %v2846_v41 = vld [vmem:[#allocation2 + $0x61] sm:$0xff] }
  0xea   : > { %4187 = vmatmul.mubr.bf16.gmra.mrb[4].mxu1 %v5684_v27 }
  0xeb   : > { %4190 = vmatprep.mubr.bf16.mxu1 %v5689_v61  ;;  %4219 = vmatpush3.bf16.msra.mxu1 %v4871_v54  ;;  %v786_v54 = vld [vmem:[#allocation2 + $0x108] sm:$0xff] }
  0xec   : > { %4220 = vmatprep.subr.bf16.mxu1 %v4873_v2  ;;  %v5748_v57 = vpack.c.bf16 %v787_v14, %v786_v54  ;;  %v2848_v54 = vld [vmem:[#allocation2 + $0x79] sm:$0xff] }
  0xee   : > { %4395 = vmatmul.mubr.bf16.gmra.mrb[20].mxu0 %v5693_v9 }
  0xef   : > { %4398 = vmatprep.mubr.bf16.mxu0 %v5698_v6  ;;  %4221 = vmatpush3.bf16.msra.mxu1 %v4873_v2  ;;  %v791_v2 = vld [vmem:[#allocation2 + $0x140] sm:$0xff] }
  0xf0   : > { %4222 = vmatprep.subr.bf16.mxu1 %v4875_v5  ;;  %v5762_v0 = vpack.c.bf16 %v791_v2, %v790_v39  ;;  %v2852_v39 = vld [vmem:[#allocation2 + $0xa9] sm:$0xff] }
  0xf1   : > { %v2879_v4 = vpack.c.bf16 %v2853_v62, %v2852_v39  ;;  %v3161_v39 = vld [vmem:[#allocation2 + $0xca] sm:$0xff] }
  0xf2   : > { %4191 = vmatmul.mubr.bf16.gmra.mrb[8].mxu1 %v5702_v37 }
  0xf3   : > { %4194 = vmatprep.mubr.bf16.mxu1 %v5707_v35  ;;  %4223 = vmatpush3.bf16.msra.mxu1 %v4875_v5  ;;  %v4884_v5 = vld [vmem:[%s6027_s1 + $0x1e0] sm:$0xff]  }
  0xf4   : > { %4224 = vmatprep.subr.bf16.mxu1 %v4877_v10 }
  0xf6   : > { %4399 = vmatmul.mubr.bf16.gmra.mrb[24].mxu0 %v5711_v56 }
  0xf7   : > { %4402 = vmatprep.mubr.bf16.mxu0 %v5716_v19  ;;  %4225 = vmatpush3.bf16.msra.mxu1 %v4877_v10  ;;  %v795_v10 = vld [vmem:[#allocation2 + $0x170] sm:$0xff] }
  0xf8   : > { %4226 = vmatprep.subr.bf16.mxu1 %v4879_v18  ;;  %v5776_v15 = vpack.c.bf16 %v795_v10, %v794_v16  ;;  %v2856_v10 = vld [vmem:[#allocation2 + $0xd9] sm:$0xff] }
  0xfa   : > { %4195 = vmatmul.mubr.bf16.gmra.mrb[12].mxu1 %v5720_v51 }
  0xfb   : > { %4198 = vmatprep.mubr.bf16.mxu1 %v5725_v23  ;;  %4227 = vmatpush3.bf16.msra.mxu1 %v4879_v18  ;;  %v4890_v18 = vld [vmem:[%s6027_s1 + $0x1f8] sm:$0xff]  }
  0xfc   : > { %4228 = vmatprep.subr.bf16.mxu1 %v4881_v24 }
  0xfe   : > { %4403 = vmatmul.mubr.bf16.gmra.mrb[28].mxu0 %v2276_v30  ;;  %v2843_v30 = vld [vmem:[#allocation2 + $0x39] sm:$0xff] }
  0xff   : > { %4422 = vmatprep.mubr.bf16.mxu0 %v5664_v43  ;;  %4229 = vmatpush3.bf16.msra.mxu1 %v4881_v24  ;;  %v4895_v24 = vld [vmem:[%s6027_s1 + $0xf0] sm:$0xff]  }
 0x100   : > { %4262 = vmatprep.subr.bf16.mxu1 %v5732_v33 }
 0x102   : > { %4199 = vmatmul.mubr.bf16.gmra.mrb[16].mxu1 %v5735_v52 }
 0x103   : > { %4202 = vmatprep.mubr.bf16.mxu1 %v5738_v20 }
 0x106   : > { %4423 = vmatmul.mubr.bf16.vlgmr.msra.gmra.mrb[0].mxu0 %v5684_v27 }
 0x107   : > { %4455 = vmatpush3.bf16.msra.mxu0 %v5669_v42  ;;  %4426 = vmatprep.mubr.bf16.mxu0 %v5689_v61  ;;  %v4882_v42 = vld [vmem:[%s6027_s1 + $0x1d8] sm:$0xff]  }
 0x108   : > { %4456 = vmatprep.subr.bf16.mxu0 %v4878_v44 }
 0x10a   : > { %4203 = vmatmul.mubr.bf16.gmra.mrb[20].mxu1 %v5748_v57 }
 0x10b   : > { %4206 = vmatprep.mubr.bf16.mxu1 %v5753_v59  ;;  %4457 = vmatpush3.bf16.msra.mxu0 %v4878_v44  ;;  %v4894_v44 = vld [vmem:[%s6027_s1 + $0x208] sm:$0xff]  }
 0x10c   : > { %4458 = vmatprep.subr.bf16.mxu0 %v4880_v1 }
 0x10e   : > { %4427 = vmatmul.mubr.bf16.gmra.mrb[4].mxu0 %v5702_v37 }
 0x10f   : > { %4430 = vmatprep.mubr.bf16.mxu0 %v5707_v35  ;;  %4459 = vmatpush3.bf16.msra.mxu0 %v4880_v1  ;;  %v2850_v1 = vld [vmem:[#allocation2 + $0x91] sm:$0xff] }
 0x110   : > { %4460 = vmatprep.subr.bf16.mxu0 %v4882_v42 }
 0x112   : > { %4207 = vmatmul.mubr.bf16.gmra.mrb[24].mxu1 %v5762_v0 }
 0x113   : > { %4210 = vmatprep.mubr.bf16.mxu1 %v5767_v3  ;;  %4461 = vmatpush3.bf16.msra.mxu0 %v4882_v42  ;;  %v4898_v42 = vld [vmem:[%s6027_s1 + $0x218] sm:$0xff]  }
 0x114   : > { %4462 = vmatprep.subr.bf16.mxu0 %v4884_v5 }
 0x116   : > { %4431 = vmatmul.mubr.bf16.gmra.mrb[8].mxu0 %v5720_v51 }
 0x117   : > { %4434 = vmatprep.mubr.bf16.mxu0 %v5725_v23  ;;  %4463 = vmatpush3.bf16.msra.mxu0 %v4884_v5  ;;  %v2854_v5 = vld [vmem:[#allocation2 + $0xc1] sm:$0xff] }
 0x118   : > { %4464 = vmatprep.subr.bf16.mxu0 %v4886_v8 }
 0x11a   : > { %4211 = vmatmul.mubr.bf16.gmra.mrb[28].mxu1 %v5776_v15 }
 0x11b   : > { %4230 = vmatprep.mubr.bf16.mxu1 %v1343_v60  ;;  %4465 = vmatpush3.bf16.msra.mxu0 %v4886_v8  ;;  %v2857_v8 = vld [vmem:[#allocation2 + $0xe1] sm:$0xff]  ;;  %v2858_v60 = vld [vmem:[#allocation2 + $0xf1] sm:$0xff] }
 0x11c   : > { %4466 = vmatprep.subr.bf16.mxu0 %v4888_v46  ;;  %v5861_v16 = vpack.c.bf16 %v2857_v8, %v2856_v10  ;;  %v3169_v10 = vld [vmem:[#allocation2 + $0x12a] sm:$0xff] }
 0x11e   : > { %4435 = vmatmul.mubr.bf16.gmra.mrb[12].mxu0 %v5735_v52 }
 0x11f   : > { %4438 = vmatprep.mubr.bf16.mxu0 %v5738_v20  ;;  %4467 = vmatpush3.bf16.msra.mxu0 %v4888_v46  ;;  %v4902_v46 = vld [vmem:[%s6027_s1 + $0x238] sm:$0xff]  }
 0x120   : > { %4468 = vmatprep.subr.bf16.mxu0 %v4890_v18 }
 0x122   : > { %4231 = vmatmul.mubr.bf16.vlgmr.msra.gmra.mrb[0].mxu1 %v5482_v47  ;;  %v4889_v47 = vld [vmem:[%s6027_s1 + $0xd8] sm:$0xff]  }
 0x123   : > { %4234 = vmatprep.mubr.bf16.mxu1 %v5530_v55  ;;  %4263 = vmatpush3.bf16.msra.mxu1 %v5732_v33  ;;  %v4891_v55 = vld [vmem:[%s6027_s1 + $0xe0] sm:$0xff]   ;;  %v2842_v33 = vld [vmem:[#allocation2 + $0x31] sm:$0xff] }
 0x124   : > { %4264 = vmatprep.subr.bf16.mxu1 %v4885_v21  ;;  %4469 = vmatpush3.bf16.msra.mxu0 %v4890_v18  ;;  %v2874_v40 = vpack.c.bf16 %v2843_v30, %v2842_v33  ;;  %v2868_v30 = vld [vmem:[#allocation2 + $0x169] sm:$0xff] }
 0x125   : > { %4502 = vmatprep.subr.bf16.mxu0 %v4892_v36 }
 0x126   : > { %4439 = vmatmul.mubr.bf16.gmra.mrb[16].mxu0 %v5748_v57 }
 0x127   : > { %4442 = vmatprep.mubr.bf16.mxu0 %v5753_v59  ;;  %4265 = vmatpush3.bf16.msra.mxu1 %v4885_v21  ;;  %v2860_v21 = vld [vmem:[#allocation2 + $0x109] sm:$0xff] }
 0x128   : > { %4266 = vmatprep.subr.bf16.mxu1 %v4887_v22 }
 0x12a   : > { %4235 = vmatmul.mubr.bf16.gmra.mrb[4].mxu1 %v5541_v12  ;;  %v2565_v12 = vld [vmem:[#allocation2 + $0x188] sm:$0xff] }
 0x12b   : > { %4238 = vmatprep.mubr.bf16.mxu1 %v5582_v58  ;;  %4267 = vmatpush3.bf16.msra.mxu1 %v4887_v22  ;;  %v2564_v58 = vld [vmem:[#allocation2 + $0x180] sm:$0xff] }
 0x12c   : > { %4268 = vmatprep.subr.bf16.mxu1 %v4889_v47  ;;  %v5819_v26 = vpack.c.bf16 %v2565_v12, %v2564_v58  ;;  %v2862_v22 = vld [vmem:[#allocation2 + $0x121] sm:$0xff]  ;;  %v2864_v12 = vld [vmem:[#allocation2 + $0x139] sm:$0xff] }
 0x12e   : > { %4443 = vmatmul.mubr.bf16.gmra.mrb[20].mxu0 %v5762_v0 }
 0x12f   : > { %4446 = vmatprep.mubr.bf16.mxu0 %v5767_v3  ;;  %4269 = vmatpush3.bf16.msra.mxu1 %v4889_v47  ;;  %v4909_v47 = vld [vmem:[%s6027_s1 + $0x108] sm:$0xff]  }
 0x130   : > { %4270 = vmatprep.subr.bf16.mxu1 %v4891_v55 }
 0x132   : > { %4239 = vmatmul.mubr.bf16.gmra.mrb[8].mxu1 %v5593_v53  ;;  %v4897_v53 = vld [vmem:[%s6027_s1 + $0xf8] sm:$0xff]  }
 0x133   : > { %4242 = vmatprep.mubr.bf16.mxu1 %v5623_v13  ;;  %4271 = vmatpush3.bf16.msra.mxu1 %v4891_v55  ;;  %v2583_v13 = vpack.c.bf16 %v5639_v11, %v2566_v28  ;;  %v2847_v11 = vld [vmem:[#allocation2 + $0x69] sm:$0xff]  ;;  %v4911_v28 = vld [vmem:[%s6027_s1 + $0x118] sm:$0xff]  }
 0x134   : > { %4272 = vmatprep.subr.bf16.mxu1 %v4893_v25  ;;  %v2876_v14 = vpack.c.bf16 %v2847_v11, %v2846_v41  ;;  %v2873_v11 = vld [vmem:[#allocation2 + $0x1a1] sm:$0xff] }
 0x135   : > { %v3149_v41 = vld [vmem:[#allocation2 + $0x3a] sm:$0xff] }
 0x136   : > { %4447 = vmatmul.mubr.bf16.gmra.mrb[24].mxu0 %v5776_v15 }
 0x137   : > { %4450 = vmatprep.mubr.bf16.mxu0 %v5819_v26  ;;  %4273 = vmatpush3.bf16.msra.mxu1 %v4893_v25  ;;  %v2867_v25 = vld [vmem:[#allocation2 + $0x159] sm:$0xff] }
 0x138   : > { %4274 = vmatprep.subr.bf16.mxu1 %v4895_v24 }
 0x13a   : > { %4243 = vmatmul.mubr.bf16.gmra.mrb[12].mxu1 %v5630_v17  ;;  %v2845_v17 = vld [vmem:[#allocation2 + $0x51] sm:$0xff] }
 0x13b   : > { %4246 = vmatprep.mubr.bf16.mxu1 %v5650_v31  ;;  %4275 = vmatpush3.bf16.msra.mxu1 %v4895_v24  ;;  %v2844_v31 = vld [vmem:[#allocation2 + $0x49] sm:$0xff]  ;;  %v2866_v24 = vld [vmem:[#allocation2 + $0x151] sm:$0xff] }
 0x13c   : > { %4276 = vmatprep.subr.bf16.mxu1 %v4897_v53  ;;  %v2875_v38 = vpack.c.bf16 %v2845_v17, %v2844_v31 }
 0x13e   : > { %4451 = vmatmul.mubr.bf16.gmra.mrb[28].mxu0 %v2583_v13  ;;  %v2871_v13 = vld [vmem:[#allocation2 + $0x189] sm:$0xff] }
 0x13f   : > { %4470 = vmatprep.mubr.bf16.mxu0 %v2874_v40  ;;  %4277 = vmatpush3.bf16.msra.mxu1 %v4897_v53  ;;  %v5892_v53 = vpack.c.bf16 %v2867_v25, %v2866_v24  ;;  %v2870_v40 = vld [vmem:[#allocation2 + $0x181] sm:$0xff] }
 0x140   : > { %4550 = vmatprep.subr.bf16.mxu1 %v5832_v32  ;;  %v5906_v17 = vpack.c.bf16 %v2871_v13, %v2870_v40 }
 0x142   : > { %4247 = vmatmul.mubr.bf16.gmra.mrb[16].mxu1 %v5655_v29  ;;  %v2849_v29 = vld [vmem:[#allocation2 + $0x81] sm:$0xff] }
 0x143   : > { %4250 = vmatprep.mubr.bf16.mxu1 %v5674_v48  ;;  %v2851_v48 = vld [vmem:[#allocation2 + $0x99] sm:$0xff]  ;;  %v2877_v63 = vpack.c.bf16 %v2849_v29, %v2848_v54 }
 0x144   : > { %v2878_v2 = vpack.c.bf16 %v2851_v48, %v2850_v1  ;;  %v3151_v29 = vld [vmem:[#allocation2 + $0x52] sm:$0xff]  ;;  %v3153_v48 = vld [vmem:[#allocation2 + $0x6a] sm:$0xff]  ;;  %v3155_v1 = vld [vmem:[#allocation2 + $0x82] sm:$0xff] }
 0x146   : > { %4471 = vmatmul.mubr.bf16.vlgmr.msra.gmra.mrb[0].mxu0 %v2875_v38  ;;  %v3148_v38 = vld [vmem:[#allocation2 + $0x32] sm:$0xff] }
 0x147   : > { %4503 = vmatpush3.bf16.msra.mxu0 %v4892_v36  ;;  %4474 = vmatprep.mubr.bf16.mxu0 %v2876_v14  ;;  %v3180_v14 = vpack.c.bf16 %v3149_v41, %v3148_v38 }
 0x148   : > { %4504 = vmatprep.subr.bf16.mxu0 %v4894_v44 }
 0x14a   : > { %4251 = vmatmul.mubr.bf16.gmra.mrb[20].mxu1 %v5679_v49  ;;  %v4899_v49 = vld [vmem:[%s6027_s1 + $0x220] sm:$0xff]  }
 0x14b   : > { %4254 = vmatprep.mubr.bf16.mxu1 %v5693_v9  ;;  %4505 = vmatpush3.bf16.msra.mxu0 %v4894_v44  ;;  %v2855_v9 = vld [vmem:[#allocation2 + $0xc9] sm:$0xff]  ;;  %v4915_v44 = vld [vmem:[%s6027_s1 + $0x138] sm:$0xff]  }
 0x14c   : > { %4506 = vmatprep.subr.bf16.mxu0 %v4896_v45  ;;  %v2880_v7 = vpack.c.bf16 %v2855_v9, %v2854_v5  ;;  %v3159_v9 = vld [vmem:[#allocation2 + $0xb2] sm:$0xff] }
 0x14e   : > { %4475 = vmatmul.mubr.bf16.gmra.mrb[4].mxu0 %v2877_v63  ;;  %v3154_v63 = vld [vmem:[#allocation2 + $0x7a] sm:$0xff] }
 0x14f   : > { %4478 = vmatprep.mubr.bf16.mxu0 %v2878_v2  ;;  %4507 = vmatpush3.bf16.msra.mxu0 %v4896_v45  ;;  %v3150_v45 = vld [vmem:[#allocation2 + $0x4a] sm:$0xff]  ;;  %v3157_v2 = vld [vmem:[#allocation2 + $0x9a] sm:$0xff] }
 0x150   : > { %4508 = vmatprep.subr.bf16.mxu0 %v4898_v42  ;;  %v3181_v54 = vpack.c.bf16 %v3151_v29, %v3150_v45 }
 0x152   : > { %4255 = vmatmul.mubr.bf16.gmra.mrb[24].mxu1 %v5698_v6  ;;  %v4901_v6 = vld [vmem:[%s6027_s1 + $0x230] sm:$0xff]  }
 0x153   : > { %4258 = vmatprep.mubr.bf16.mxu1 %v5711_v56  ;;  %4509 = vmatpush3.bf16.msra.mxu0 %v4898_v42  ;;  %v2859_v56 = vld [vmem:[#allocation2 + $0xf9] sm:$0xff] }
 0x154   : > { %4510 = vmatprep.subr.bf16.mxu0 %v4899_v49  ;;  %v5866_v18 = vpack.c.bf16 %v2859_v56, %v2858_v60  ;;  %v3156_v42 = vld [vmem:[#allocation2 + $0x92] sm:$0xff] }
 0x155   : > { %v3184_v62 = vpack.c.bf16 %v3157_v2, %v3156_v42  ;;  %v3167_v56 = vld [vmem:[#allocation2 + $0x112] sm:$0xff] }
 0x156   : > { %4479 = vmatmul.mubr.bf16.gmra.mrb[8].mxu0 %v2879_v4 }
 0x157   : > { %4482 = vmatprep.mubr.bf16.mxu0 %v2880_v7  ;;  %4511 = vmatpush3.bf16.msra.mxu0 %v4899_v49  ;;  %v3183_v49 = vpack.c.bf16 %v3155_v1, %v3154_v63  ;;  %v3165_v7 = vld [vmem:[#allocation2 + $0xfa] sm:$0xff] }
 0x158   : > { %4512 = vmatprep.subr.bf16.mxu0 %v4900_v50 }
 0x15a   : > { %4259 = vmatmul.mubr.bf16.gmra.mrb[28].mxu1 %v5716_v19  ;;  %v2861_v19 = vld [vmem:[#allocation2 + $0x111] sm:$0xff] }
 0x15b   : > { %4278 = vmatprep.mubr.bf16.mxu1 %v5659_v34  ;;  %4513 = vmatpush3.bf16.msra.mxu0 %v4900_v50  ;;  %v2863_v34 = vld [vmem:[#allocation2 + $0x129] sm:$0xff]  ;;  %v5873_v36 = vpack.c.bf16 %v2861_v19, %v2860_v21 }
 0x15c   : > { %4514 = vmatprep.subr.bf16.mxu0 %v4901_v6  ;;  %v5878_v55 = vpack.c.bf16 %v2863_v34, %v2862_v22  ;;  %v3163_v50 = vld [vmem:[#allocation2 + $0xe2] sm:$0xff]  ;;  %v3173_v34 = vld [vmem:[#allocation2 + $0x15a] sm:$0xff] }
 0x15d   : > { %v3171_v19 = vld [vmem:[#allocation2 + $0x142] sm:$0xff] }
 0x15e   : > { %4483 = vmatmul.mubr.bf16.gmra.mrb[12].mxu0 %v5861_v16 }
 0x15f   : > { %4486 = vmatprep.mubr.bf16.mxu0 %v5866_v18  ;;  %4515 = vmatpush3.bf16.msra.mxu0 %v4901_v6 }
 0x160   : > { %4516 = vmatprep.subr.bf16.mxu0 %v4902_v46 }
 0x162   : > { %4279 = vmatmul.mubr.bf16.vlgmr.msra.gmra.mrb[0].mxu1 %v5664_v43  ;;  %v4910_v43 = vld [vmem:[%s6027_s1 + $0x110] sm:$0xff]  }
 0x163   : > { %4282 = vmatprep.mubr.bf16.mxu1 %v5684_v27  ;;  %4558 = vmatpush3.bf16.msra.mxu1 %v5832_v32  ;;  %v2865_v27 = vld [vmem:[#allocation2 + $0x141] sm:$0xff] }
 0x164   : > { %4551 = vmatprep.subr.bf16.mxu1 %v4909_v47  ;;  %4517 = vmatpush3.bf16.msra.mxu0 %v4902_v46  ;;  %v5887_v58 = vpack.c.bf16 %v2865_v27, %v2864_v12  ;;  %v4913_v32 = vld [vmem:[%s6027_s1 + $0x128] sm:$0xff]  }
 0x165   : > { %v3179_v12 = vld [vmem:[#allocation2 + $0x1a2] sm:$0xff] }
 0x166   : > { %4487 = vmatmul.mubr.bf16.gmra.mrb[16].mxu0 %v5873_v36 }
 0x167   : > { %4490 = vmatprep.mubr.bf16.mxu0 %v5878_v55  ;;  %4559 = vmatpush3.bf16.msra.mxu1 %v4909_v47  ;;  %v3175_v47 = vld [vmem:[#allocation2 + $0x172] sm:$0xff] }
 0x168   : > { %4552 = vmatprep.subr.bf16.mxu1 %v4910_v43 }
 0x16a   : > { %4283 = vmatmul.mubr.bf16.gmra.mrb[4].mxu1 %v5689_v61  ;;  %v4912_v61 = vld [vmem:[%s6027_s1 + $0x120] sm:$0xff]  }
 0x16b   : > { %4286 = vmatprep.mubr.bf16.mxu1 %v5702_v37  ;;  %4560 = vmatpush3.bf16.msra.mxu1 %v4910_v43  ;;  %v2869_v37 = vld [vmem:[#allocation2 + $0x171] sm:$0xff] }
 0x16c   : > { %4553 = vmatprep.subr.bf16.mxu1 %v4911_v28  ;;  %v5901_v33 = vpack.c.bf16 %v2869_v37, %v2868_v30  ;;  %v3177_v43 = vld [vmem:[#allocation2 + $0x18a] sm:$0xff] }
 0x16e   : > { %4491 = vmatmul.mubr.bf16.gmra.mrb[20].mxu0 %v5887_v58 }
 0x16f   : > { %4494 = vmatprep.mubr.bf16.mxu0 %v5892_v53  ;;  %4561 = vmatpush3.bf16.msra.mxu1 %v4911_v28 }
 0x170   : > { %4554 = vmatprep.subr.bf16.mxu1 %v4912_v61 }
 0x172   : > { %4287 = vmatmul.mubr.bf16.gmra.mrb[8].mxu1 %v5707_v35  ;;  %v2872_v35 = vld [vmem:[#allocation2 + $0x199] sm:$0xff] }
 0x173   : > { %4290 = vmatprep.mubr.bf16.mxu1 %v5720_v51  ;;  %4562 = vmatpush3.bf16.msra.mxu1 %v4912_v61  ;;  %v4914_v51 = vld [vmem:[%s6027_s1 + $0x130] sm:$0xff]   ;;  %v2889_v31 = vpack.c.bf16 %v2873_v11, %v2872_v35 }
 0x174   : > { %4555 = vmatprep.subr.bf16.mxu1 %v4913_v32 }
 0x176   : > { %4495 = vmatmul.mubr.bf16.gmra.mrb[24].mxu0 %v5901_v33 }
 0x177   : > { %4498 = vmatprep.mubr.bf16.mxu0 %v5906_v17  ;;  %4563 = vmatpush3.bf16.msra.mxu1 %v4913_v32 }
 0x178   : > { %4556 = vmatprep.subr.bf16.mxu1 %v4914_v51 }
 0x17a   : > { %4291 = vmatmul.mubr.bf16.gmra.mrb[12].mxu1 %v5725_v23  ;;  %v3152_v23 = vld [vmem:[#allocation2 + $0x62] sm:$0xff] }
 0x17b   : > { %4294 = vmatprep.mubr.bf16.mxu1 %v5735_v52  ;;  %4564 = vmatpush3.bf16.msra.mxu1 %v4914_v51  ;;  %v3182_v52 = vpack.c.bf16 %v3153_v48, %v3152_v23 }
 0x17c   : > { %4557 = vmatprep.subr.bf16.mxu1 %v4915_v44 }
 0x17e   : > { %4499 = vmatmul.mubr.bf16.gmra.mrb[28].mxu0 %v2889_v31 }
 0x17f   : > { %4518 = vmatprep.mubr.bf16.mxu0 %v3180_v14  ;;  %4565 = vmatpush3.bf16.msra.mxu1 %v4915_v44 }
 0x182   : > { %4295 = vmatmul.mubr.bf16.gmra.mrb[16].mxu1 %v5738_v20  ;;  %v3158_v20 = vld [vmem:[#allocation2 + $0xaa] sm:$0xff] }
 0x183   : > { %4298 = vmatprep.mubr.bf16.mxu1 %v5748_v57  ;;  %v3160_v57 = vld [vmem:[#allocation2 + $0xc2] sm:$0xff]  ;;  %v3185_v4 = vpack.c.bf16 %v3159_v9, %v3158_v20 }
 0x184   : > { %v3186_v5 = vpack.c.bf16 %v3161_v39, %v3160_v57 }
 0x186   : > { %4519 = vmatmul.mubr.bf16.vlgmr.msra.gmra.mrb[0].mxu0 %v3181_v54 }
 0x187   : > { %4522 = vmatprep.mubr.bf16.mxu0 %v3182_v52 }
 0x18a   : > { %4299 = vmatmul.mubr.bf16.gmra.mrb[20].mxu1 %v5753_v59  ;;  %v3162_v59 = vld [vmem:[#allocation2 + $0xda] sm:$0xff] }
 0x18b   : > { %4302 = vmatprep.mubr.bf16.mxu1 %v5762_v0  ;;  %v3164_v0 = vld [vmem:[#allocation2 + $0xf2] sm:$0xff]  ;;  %v3187_v6 = vpack.c.bf16 %v3163_v50, %v3162_v59 }
 0x18c   : > { %v3188_v8 = vpack.c.bf16 %v3165_v7, %v3164_v0 }
 0x18e   : > { %4523 = vmatmul.mubr.bf16.gmra.mrb[4].mxu0 %v3183_v49 }
 0x18f   : > { %4526 = vmatprep.mubr.bf16.mxu0 %v3184_v62 }
 0x192   : > { %4303 = vmatmul.mubr.bf16.gmra.mrb[24].mxu1 %v5767_v3  ;;  %v3166_v3 = vld [vmem:[#allocation2 + $0x10a] sm:$0xff] }
 0x193   : > { %4306 = vmatprep.mubr.bf16.mxu1 %v5776_v15  ;;  %v3168_v15 = vld [vmem:[#allocation2 + $0x122] sm:$0xff]  ;;  %v3189_v60 = vpack.c.bf16 %v3167_v56, %v3166_v3 }
 0x194   : > { %v3190_v46 = vpack.c.bf16 %v3169_v10, %v3168_v15 }
 0x196   : > { %4527 = vmatmul.mubr.bf16.gmra.mrb[8].mxu0 %v3185_v4 }
 0x197   : > { %4530 = vmatprep.mubr.bf16.mxu0 %v3186_v5 }
 0x19a   : > { %4307 = vmatmul.mubr.bf16.gmra.mrb[28].mxu1 %v5819_v26  ;;  %v3170_v26 = vld [vmem:[#allocation2 + $0x13a] sm:$0xff] }
 0x19b   : > { %4342 = vmatprep.mubr.bf16.mxu1 %v5861_v16  ;;  %v3172_v16 = vld [vmem:[#allocation2 + $0x152] sm:$0xff]  ;;  %v3191_v21 = vpack.c.bf16 %v3171_v19, %v3170_v26 }
 0x19c   : > { %v3192_v22 = vpack.c.bf16 %v3173_v34, %v3172_v16 }
 0x19e   : > { %4531 = vmatmul.mubr.bf16.gmra.mrb[12].mxu0 %v3187_v6 }
 0x19f   : > { %4534 = vmatprep.mubr.bf16.mxu0 %v3188_v8 }
 0x1a2   : > { %4343 = vmatmul.mubr.bf16.vlgmr.msra.gmra.mrb[16].mxu1 %v5866_v18  ;;  %v3174_v18 = vld [vmem:[#allocation2 + $0x16a] sm:$0xff] }
 0x1a3   : > { %4346 = vmatprep.mubr.bf16.mxu1 %v5873_v36  ;;  %v3176_v36 = vld [vmem:[#allocation2 + $0x182] sm:$0xff]  ;;  %v3193_v27 = vpack.c.bf16 %v3175_v47, %v3174_v18 }
 0x1a4   : > { %v3194_v25 = vpack.c.bf16 %v3177_v43, %v3176_v36 }
 0x1a6   : > { %4535 = vmatmul.mubr.bf16.gmra.mrb[16].mxu0 %v3189_v60 }
 0x1a7   : > { %4538 = vmatprep.mubr.bf16.mxu0 %v3190_v46 }
 0x1aa   : > { %4347 = vmatmul.mubr.bf16.gmra.mrb[20].mxu1 %v5878_v55  ;;  %v3178_v55 = vld [vmem:[#allocation2 + $0x19a] sm:$0xff] }
 0x1ab   : > { %4350 = vmatprep.mubr.bf16.mxu1 %v5887_v58  ;;  %v3195_v58 = vpack.c.bf16 %v3179_v12, %v3178_v55 }
 0x1ae   : > { %4539 = vmatmul.mubr.bf16.gmra.mrb[20].mxu0 %v3191_v21 }
 0x1af   : > { %4542 = vmatprep.mubr.bf16.mxu0 %v3192_v22 }
 0x1b2   : > { %4351 = vmatmul.mubr.bf16.gmra.mrb[24].mxu1 %v5892_v53 }
 0x1b3   : > { %4354 = vmatprep.mubr.bf16.mxu1 %v5901_v33 }
 0x1b6   : > { %4543 = vmatmul.mubr.bf16.gmra.mrb[24].mxu0 %v3193_v27 }
 0x1b7   : > { %4546 = vmatprep.mubr.bf16.mxu0 %v3194_v25 }
 0x1ba   : > { %4355 = vmatmul.mubr.bf16.gmra.mrb[28].mxu1 %v5906_v17 }
 0x1be   : > { %4547 = vmatmul.mubr.bf16.gmra.mrb[28].mxu0 %v3195_v58 }
 0x235   : > { %v4280_v24 = vpop.f32.mrb[0].mxu1 }
 0x236   : > { %v1764_v28 = vpop.f32.mrb[1].mxu1 }
 0x237   : > { %v4281_v61 = vpop.f32.mrb[2].mxu1 }
 0x238   : > { %v1767_v37 = vpop.f32.mrb[3].mxu1 }
 0x23d   : > { %v4284_v53 = vpop.f32.mrb[4].mxu1 }
 0x23e   : > { %v1780_v13 = vpop.f32.mrb[5].mxu1 }
 0x23f   : > { %v4285_v30 = vpop.f32.mrb[6].mxu1 }
 0x240   : > { %v1783_v40 = vpop.f32.mrb[7].mxu1 }
 0x245   : > { %v4288_v33 = vpop.f32.mrb[8].mxu1 }
 0x246   : > { %v1796_v32 = vpop.f32.mrb[9].mxu1 }
 0x247   : > { %v4289_v35 = vpop.f32.mrb[10].mxu1 }
 0x248   : > { %v5933_v11 = vpop.f32.mrb[11].mxu1 }
 0x24d   : > { %v5935_v51 = vpop.f32.mrb[12].mxu1 }
 0x24e   : > { %v5937_v31 = vpop.f32.mrb[13].mxu1 }
 0x24f   : > { %v5939_v17 = vpop.f32.mrb[14].mxu1 }
 0x250   : > { %v5941_v38 = vpop.f32.mrb[15].mxu1 }
 0x259   : > { %v4520_v41 = vpop.f32.mrb[0].mxu0 }
 0x25a   : > { %v4566_v44 = vadd.f32 %v4520_v41, %v4280_v24  ;;  %v3295_v14 = vpop.f32.mrb[1].mxu0 }
 0x25b   : > { %v4567_v45 = vadd.f32 %v3295_v14, %v1764_v28  ;;  %v4521_v29 = vpop.f32.mrb[2].mxu0 }
 0x25c   : > { %3457 = vst.msk [vmem:[%s5948_s15 + $0x10] sm:$0xff] %vm3454_vm9, %v4566_v44  ;;  %v4568_v23 = vadd.f32 %v4521_v29, %v4281_v61  ;;  %v3298_v48 = vpop.f32.mrb[3].mxu0  ;;  %v3526_v42 = vmul.f32 %v4566_v44, %v4566_v44 }
 0x25d   : > { %3455 = vst.msk [vmem:[%s5948_s15] sm:$0xff] %vm3454_vm9, %v4567_v45  ;;  %v4569_v54 = vadd.f32 %v3298_v48, %v1767_v37  ;;  %v3524_v52 = vmul.f32 %v4567_v45, %v4567_v45 }
 0x25e   : > { %3458 = vst.msk [vmem:[%s5948_s15 + $0x18] sm:$0xff] %vm3454_vm9, %v4568_v23  ;;  %v3527_v57 = vmul.f32 %v4568_v23, %v4568_v23 }
 0x25f   : > { %3456 = vst.msk [vmem:[%s5948_s15 + $0x8] sm:$0xff] %vm3454_vm9, %v4569_v54  ;;  %v3487_v63 = vadd.f32 %v4569_v54, %v4567_v45  ;;  %v3525_v1 = vmul.f32 %v4569_v54, %v4569_v54 }
 0x261   : > { %v3488_v2 = vadd.f32 %v4566_v44, %v3487_v63  ;;  %v3556_v49 = vadd.f32 %v3525_v1, %v3524_v52  ;;  %v4524_v62 = vpop.f32.mrb[4].mxu0 }
 0x262   : > { %v4570_v20 = vadd.f32 %v4524_v62, %v4284_v53  ;;  %v3311_v9 = vpop.f32.mrb[5].mxu0 }
 0x263   : > { %v3557_v39 = vadd.f32 %v3556_v49, %v3526_v42  ;;  %v4571_v4 = vadd.f32 %v3311_v9, %v1780_v13  ;;  %v3489_v5 = vadd.f32 %v4568_v23, %v3488_v2  ;;  %v4525_v59 = vpop.f32.mrb[6].mxu0 }
 0x264   : > { %3461 = vst.msk [vmem:[%s5948_s15 + $0x30] sm:$0xff] %vm3454_vm9, %v4570_v20  ;;  %v4572_v50 = vadd.f32 %v4525_v59, %v4285_v30  ;;  %v3314_v0 = vpop.f32.mrb[7].mxu0  ;;  %v3530_v60 = vmul.f32 %v4570_v20, %v4570_v20 }
 0x265   : > { %3459 = vst.msk [vmem:[%s5948_s15 + $0x20] sm:$0xff] %vm3454_vm9, %v4571_v4  ;;  %v3490_v7 = vadd.f32 %v4571_v4, %v3489_v5  ;;  %v3528_v6 = vmul.f32 %v4571_v4, %v4571_v4  ;;  %v3558_v8 = vadd.f32 %v3557_v39, %v3527_v57  ;;  %v4573_v3 = vadd.f32 %v3314_v0, %v1783_v40 }
 0x266   : > { %3462 = vst.msk [vmem:[%s5948_s15 + $0x38] sm:$0xff] %vm3454_vm9, %v4572_v50  ;;  %v3531_v21 = vmul.f32 %v4572_v50, %v4572_v50 }
 0x267   : > { %v3559_v56 = vadd.f32 %v3558_v8, %v3528_v6  ;;  %3460 = vst.msk [vmem:[%s5948_s15 + $0x28] sm:$0xff] %vm3454_vm9, %v4573_v3  ;;  %v3491_v15 = vadd.f32 %v4573_v3, %v3490_v7  ;;  %v3529_v10 = vmul.f32 %v4573_v3, %v4573_v3 }
 0x269   : > { %v3492_v46 = vadd.f32 %v4570_v20, %v3491_v15  ;;  %v3560_v26 = vadd.f32 %v3559_v56, %v3529_v10  ;;  %v4528_v19 = vpop.f32.mrb[8].mxu0 }
 0x26a   : > { %v4574_v16 = vadd.f32 %v4528_v19, %v4288_v33  ;;  %v3327_v34 = vpop.f32.mrb[9].mxu0 }
 0x26b   : > { %v3561_v22 = vadd.f32 %v3560_v26, %v3530_v60  ;;  %v4575_v18 = vadd.f32 %v3327_v34, %v1796_v32  ;;  %v3493_v47 = vadd.f32 %v4572_v50, %v3492_v46  ;;  %v4529_v36 = vpop.f32.mrb[10].mxu0 }
 0x26c   : > { %3465 = vst.msk [vmem:[%s5948_s15 + $0x50] sm:$0xff] %vm3454_vm9, %v4574_v16  ;;  %v4576_v43 = vadd.f32 %v4529_v36, %v4289_v35  ;;  %v3330_v27 = vpop.f32.mrb[11].mxu0  ;;  %v3534_v37 = vmul.f32 %v4574_v16, %v4574_v16 }
 0x26d   : > { %3463 = vst.msk [vmem:[%s5948_s15 + $0x40] sm:$0xff] %vm3454_vm9, %v4575_v18  ;;  %v3494_v25 = vadd.f32 %v4575_v18, %v3493_v47  ;;  %v3532_v55 = vmul.f32 %v4575_v18, %v4575_v18  ;;  %v3562_v12 = vadd.f32 %v3561_v22, %v3531_v21  ;;  %v4577_v58 = vadd.f32 %v3330_v27, %v5933_v11 }
 0x26e   : > { %3466 = vst.msk [vmem:[%s5948_s15 + $0x58] sm:$0xff] %vm3454_vm9, %v4576_v43  ;;  %v3535_v32 = vmul.f32 %v4576_v43, %v4576_v43 }
 0x26f   : > { %v3563_v24 = vadd.f32 %v3562_v12, %v3532_v55  ;;  %3464 = vst.msk [vmem:[%s5948_s15 + $0x48] sm:$0xff] %vm3454_vm9, %v4577_v58  ;;  %v3495_v28 = vadd.f32 %v4577_v58, %v3494_v25  ;;  %v3533_v61 = vmul.f32 %v4577_v58, %v4577_v58 }
 0x271   : > { %v3496_v53 = vadd.f32 %v4574_v16, %v3495_v28  ;;  %v3564_v13 = vadd.f32 %v3563_v24, %v3533_v61  ;;  %v4532_v30 = vpop.f32.mrb[12].mxu0 }
 0x272   : > { %v4578_v40 = vadd.f32 %v4532_v30, %v5935_v51  ;;  %v3343_v33 = vpop.f32.mrb[13].mxu0 }
 0x273   : > { %v3565_v35 = vadd.f32 %v3564_v13, %v3534_v37  ;;  %v4579_v11 = vadd.f32 %v3343_v33, %v5937_v31  ;;  %v3497_v41 = vadd.f32 %v4576_v43, %v3496_v53  ;;  %v4533_v44 = vpop.f32.mrb[14].mxu0 }
 0x274   : > { %3469 = vst.msk [vmem:[%s5948_s15 + $0x70] sm:$0xff] %vm3454_vm9, %v4578_v40  ;;  %v4580_v14 = vadd.f32 %v4533_v44, %v5939_v17  ;;  %v3346_v45 = vpop.f32.mrb[15].mxu0  ;;  %v3538_v2 = vmul.f32 %v4578_v40, %v4578_v40 }
 0x275   : > { %3467 = vst.msk [vmem:[%s5948_s15 + $0x60] sm:$0xff] %vm3454_vm9, %v4579_v11  ;;  %v3498_v29 = vadd.f32 %v4579_v11, %v3497_v41  ;;  %v3536_v23 = vmul.f32 %v4579_v11, %v4579_v11  ;;  %v3566_v48 = vadd.f32 %v3565_v35, %v3535_v32  ;;  %v4581_v51 = vadd.f32 %v3346_v45, %v5941_v38  ;;  %v4344_v54 = vpop.f32.mrb[16].mxu1 }
 0x276   : > { %3470 = vst.msk [vmem:[%s5948_s15 + $0x78] sm:$0xff] %vm3454_vm9, %v4580_v14  ;;  %v2134_v52 = vpop.f32.mrb[17].mxu1  ;;  %v3539_v57 = vmul.f32 %v4580_v14, %v4580_v14 }
 0x277   : > { %v3567_v63 = vadd.f32 %v3566_v48, %v3536_v23  ;;  %3468 = vst.msk [vmem:[%s5948_s15 + $0x68] sm:$0xff] %vm3454_vm9, %v4581_v51  ;;  %v3499_v31 = vadd.f32 %v4581_v51, %v3498_v29  ;;  %v3537_v1 = vmul.f32 %v4581_v51, %v4581_v51  ;;  %v4345_v42 = vpop.f32.mrb[18].mxu1 }
 0x278   : > { %v2137_v17 = vpop.f32.mrb[19].mxu1 }
 0x279   : > { %v3500_v49 = vadd.f32 %v4578_v40, %v3499_v31  ;;  %v3568_v62 = vadd.f32 %v3567_v63, %v3537_v1  ;;  %v4536_v20 = vpop.f32.mrb[16].mxu0 }
 0x27a   : > { %v4582_v9 = vadd.f32 %v4536_v20, %v4344_v54  ;;  %v3359_v38 = vpop.f32.mrb[17].mxu0 }
 0x27b   : > { %v3569_v39 = vadd.f32 %v3568_v62, %v3538_v2  ;;  %v4583_v4 = vadd.f32 %v3359_v38, %v2134_v52  ;;  %v3501_v5 = vadd.f32 %v4580_v14, %v3500_v49  ;;  %v4537_v59 = vpop.f32.mrb[18].mxu0 }
 0x27c   : > { %3473 = vst.msk [vmem:[%s5948_s15 + $0x90] sm:$0xff] %vm3454_vm9, %v4582_v9  ;;  %v4584_v50 = vadd.f32 %v4537_v59, %v4345_v42  ;;  %v3362_v0 = vpop.f32.mrb[19].mxu0  ;;  %v3542_v16 = vmul.f32 %v4582_v9, %v4582_v9 }
 0x27d   : > { %3471 = vst.msk [vmem:[%s5948_s15 + $0x80] sm:$0xff] %vm3454_vm9, %v4583_v4  ;;  %v3502_v7 = vadd.f32 %v4583_v4, %v3501_v5  ;;  %v3540_v6 = vmul.f32 %v4583_v4, %v4583_v4  ;;  %v3570_v8 = vadd.f32 %v3569_v39, %v3539_v57  ;;  %v4585_v3 = vadd.f32 %v3362_v0, %v2137_v17  ;;  %v4348_v56 = vpop.f32.mrb[20].mxu1 }
 0x27e   : > { %3474 = vst.msk [vmem:[%s5948_s15 + $0x98] sm:$0xff] %vm3454_vm9, %v4584_v50  ;;  %v2150_v15 = vpop.f32.mrb[21].mxu1  ;;  %v3543_v36 = vmul.f32 %v4584_v50, %v4584_v50 }
 0x27f   : > { %v3571_v10 = vadd.f32 %v3570_v8, %v3540_v6  ;;  %3472 = vst.msk [vmem:[%s5948_s15 + $0x88] sm:$0xff] %vm3454_vm9, %v4585_v3  ;;  %v3503_v60 = vadd.f32 %v4585_v3, %v3502_v7  ;;  %v3541_v46 = vmul.f32 %v4585_v3, %v4585_v3  ;;  %v4349_v26 = vpop.f32.mrb[22].mxu1 }
 0x280   : > { %v2153_v19 = vpop.f32.mrb[23].mxu1 }
 0x281   : > { %v3504_v34 = vadd.f32 %v4582_v9, %v3503_v60  ;;  %v3572_v21 = vadd.f32 %v3571_v10, %v3541_v46  ;;  %v4540_v22 = vpop.f32.mrb[20].mxu0 }
 0x282   : > { %v4586_v18 = vadd.f32 %v4540_v22, %v4348_v56  ;;  %v3375_v47 = vpop.f32.mrb[21].mxu0 }
 0x283   : > { %v3573_v43 = vadd.f32 %v3572_v21, %v3542_v16  ;;  %v4587_v27 = vadd.f32 %v3375_v47, %v2150_v15  ;;  %v3505_v25 = vadd.f32 %v4584_v50, %v3504_v34  ;;  %v4541_v55 = vpop.f32.mrb[22].mxu0 }
 0x284   : > { %3477 = vst.msk [vmem:[%s5948_s15 + $0xb0] sm:$0xff] %vm3454_vm9, %v4586_v18  ;;  %v4588_v12 = vadd.f32 %v4541_v55, %v4349_v26  ;;  %v3378_v58 = vpop.f32.mrb[23].mxu0  ;;  %v3546_v11 = vmul.f32 %v4586_v18, %v4586_v18 }
 0x285   : > { %3475 = vst.msk [vmem:[%s5948_s15 + $0xa0] sm:$0xff] %vm3454_vm9, %v4587_v27  ;;  %v3506_v24 = vadd.f32 %v4587_v27, %v3505_v25  ;;  %v3544_v28 = vmul.f32 %v4587_v27, %v4587_v27  ;;  %v3574_v61 = vadd.f32 %v3573_v43, %v3543_v36  ;;  %v4589_v37 = vadd.f32 %v3378_v58, %v2153_v19  ;;  %v4352_v53 = vpop.f32.mrb[24].mxu1 }
 0x286   : > { %3478 = vst.msk [vmem:[%s5948_s15 + $0xb8] sm:$0xff] %vm3454_vm9, %v4588_v12  ;;  %v2166_v13 = vpop.f32.mrb[25].mxu1  ;;  %v3547_v23 = vmul.f32 %v4588_v12, %v4588_v12 }
 0x287   : > { %v3575_v30 = vadd.f32 %v3574_v61, %v3544_v28  ;;  %3476 = vst.msk [vmem:[%s5948_s15 + $0xa8] sm:$0xff] %vm3454_vm9, %v4589_v37  ;;  %v3507_v40 = vadd.f32 %v4589_v37, %v3506_v24  ;;  %v3545_v33 = vmul.f32 %v4589_v37, %v4589_v37  ;;  %v4353_v32 = vpop.f32.mrb[26].mxu1 }
 0x288   : > { %v2169_v35 = vpop.f32.mrb[27].mxu1 }
 0x289   : > { %v3508_v41 = vadd.f32 %v4586_v18, %v3507_v40  ;;  %v3576_v44 = vadd.f32 %v3575_v30, %v3545_v33  ;;  %v4544_v14 = vpop.f32.mrb[24].mxu0 }
 0x28a   : > { %v4590_v45 = vadd.f32 %v4544_v14, %v4352_v53  ;;  %v3391_v29 = vpop.f32.mrb[25].mxu0 }
 0x28b   : > { %v3577_v48 = vadd.f32 %v3576_v44, %v3546_v11  ;;  %v4591_v51 = vadd.f32 %v3391_v29, %v2166_v13  ;;  %v3509_v54 = vadd.f32 %v4588_v12, %v3508_v41  ;;  %v4545_v52 = vpop.f32.mrb[26].mxu0 }
 0x28c   : > { %3481 = vst.msk [vmem:[%s5948_s15 + $0xd0] sm:$0xff] %vm3454_vm9, %v4590_v45  ;;  %v4592_v63 = vadd.f32 %v4545_v52, %v4353_v32  ;;  %v3394_v31 = vpop.f32.mrb[27].mxu0  ;;  %v3550_v4 = vmul.f32 %v4590_v45, %v4590_v45 }
 0x28d   : > { %3479 = vst.msk [vmem:[%s5948_s15 + $0xc0] sm:$0xff] %vm3454_vm9, %v4591_v51  ;;  %v3510_v1 = vadd.f32 %v4591_v51, %v3509_v54  ;;  %v3548_v42 = vmul.f32 %v4591_v51, %v4591_v51  ;;  %v3578_v17 = vadd.f32 %v3577_v48, %v3547_v23  ;;  %v4593_v2 = vadd.f32 %v3394_v31, %v2169_v35  ;;  %v4356_v49 = vpop.f32.mrb[28].mxu1 }
 0x28e   : > { %3482 = vst.msk [vmem:[%s5948_s15 + $0xd8] sm:$0xff] %vm3454_vm9, %v4592_v63  ;;  %v2182_v62 = vpop.f32.mrb[29].mxu1  ;;  %v3551_v6 = vmul.f32 %v4592_v63, %v4592_v63 }
 0x28f   : > { %v3579_v20 = vadd.f32 %v3578_v17, %v3548_v42  ;;  %3480 = vst.msk [vmem:[%s5948_s15 + $0xc8] sm:$0xff] %vm3454_vm9, %v4593_v2  ;;  %v3511_v9 = vadd.f32 %v4593_v2, %v3510_v1  ;;  %v3549_v38 = vmul.f32 %v4593_v2, %v4593_v2  ;;  %v4357_v57 = vpop.f32.mrb[30].mxu1 }
 0x290   : > { %v2185_v39 = vpop.f32.mrb[31].mxu1 }
 0x291   : > { %v3512_v5 = vadd.f32 %v4590_v45, %v3511_v9  ;;  %v3580_v59 = vadd.f32 %v3579_v20, %v3549_v38  ;;  %v4548_v50 = vpop.f32.mrb[28].mxu0 }
 0x292   : > { %v4594_v0 = vadd.f32 %v4548_v50, %v4356_v49  ;;  %v3407_v7 = vpop.f32.mrb[29].mxu0 }
 0x293   : > { %v3581_v8 = vadd.f32 %v3580_v59, %v3550_v4  ;;  %v4595_v3 = vadd.f32 %v3407_v7, %v2182_v62  ;;  %v3513_v56 = vadd.f32 %v4592_v63, %v3512_v5  ;;  %v4549_v15 = vpop.f32.mrb[30].mxu0 }
 0x294   : > { %3485 = vst.msk [vmem:[%s5948_s15 + $0xf0] sm:$0xff] %vm3454_vm9, %v4594_v0  ;;  %v4596_v10 = vadd.f32 %v4549_v15, %v4357_v57  ;;  %v3410_v60 = vpop.f32.mrb[31].mxu0  ;;  %v3554_v18 = vmul.f32 %v4594_v0, %v4594_v0 }
 0x295   : > { %3483 = vst.msk [vmem:[%s5948_s15 + $0xe0] sm:$0xff] %vm3454_vm9, %v4595_v3  ;;  %v3514_v46 = vadd.f32 %v4595_v3, %v3513_v56  ;;  %v3552_v26 = vmul.f32 %v4595_v3, %v4595_v3  ;;  %v3582_v19 = vadd.f32 %v3581_v8, %v3551_v6  ;;  %v4597_v16 = vadd.f32 %v3410_v60, %v2185_v39 }
 0x296   : > { %3486 = vst.msk [vmem:[%s5948_s15 + $0xf8] sm:$0xff] %vm3454_vm9, %v4596_v10  ;;  %v3555_v43 = vmul.f32 %v4596_v10, %v4596_v10 }
 0x297   : > { %v3583_v34 = vadd.f32 %v3582_v19, %v3552_v26  ;;  %3484 = vst.msk [vmem:[%s5948_s15 + $0xe8] sm:$0xff] %vm3454_vm9, %v4597_v16  ;;  %v3515_v21 = vadd.f32 %v4597_v16, %v3514_v46  ;;  %v3553_v22 = vmul.f32 %v4597_v16, %v4597_v16 }
 0x299   : > { %v3516_v47 = vadd.f32 %v4594_v0, %v3515_v21  ;;  %v3584_v36 = vadd.f32 %v3583_v34, %v3553_v22 }
 0x29b   : > { %v3517_v27 = vadd.f32 %v4596_v10, %v3516_v47  ;;  %v3585_v25 = vadd.f32 %v3584_v36, %v3554_v18 }
 0x29d   : > { %v3518_v55 = vrot.slane %v3517_v27, 4  ;;  %v3586_v12 = vadd.f32 %v3585_v25, %v3555_v43 }
 0x29f   : > { %v3519_v58 = vadd.f32 %v3518_v55, %v3517_v27  ;;  %v3587_v24 = vrot.slane %v3586_v12, 4 }
 0x2a1   : > { %v3520_v28 = vrot.slane %v3519_v58, 2  ;;  %v3588_v61 = vadd.f32 %v3587_v24, %v3586_v12 }
 0x2a3   : > { %v3521_v37 = vadd.f32 %v3520_v28, %v3519_v58  ;;  %v3589_v53 = vrot.slane %v3588_v61, 2 }
 0x2a5   : > { %v3522_v13 = vrot.slane %v3521_v37, 1  ;;  %v3590_v30 = vadd.f32 %v3589_v53, %v3588_v61 }
 0x2a7   : > { %v3591_v40 = vrot.slane %v3590_v30, 1  ;;  %v3523_v33 = vadd.f32 %v3522_v13, %v3521_v37 }
 0x2a9   : > { %v3592_v32 = vadd.f32 %v3591_v40, %v3590_v30 }
 0x2ab   : > { %v3594_v35 = vsel %vm3593_vm10, %v3523_v33, %v3592_v32 }
 0x2ac   : > { %3595 = vst [vmem:[%s235_s3] sm:$0x3] %v3594_v35 }
 0x2ad PF: > { %s16_s18 = sadd.s32 1, %s4991_s18  }
 0x2ae   : > { %p13_p4 = scmp.ge.s32.totalorder %s16_s18, 4  }
 0x2b0   :  { %15 = sbr.rel (!%p13_p4) target bundleno = 1 (0x1), region = 89 }

// kernel: acoor_conv_forward.4
= control target key start
LH: loop header
LB: loop body
LE: loop exit
PB: predicated region body
PF: predicated region fallthrough
CT: control target
= control target key end

     0   :  { %s5135_s18 = smov 0   ;;  %s6247_s0 = inlined_call_operand.vmem [shape: f32[2,16,16,8], index: 0, kind: input, shape index: {}]   ;;  %s6248_s1 = inlined_call_operand.vmem [shape: bf16[9,128,128], index: 1, kind: input, shape index: {}]   ;;  %s6249_s2 = inlined_call_operand.vmem [shape: f32[1,8], index: 2, kind: input, shape index: {}]   ;;  %s6250_s3 = inlined_call_operand.vmem [shape: f32[1,8], index: 3, kind: input, shape index: {}]   ;;  %s6251_s4 = inlined_call_operand.vmem [shape: f32[2,16,16,8], index: 4, kind: output, shape index: {0}]   ;;  %s6252_s5 = inlined_call_operand.vmem [shape: f32[2,2,128], index: 5, kind: output, shape index: {1}]  }
   0x1 LB: > { %s3791_s19 = sadd.s32 4294967295, %s5102_s18   ;;  %p3795_p0 = scmp.ge.s32.totalorder %s5102_s18, 1  ;;  %s5102_s18 = sphi %s5135_s18, %s16_s18  }
   0x2   : > { %p190_p1 = scmp.lt.s32.totalorder %s5102_s18, 3 }
   0x4   : > { %p191_p2 = pnand %p3795_p0, %p190_p1 }
   0x5   : > { %v379_v0 = vlaneseq (!%p191_p2)  ;;  %v4942_v1 = vld [vmem:[%s6248_s1 + $0x40] sm:$0xff] (!%p191_p2)   ;;  %v4944_v5 = vld [vmem:[%s6248_s1 + $0x48] sm:$0xff] (!%p191_p2)   ;;  %v4946_v10 = vld [vmem:[%s6248_s1 + $0x50] sm:$0xff] (!%p191_p2)   ;;  %v5104_v53 = vmov (!%p191_p2), 0.0   ;;  %p222_p3 = scmp.lt.s32.totalorder (!%p191_p2), %s3791_s19, 1  ;;  %vm666_vm4 = vcmask (!%p191_p2), 64512  }
   0x6   : > { %194 = sbr.rel (%p191_p2) target bundleno = 685 (0x2ad), region = 36  ;;  %v4943_v2 = vld [vmem:[%s6248_s1 + $0x100] sm:$0xff] (!%p191_p2)   ;;  %4229 = vmatprep.subr.bf16.mxu1 (!%p191_p2), %v4942_v1  ;;  %v4945_v9 = vld [vmem:[%s6248_s1 + $0x108] sm:$0xff] (!%p191_p2)   ;;  %v4947_v13 = vld [vmem:[%s6248_s1 + $0x110] sm:$0xff] (!%p191_p2)   ;;  %798 = vst [vmem:[#allocation2] sm:$0xff] (!%p191_p2), %v5104_v53  ;;  %vm699_vm5 = vcmask (!%p191_p2), 72704  }
   0x7   : > { %v385_v3 = vand.u32 (!%p191_p2), 127, %v379_v0  ;;  %v5149_v4 = vshrl.u32 (!%p191_p2), %v379_v0, 7  ;;  %4230 = vmatpush3.bf16.msra.mxu1 (!%p191_p2), %v4942_v1  ;;  %4421 = vmatprep.subr.bf16.mxu0 (!%p191_p2), %v4943_v2  ;;  %v4948_v17 = vld [vmem:[%s6248_s1 + $0x58] sm:$0xff] (!%p191_p2)   ;;  %v4950_v26 = vld [vmem:[%s6248_s1 + $0x60] sm:$0xff] (!%p191_p2)   ;;  %v4952_v32 = vld [vmem:[%s6248_s1 + $0x68] sm:$0xff] (!%p191_p2)   ;;  %799 = vst [vmem:[#allocation2 + $0x8] sm:$0xff] (!%p191_p2), %v5104_v53 }
   0x8   : > { %4422 = vmatpush3.bf16.msra.mxu0 (!%p191_p2), %v4943_v2  ;;  %4231 = vmatprep.subr.bf16.mxu1 (!%p191_p2), %v4944_v5  ;;  %v4949_v21 = vld [vmem:[%s6248_s1 + $0x118] sm:$0xff] (!%p191_p2)   ;;  %v4951_v31 = vld [vmem:[%s6248_s1 + $0x120] sm:$0xff] (!%p191_p2)   ;;  %v4953_v38 = vld [vmem:[%s6248_s1 + $0x128] sm:$0xff] (!%p191_p2)   ;;  %800 = vst [vmem:[#allocation2 + $0x10] sm:$0x3] (!%p191_p2), %v5104_v53  ;;  %vm732_vm6 = vcmask (!%p191_p2), 80896  }
   0x9   : > { %v386_v6 = vcvt.s32.f32 (!%p191_p2), %v385_v3  ;;  %v381_v7 = vadd.s32 (!%p191_p2), 8, %v5149_v4  ;;  %v382_v8 = vcvt.s32.f32 (!%p191_p2), %v5149_v4  ;;  %4423 = vmatprep.subr.bf16.mxu0 (!%p191_p2), %v4945_v9  ;;  %v5171_v20 = vsub.s32 (!%p191_p2), 1, %v5149_v4  ;;  %v4954_v39 = vld [vmem:[%s6248_s1 + $0x70] sm:$0xff] (!%p191_p2)   ;;  %v5239_v46 = vld [vmem:[%s6248_s1 + $0x78] sm:$0xff] (!%p191_p2)   ;;  %802 = vst [vmem:[#allocation2 + $0x198] sm:$0xff] (!%p191_p2), %v5104_v53  ;;  %803 = vst [vmem:[#allocation2 + $0x1a0] sm:$0xff] (!%p191_p2), %v5104_v53 }
   0xa   : > { %v5196_v33 = vsub.s32 (!%p191_p2), 0, %v5149_v4  ;;  %v5200_v34 = vsub.s32 (!%p191_p2), 2, %v5149_v4  ;;  %v5209_v37 = vsub.s32 (!%p191_p2), 3, %v5149_v4  ;;  %v5218_v40 = vsub.s32 (!%p191_p2), 4, %v5149_v4  ;;  %v4955_v45 = vld [vmem:[%s6248_s1 + $0x130] sm:$0xff] (!%p191_p2)   ;;  %v4957_v54 = vld [vmem:[%s6248_s1 + $0x138] sm:$0xff] (!%p191_p2)  }
   0xb   : > { %v394_v11 = vmul.f32 (!%p191_p2), 0.06666667, %v386_v6  ;;  %v388_v12 = vmul.f32 (!%p191_p2), 0.06666667, %v382_v8  ;;  %v383_v14 = vcvt.s32.f32 (!%p191_p2), %v381_v7  ;;  %4232 = vmatpush3.bf16.msra.mxu1 (!%p191_p2), %v4944_v5  ;;  %v5242_v47 = vsub.s32 (!%p191_p2), 5, %v5149_v4  ;;  %v5274_v61 = vld [vmem:[%s6248_s1 + $0x140] sm:$0xff] (!%p191_p2)  }
   0xc   : > { %4233 = vmatprep.subr.bf16.mxu1 (!%p191_p2), %v4946_v10  ;;  %4424 = vmatpush3.bf16.msra.mxu0 (!%p191_p2), %v4945_v9  ;;  %v5251_v52 = vsub.s32 (!%p191_p2), 6, %v5149_v4  ;;  %804 = vst [vmem:[#allocation2 + $0x1a8] sm:$0x3] (!%p191_p2), %v5104_v53  ;;  %806 = vst [vmem:[#allocation2 + $0x18] sm:$0x1] (!%p191_p2), %v5104_v53  ;;  %v5269_v60 = vsub.s32 (!%p191_p2), 7, %v5149_v4 }
   0xd   : > { %v395_v15 = vmul.f32 2.0, %v394_v11  ;;  %v390_v16 = vmul.f32 2.0, %v388_v12  ;;  %4425 = vmatprep.subr.bf16.mxu0 %v4947_v13  ;;  %v389_v22 = vmul.f32 0.06666667, %v383_v14  ;;  %807 = vst [vmem:[#allocation2 + $0x30] sm:$0x1] %v5104_v53 }
   0xe   : > { %808 = vst [vmem:[#allocation2 + $0x48] sm:$0x1] %v5104_v53  ;;  %809 = vst [vmem:[#allocation2 + $0x60] sm:$0x1] %v5104_v53  ;;  %v938_v1 = vld [vmem:[#allocation2 + $0x1] sm:$0xff]  ;;  %s6256_s19 = smov (!%p222_p3, %s3791_s19), 1 }
   0xf   : > { %v3805_v18 = vadd.f32 -1.0, %v395_v15  ;;  %v5168_v19 = vadd.f32 -1.0, %v390_v16  ;;  %4234 = vmatpush3.bf16.msra.mxu1 %v4946_v10  ;;  %v391_v29 = vmul.f32 2.0, %v389_v22  ;;  %810 = vst [vmem:[#allocation2 + $0x78] sm:$0x1] %v5104_v53  ;;  %v939_v2 = vld [vmem:[#allocation2 + $0x9] sm:$0xff] }
  0x10   : > { %4235 = vmatprep.subr.bf16.mxu1 %v4948_v17  ;;  %4426 = vmatpush3.bf16.msra.mxu0 %v4947_v13  ;;  %811 = vst [vmem:[#allocation2 + $0x90] sm:$0x1] %v5104_v53  ;;  %812 = vst [vmem:[#allocation2 + $0xa8] sm:$0x1] %v5104_v53  ;;  %v970_v4 = vpack.c.bf16 %v939_v2, %v938_v1  ;;  %v5288_v6 = vld [vmem:[%s6248_s1] sm:$0xff]   ;;  %s4011_s8 = sshll.u32 %s6256_s19, 8 }
  0x11   : > { %484 = vbcast.lane.b32.xlu0 %v3805_v18, 256  ;;  %v3806_v23 = vadd.f32 -0.5, %v5168_v19  ;;  %v3808_v24 = vadd.f32 -0.5, %v3805_v18  ;;  %v5179_v25 = vrot.slane %v5168_v19, %v5171_v20  ;;  %4427 = vmatprep.subr.bf16.mxu0 %v4949_v21  ;;  %v5204_v35 = vrot.slane %v5168_v19, %v5196_v33  ;;  %813 = vst [vmem:[#allocation2 + $0xc0] sm:$0x1] %v5104_v53  ;;  %s5330_s11 = scalar_lea.vmem %s6247_s0, %s4011_s8  ;;  %s6169_s10 = scalar_lea.vmem %s6251_s4, %s4011_s8 }
  0x12   : > { %v5206_v36 = vadd.f32 -1.0, %v391_v29  ;;  %v5222_v41 = vrot.slane %v5168_v19, %v5200_v34  ;;  %v5226_v42 = vrot.slane %v5168_v19, %v5209_v37  ;;  %v5230_v43 = vrot.slane %v5168_v19, %v5218_v40  ;;  %814 = vst [vmem:[#allocation2 + $0xd8] sm:$0x1] %v5104_v53  ;;  %815 = vst [vmem:[#allocation2 + $0xf0] sm:$0x1] %v5104_v53  ;;  %v245_v1 = vld [vmem:[%s5330_s11 + $0x40] sm:$0xff] }
  0x13   : > { %v399_v27 = vmul.f32 %v3806_v23, %v3806_v23  ;;  %v5184_v28 = vmul.f32 %v3808_v24, %v3808_v24  ;;  %4236 = vmatpush3.bf16.msra.mxu1 %v4948_v17  ;;  %v5246_v48 = vrot.slane %v5168_v19, %v5242_v47  ;;  %816 = vst [vmem:[#allocation2 + $0x108] sm:$0x1] %v5104_v53  ;;  %817 = vst [vmem:[#allocation2 + $0x120] sm:$0x1] %v5104_v53  ;;  %v268_v23 = vld [vmem:[%s5330_s11 + $0xf8] sm:$0xff]  ;;  %vm765_vm7 = vcmask 89088  }
  0x14   : > { %4237 = vmatprep.subr.bf16.mxu1 %v4950_v26  ;;  %4428 = vmatpush3.bf16.msra.mxu0 %v4949_v21  ;;  %v3807_v44 = vadd.f32 -0.5, %v5206_v36  ;;  %818 = vst [vmem:[#allocation2 + $0x138] sm:$0x1] %v5104_v53  ;;  %819 = vst [vmem:[#allocation2 + $0x150] sm:$0x1] %v5104_v53  ;;  %v5261_v56 = vrot.slane %v5168_v19, %v5251_v52  ;;  %v5282_v3 = vrot.slane %v5168_v19, %v5269_v60  ;;  %s3800_s8 = sshll.u32 %s6256_s19, 1 }
  0x15   : > { %v5187_v30 = vadd.f32 %v5184_v28, %v399_v27  ;;  %488 = vbcast.lane.b32.xlu0 %v3805_v18, 264  ;;  %4429 = vmatprep.subr.bf16.mxu0 %v4951_v31  ;;  %820 = vst [vmem:[#allocation2 + $0x168] sm:$0x1] %v5104_v53  ;;  %821 = vst [vmem:[#allocation2 + $0x180] sm:$0x1] %v5104_v53  ;;  %v5292_v7 = vrot.slane %v5206_v36, %v5196_v33  ;;  %vm3702_vm9 = vcmask 1040384   ;;  %s235_s14 = scalar_lea.vmem %s6252_s5, %s3800_s8 }
  0x16   : > { %v400_v50 = vmul.f32 %v3807_v44, %v3807_v44  ;;  %824 = vst [vmem:[#allocation2 + $0x29] sm:$0x1] %v5104_v53  ;;  %825 = vst [vmem:[#allocation2 + $0x41] sm:$0x1] %v5104_v53  ;;  %4245 = vmatprep.mubr.bf16.mxu1 %v970_v4  ;;  %v5296_v8 = vrot.slane %v5206_v36, %v5171_v20  ;;  %v5304_v10 = vrot.slane %v5206_v36, %v5200_v34  ;;  %v5346_v27 = vld [vmem:[%s6250_s3] ss:$0 sm:$0xff] }
  0x17   : > { %5014 = vrsqrt.f32 %v5187_v30  ;;  %4238 = vmatpush3.bf16.msra.mxu1 %v4950_v26  ;;  %vm407_vm0 = vcmp.eq.f32.partialorder %v5187_v30, inf  ;;  %v410_v51 = vand.u32 2147483648, %v5187_v30  ;;  %826 = vst [vmem:[#allocation2 + $0x59] sm:$0x1] %v5104_v53  ;;  %827 = vst [vmem:[#allocation2 + $0x71] sm:$0x1] %v5104_v53  ;;  %v5313_v13 = vrot.slane %v5206_v36, %v5209_v37 }
  0x18   : > { %4239 = vmatprep.subr.bf16.mxu1 %v4952_v32  ;;  %4430 = vmatpush3.bf16.msra.mxu0 %v4951_v31  ;;  %828 = vst [vmem:[#allocation2 + $0x89] sm:$0x1] %v5104_v53  ;;  %829 = vst [vmem:[#allocation2 + $0xa1] sm:$0x1] %v5104_v53  ;;  %vm409_vm1 = vcmp.eq.f32.partialorder %v5187_v30, 0.0  ;;  %v404_v58 = vadd.f32 %v5184_v28, %v400_v50  ;;  %v5317_v15 = vrot.slane %v5206_v36, %v5218_v40 }
  0x19   : > { %4431 = vmatprep.subr.bf16.mxu0 %v4953_v38  ;;  %830 = vst [vmem:[#allocation2 + $0xb9] sm:$0x1] %v5104_v53  ;;  %831 = vst [vmem:[#allocation2 + $0xd1] sm:$0x1] %v5104_v53  ;;  %v5323_v17 = vrot.slane %v5206_v36, %v5242_v47  ;;  %v5335_v22 = vrot.slane %v5206_v36, %v5251_v52  ;;  %v5341_v26 = vld [vmem:[%s6249_s2] ss:$0 sm:$0xff]  ;;  %v5350_v28 = vrot.slane %v5206_v36, %v5269_v60 }
  0x1a   : > { %832 = vst [vmem:[#allocation2 + $0xe9] sm:$0x1] %v5104_v53  ;;  %833 = vst [vmem:[#allocation2 + $0x101] sm:$0x1] %v5104_v53  ;;  %5016 = vrsqrt.f32 %v404_v58  ;;  %vm414_vm2 = vcmp.eq.f32.partialorder %v404_v58, inf  ;;  %v417_v18 = vand.u32 2147483648, %v404_v58  ;;  %v307_v29 = vmul.f32 %v5341_v26, %v268_v23 }
  0x1b   : > { %4240 = vmatpush3.bf16.msra.mxu1 %v4952_v32  ;;  %834 = vst [vmem:[#allocation2 + $0x119] sm:$0x1] %v5104_v53  ;;  %835 = vst [vmem:[#allocation2 + $0x131] sm:$0x1] %v5104_v53  ;;  %vm416_vm3 = vcmp.eq.f32.partialorder %v404_v58, 0.0 }
  0x1c   : > { %4241 = vmatprep.subr.bf16.mxu1 %v4954_v39  ;;  %4432 = vmatpush3.bf16.msra.mxu0 %v4953_v38  ;;  %836 = vst [vmem:[#allocation2 + $0x149] sm:$0x1] %v5104_v53  ;;  %837 = vst [vmem:[#allocation2 + $0x161] sm:$0x1] %v5104_v53  ;;  %v346_v31 = vadd.f32 %v5346_v27, %v307_v29 }
  0x1d   : > { %4433 = vmatprep.subr.bf16.mxu0 %v4955_v45  ;;  %838 = vst [vmem:[#allocation2 + $0x179] sm:$0x1] %v5104_v53  ;;  %839 = vst [vmem:[#allocation2 + $0x191] sm:$0x1] %v5104_v53 }
  0x1e   : > { %823 = vst [vmem:[#allocation2 + $0x11] sm:$0x1] %v5104_v53  ;;  %805 = vst [vmem:[#allocation2] sm:$0x1] %v5104_v53  ;;  %v378_v32 = vmax.f32 %v346_v31, 0.0 }
  0x1f   : > { %4242 = vmatpush3.bf16.msra.mxu1 %v4954_v39  ;;  %822 = vst [vmem:[#allocation2 + $0x198] sm:$0x1] %v5104_v53  ;;  %840 = vst [vmem:[#allocation2 + $0x1a9] sm:$0x1] %v5104_v53  ;;  %v241_v53 = vld [vmem:[%s5330_s11 + $0x20] sm:$0xff] }
  0x20   : > { %4243 = vmatprep.subr.bf16.mxu1 %v5239_v46  ;;  %4434 = vmatpush3.bf16.msra.mxu0 %v4955_v45  ;;  %v698_v39 = vsel %vm666_vm4, %v378_v32, %v5350_v28  ;;  %vm5465_vm8 = vmpackc.low %vm765_vm7, %vm765_vm7 }
  0x21   : > { %v5015_v49 = vpop.eup %5014  ;;  %4435 = vmatprep.subr.bf16.mxu0 %v4957_v54 }
  0x22   : > { %v406_v55 = vmul.f32 %v5015_v49, %v5187_v30 }
  0x23   : > { %4244 = vmatpush3.bf16.msra.mxu1 %v5239_v46  ;;  %v237_v46 = vld [vmem:[%s5330_s11] sm:$0xff] }
  0x24   : > { %v408_v57 = vsel %vm407_vm0, %v5187_v30, %v406_v55  ;;  %4436 = vmatpush3.bf16.msra.mxu0 %v4957_v54  ;;  %4277 = vmatprep.subr.bf16.mxu1 %v5288_v6  ;;  %v5017_v11 = vpop.eup %5016  ;;  %v276_v49 = vmul.f32 %v5341_v26, %v237_v46 }
  0x25   : > { %v411_v59 = vsel %vm409_vm1, %v410_v51, %v408_v57  ;;  %4469 = vmatprep.subr.bf16.mxu0 %v5274_v61  ;;  %v413_v14 = vmul.f32 %v5017_v11, %v404_v58  ;;  %v238_v51 = vld [vmem:[%s5330_s11 + $0x8] sm:$0xff]  ;;  %v284_v11 = vmul.f32 %v5341_v26, %v245_v1 }
  0x26   : > { %v504_v62 = vrot.slane %v411_v59, %v5171_v20  ;;  %v493_v63 = vrot.slane %v411_v59, %v5196_v33  ;;  %v515_v0 = vrot.slane %v411_v59, %v5200_v34  ;;  %v526_v5 = vrot.slane %v411_v59, %v5209_v37 }
  0x27   : > { %v537_v9 = vrot.slane %v411_v59, %v5218_v40  ;;  %v548_v12 = vrot.slane %v411_v59, %v5242_v47  ;;  %v559_v16 = vrot.slane %v411_v59, %v5251_v52  ;;  %v415_v19 = vsel %vm414_vm2, %v404_v58, %v413_v14 }
  0x28   : > { %506 = vbcast.lane.b32.xlu0 %v504_v62, 256  ;;  %495 = vbcast.lane.b32.xlu1 %v493_v63, 256  ;;  %v570_v21 = vrot.slane %v411_v59, %v5269_v60  ;;  %v418_v24 = vsel %vm416_vm3, %v417_v18, %v415_v19  ;;  %v315_v55 = vadd.f32 %v5346_v27, %v276_v49  ;;  %v243_v59 = vld [vmem:[%s5330_s11 + $0x30] sm:$0xff] }
  0x29   : > { %v581_v30 = vrot.slane %v418_v24, %v5196_v33  ;;  %v592_v38 = vrot.slane %v418_v24, %v5171_v20  ;;  %v603_v36 = vrot.slane %v418_v24, %v5200_v34  ;;  %v614_v44 = vrot.slane %v418_v24, %v5209_v37  ;;  %v247_v19 = vld [vmem:[%s5330_s11 + $0x50] sm:$0xff] }
  0x2a   : > { %v625_v33 = vrot.slane %v418_v24, %v5218_v40  ;;  %v636_v20 = vrot.slane %v418_v24, %v5242_v47  ;;  %v647_v45 = vrot.slane %v418_v24, %v5251_v52  ;;  %v658_v34 = vrot.slane %v418_v24, %v5269_v60  ;;  %v239_v40 = vld [vmem:[%s5330_s11 + $0x10] sm:$0xff]  ;;  %v240_v60 = vld [vmem:[%s5330_s11 + $0x18] sm:$0xff] }
  0x2b   : > { %v278_v47 = vmul.f32 %v5341_v26, %v239_v40  ;;  %v277_v57 = vmul.f32 %v5341_v26, %v238_v51  ;;  %v280_v58 = vmul.f32 %v5341_v26, %v241_v53  ;;  %v282_v2 = vmul.f32 %v5341_v26, %v243_v59  ;;  %v244_v24 = vld [vmem:[%s5330_s11 + $0x38] sm:$0xff] }
  0x2c   : > { %517 = vbcast.lane.b32.xlu0 %v515_v0, 256  ;;  %499 = vbcast.lane.b32.xlu1 %v493_v63, 264  ;;  %v347_v63 = vmax.f32 %v315_v55, 0.0  ;;  %v279_v4 = vmul.f32 %v5341_v26, %v240_v60  ;;  %v286_v32 = vmul.f32 %v5341_v26, %v247_v19 }
  0x2d   : > { %v317_v54 = vadd.f32 %v5346_v27, %v278_v47 }
  0x2e   : > { %v667_v14 = vsel %vm666_vm4, %v347_v63, %v5204_v35  ;;  %v318_v23 = vadd.f32 %v5346_v27, %v279_v4  ;;  %v325_v55 = vadd.f32 %v5346_v27, %v286_v32 }
  0x30   : > { %528 = vbcast.lane.b32.xlu0 %v526_v5, 256  ;;  %510 = vbcast.lane.b32.xlu1 %v504_v62, 264  ;;  %v349_v62 = vmax.f32 %v317_v54, 0.0  ;;  %v350_v40 = vmax.f32 %v318_v23, 0.0  ;;  %v357_v19 = vmax.f32 %v325_v55, 0.0  ;;  %v4960_v55 = vld [vmem:[%s6248_s1 + $0x148] sm:$0xff]  }
  0x34   : > { %539 = vbcast.lane.b32.xlu0 %v537_v9, 256  ;;  %521 = vbcast.lane.b32.xlu1 %v515_v0, 264  ;;  %v316_v0 = vadd.f32 %v5346_v27, %v277_v57  ;;  %v246_v57 = vld [vmem:[%s5330_s11 + $0x48] sm:$0xff] }
  0x38   : > { %550 = vbcast.lane.b32.xlu0 %v548_v12, 256  ;;  %532 = vbcast.lane.b32.xlu1 %v526_v5, 264  ;;  %v242_v5 = vld [vmem:[%s5330_s11 + $0x28] sm:$0xff] }
  0x39   : > { %v281_v18 = vmul.f32 %v5341_v26, %v242_v5 }
  0x3c   : > { %561 = vbcast.lane.b32.xlu0 %v559_v16, 256  ;;  %543 = vbcast.lane.b32.xlu1 %v537_v9, 264  ;;  %v319_v9 = vadd.f32 %v5346_v27, %v280_v58 }
  0x3e   : > { %v351_v29 = vmax.f32 %v319_v9, 0.0 }
  0x40   : > { %572 = vbcast.lane.b32.xlu0 %v570_v21, 256  ;;  %554 = vbcast.lane.b32.xlu1 %v548_v12, 264  ;;  %v669_v12 = vsel %vm666_vm4, %v349_v62, %v5179_v25  ;;  %v671_v49 = vsel %vm666_vm4, %v351_v29, %v5222_v41  ;;  %v4961_v29 = vld [vmem:[%s6248_s1 + $0x8] sm:$0xff]  }
  0x44   : > { %565 = vbcast.lane.b32.xlu1 %v559_v16, 264  ;;  %583 = vbcast.lane.b32.xlu0 %v581_v30, 256  ;;  %v348_v16 = vmax.f32 %v316_v0, 0.0 }
  0x48   : > { %576 = vbcast.lane.b32.xlu1 %v570_v21, 264  ;;  %594 = vbcast.lane.b32.xlu0 %v592_v38, 256  ;;  %v321_v21 = vadd.f32 %v5346_v27, %v282_v2  ;;  %v670_v2 = vsel %vm666_vm4, %v350_v40, %v5179_v25 }
  0x4c   : > { %587 = vbcast.lane.b32.xlu1 %v581_v30, 264  ;;  %605 = vbcast.lane.b32.xlu0 %v603_v36, 256 }
  0x50   : > { %598 = vbcast.lane.b32.xlu1 %v592_v38, 264  ;;  %616 = vbcast.lane.b32.xlu0 %v614_v44, 256  ;;  %v249_v38 = vld [vmem:[%s5330_s11 + $0x60] sm:$0xff] }
  0x54   : > { %609 = vbcast.lane.b32.xlu1 %v603_v36, 264  ;;  %627 = vbcast.lane.b32.xlu0 %v625_v33, 256  ;;  %v323_v36 = vadd.f32 %v5346_v27, %v284_v11  ;;  %v285_v11 = vmul.f32 %v5341_v26, %v246_v57 }
  0x56   : > { %v355_v58 = vmax.f32 %v323_v36, 0.0 }
  0x58   : > { %620 = vbcast.lane.b32.xlu1 %v614_v44, 264  ;;  %638 = vbcast.lane.b32.xlu0 %v636_v20, 256  ;;  %v320_v44 = vadd.f32 %v5346_v27, %v281_v18  ;;  %v675_v25 = vsel %vm666_vm4, %v355_v58, %v5230_v43 }
  0x5a   : > { %v352_v59 = vmax.f32 %v320_v44, 0.0  ;;  %v253_v44 = vld [vmem:[%s5330_s11 + $0x80] sm:$0xff] }
  0x5b   : > { %v292_v57 = vmul.f32 %v5341_v26, %v253_v44 }
  0x5c   : > { %631 = vbcast.lane.b32.xlu1 %v625_v33, 264  ;;  %649 = vbcast.lane.b32.xlu0 %v647_v45, 256  ;;  %v283_v33 = vmul.f32 %v5341_v26, %v244_v24  ;;  %v250_v24 = vld [vmem:[%s5330_s11 + $0x68] sm:$0xff] }
  0x5e   : > { %v322_v60 = vadd.f32 %v5346_v27, %v283_v33 }
  0x60   : > { %642 = vbcast.lane.b32.xlu1 %v636_v20, 264  ;;  %660 = vbcast.lane.b32.xlu0 %v658_v34, 256  ;;  %v354_v23 = vmax.f32 %v322_v60, 0.0 }
  0x64   : > { %653 = vbcast.lane.b32.xlu1 %v647_v45, 264 }
  0x68   : > { %664 = vbcast.lane.b32.xlu1 %v658_v34, 264  ;;  %v353_v34 = vmax.f32 %v321_v21, 0.0  ;;  %v672_v21 = vsel %vm666_vm4, %v352_v59, %v5222_v41  ;;  %v252_v41 = vld [vmem:[%s5330_s11 + $0x78] sm:$0xff]  ;;  %v255_v59 = vld [vmem:[%s5330_s11 + $0x90] sm:$0xff] }
  0x69   : > { %v291_v58 = vmul.f32 %v5341_v26, %v252_v41 }
  0x6a   : > { %v673_v1 = vsel %vm666_vm4, %v353_v34, %v5226_v42 }
  0x83   : > { %v5364_v37 = vpop.permute.xlu0 %484 }
  0x84   : > { %v702_v30 = vsel %vm699_vm5, %v669_v12, %v5364_v37  ;;  %v700_v31 = vsel %vm699_vm5, %v667_v14, %v5364_v37  ;;  %v704_v63 = vsel %vm699_vm5, %v671_v49, %v5364_v37  ;;  %v251_v12 = vld [vmem:[%s5330_s11 + $0x70] sm:$0xff]  ;;  %v248_v14 = vld [vmem:[%s5330_s11 + $0x58] sm:$0xff]  ;;  %v324_v49 = vadd.f32 %v5346_v27, %v285_v11 }
  0x85   : > { %v287_v36 = vmul.f32 %v5341_v26, %v248_v14 }
  0x86   : > { %v356_v11 = vmax.f32 %v324_v49, 0.0 }
  0x87   : > { %v5370_v50 = vpop.permute.xlu0 %488 }
  0x88   : > { %v5375_v52 = vsel %vm699_vm5, %v698_v39, %v5370_v50  ;;  %v668_v39 = vsel %vm666_vm4, %v348_v16, %v5204_v35  ;;  %v288_v35 = vmul.f32 %v5341_v26, %v249_v38  ;;  %v703_v38 = vsel %vm699_vm5, %v670_v2, %v5370_v50 }
  0x89   : > { %v701_v54 = vsel %vm699_vm5, %v668_v39, %v5370_v50  ;;  %v290_v39 = vmul.f32 %v5341_v26, %v251_v12  ;;  %v676_v44 = vsel %vm666_vm4, %v356_v11, %v5230_v43  ;;  %v4965_v11 = vld [vmem:[%s6248_s1 + $0x160] sm:$0xff]  }
  0x8a   : > { %v327_v9 = vadd.f32 %v5346_v27, %v288_v35 }
  0x8c   : > { %v359_v40 = vmax.f32 %v327_v9, 0.0 }
  0x8e   : > { %v679_v9 = vsel %vm666_vm4, %v359_v40, %v5261_v56 }
  0x9a   : > { %v507_v20 = vpop.permute.xlu0 %506  ;;  %v496_v45 = vpop.permute.xlu1 %495 }
  0x9b   : > { %v5412_v46 = vsel %vm732_vm6, %v702_v30, %v507_v20  ;;  %v733_v47 = vsel %vm732_vm6, %v700_v31, %v496_v45  ;;  %v706_v31 = vsel %vm699_vm5, %v673_v1, %v5364_v37  ;;  %v326_v1 = vadd.f32 %v5346_v27, %v287_v36 }
  0x9c   : > { %v768_v51 = vsel %vm765_vm7, %v5412_v46, 0.0  ;;  %v766_v53 = vsel %vm765_vm7, %v733_v47, 0.0 }
  0x9d   : > { %844 = vst [vmem:[#allocation2 + $0x31] sm:$0xff] %v768_v51  ;;  %842 = vst [vmem:[#allocation2 + $0x19] sm:$0xff] %v766_v53  ;;  %v677_v53 = vsel %vm666_vm4, %v357_v19, %v5246_v48  ;;  %v294_v19 = vmul.f32 %v5341_v26, %v255_v59 }
  0x9e   : > { %v518_v62 = vpop.permute.xlu0 %517  ;;  %v500_v0 = vpop.permute.xlu1 %499 }
  0x9f   : > { %v5433_v4 = vsel %vm732_vm6, %v704_v63, %v518_v62  ;;  %v734_v5 = vsel %vm732_vm6, %v701_v54, %v500_v0  ;;  %v674_v54 = vsel %vm666_vm4, %v354_v23, %v5226_v42  ;;  %v708_v62 = vsel %vm699_vm5, %v675_v25, %v5364_v37  ;;  %v4962_v25 = vld [vmem:[%s6248_s1 + $0x150] sm:$0xff]   ;;  %v254_v23 = vld [vmem:[%s5330_s11 + $0x88] sm:$0xff] }
  0xa0   : > { %v770_v16 = vsel %vm765_vm7, %v5433_v4, 0.0  ;;  %v767_v18 = vsel %vm765_vm7, %v734_v5, 0.0  ;;  %v5028_v34 = vpack.c.bf16 %v734_v5, %v733_v47  ;;  %v289_v47 = vmul.f32 %v5341_v26, %v250_v24 }
  0xa1   : > { %846 = vst [vmem:[#allocation2 + $0x49] sm:$0xff] %v770_v16  ;;  %843 = vst [vmem:[#allocation2 + $0x21] sm:$0xff] %v767_v18  ;;  %v705_v42 = vsel %vm699_vm5, %v672_v21, %v5370_v50  ;;  %v329_v0 = vadd.f32 %v5346_v27, %v290_v39  ;;  %v5522_v21 = vadd.f32 %v5346_v27, %v291_v58 }
  0xa2   : > { %v529_v30 = vpop.permute.xlu0 %528  ;;  %v511_v32 = vpop.permute.xlu1 %510  ;;  %5029 = vmatmul.mubr.msk.bf16.vlgmr.msra.gmra.mrb[0].mxu1 %vm5465_vm8, %v5028_v34  ;;  %5032 = vmatprep.mubr.msk.bf16.mxu0 %vm5465_vm8, %v5028_v34  ;;  %v328_v18 = vadd.f32 %v5346_v27, %v289_v47  ;;  %v293_v49 = vmul.f32 %v5341_v26, %v254_v23  ;;  %v4970_v47 = vld [vmem:[%s6248_s1 + $0x20] sm:$0xff]   ;;  %v709_v58 = vsel %vm699_vm5, %v676_v44, %v5370_v50 }
  0xa3   : > { %v5460_v33 = vsel %vm732_vm6, %v706_v31, %v529_v30  ;;  %v736_v20 = vsel %vm732_vm6, %v703_v38, %v511_v32  ;;  %4278 = vmatpush3.bf16.msra.mxu1 %v5288_v6  ;;  %v4964_v6 = vld [vmem:[%s6248_s1 + $0x10] sm:$0xff]   ;;  %v707_v31 = vsel %vm699_vm5, %v674_v54, %v5370_v50  ;;  %v361_v32 = vmax.f32 %v329_v0, 0.0 }
  0xa4   : > { %v772_v35 = vsel %vm765_vm7, %v5460_v33, 0.0  ;;  %v769_v51 = vsel %vm765_vm7, %v736_v20, 0.0  ;;  %4279 = vmatprep.subr.bf16.mxu1 %v4961_v29  ;;  %v5034_v12 = vpack.c.bf16 %v736_v20, %v5412_v46  ;;  %v5516_v46 = vadd.f32 %v5346_v27, %v292_v57 }
  0xa5   : > { %848 = vst [vmem:[#allocation2 + $0x61] sm:$0xff] %v772_v35  ;;  %845 = vst [vmem:[#allocation2 + $0x39] sm:$0xff] %v769_v51  ;;  %v358_v38 = vmax.f32 %v326_v1, 0.0  ;;  %v360_v40 = vmax.f32 %v328_v18, 0.0  ;;  %v257_v35 = vld [vmem:[%s5330_s11 + $0xa0] sm:$0xff]  ;;  %v5551_v51 = vadd.f32 %v5346_v27, %v294_v19  ;;  %v681_v59 = vsel %vm666_vm4, %v361_v32, %v5282_v3 }
  0xa6   : > { %v540_v60 = vpop.permute.xlu0 %539  ;;  %v522_v63 = vpop.permute.xlu1 %521  ;;  %5035 = vmatprep.mubr.msk.bf16.mxu1 %vm5465_vm8, %v5034_v12  ;;  %5038 = vmatmul.mubr.msk.bf16.vlgmr.msra.gmra.mrb[0].mxu0 %vm5465_vm8, %v5034_v12  ;;  %v363_v43 = vmax.f32 %v5516_v46, 0.0  ;;  %v296_v1 = vmul.f32 %v5341_v26, %v257_v35  ;;  %v714_v19 = vsel %vm699_vm5, %v681_v59, %v5364_v37  ;;  %v261_v32 = vld [vmem:[%s5330_s11 + $0xc0] sm:$0xff] }
  0xa7   : > { %v5499_v2 = vsel %vm732_vm6, %v708_v62, %v540_v60  ;;  %v738_v5 = vsel %vm732_vm6, %v705_v42, %v522_v63  ;;  %4470 = vmatpush3.bf16.msra.mxu0 %v5274_v61  ;;  %4280 = vmatpush3.bf16.msra.mxu1 %v4961_v29  ;;  %v4967_v61 = vld [vmem:[%s6248_s1 + $0x18] sm:$0xff]   ;;  %v710_v29 = vsel %vm699_vm5, %v677_v53, %v5364_v37  ;;  %v259_v62 = vld [vmem:[%s5330_s11 + $0xb0] sm:$0xff] }
  0xa8   : > { %v774_v14 = vsel %vm765_vm7, %v5499_v2, 0.0  ;;  %v771_v16 = vsel %vm765_vm7, %v738_v5, 0.0  ;;  %4471 = vmatprep.subr.bf16.mxu0 %v4960_v55  ;;  %4281 = vmatprep.subr.bf16.mxu1 %v4964_v6  ;;  %v5040_v41 = vpack.c.bf16 %v738_v5, %v5433_v4  ;;  %v362_v4 = vmax.f32 %v5522_v21, 0.0  ;;  %v4963_v53 = vld [vmem:[%s6248_s1 + $0x158] sm:$0xff]  }
  0xa9   : > { %850 = vst [vmem:[#allocation2 + $0x79] sm:$0xff] %v774_v14  ;;  %847 = vst [vmem:[#allocation2 + $0x51] sm:$0xff] %v771_v16  ;;  %v256_v60 = vld [vmem:[%s5330_s11 + $0x98] sm:$0xff]  ;;  %v298_v14 = vmul.f32 %v5341_v26, %v259_v62  ;;  %v258_v16 = vld [vmem:[%s5330_s11 + $0xa8] sm:$0xff]  ;;  %v683_v21 = vsel %vm666_vm4, %v363_v43, %v5292_v7 }
  0xaa   : > { %v551_v24 = vpop.permute.xlu0 %550  ;;  %v533_v30 = vpop.permute.xlu1 %532  ;;  %5041 = vmatmul.mubr.msk.bf16.gmra.mrb[4].mxu1 %vm5465_vm8, %v5040_v41  ;;  %5044 = vmatprep.mubr.msk.bf16.mxu0 %vm5465_vm8, %v5040_v41  ;;  %v295_v12 = vmul.f32 %v5341_v26, %v256_v60  ;;  %v682_v23 = vsel %vm666_vm4, %v362_v4, %v5282_v3  ;;  %v260_v3 = vld [vmem:[%s5330_s11 + $0xb8] sm:$0xff] }
  0xab   : > { %v5533_v39 = vsel %vm732_vm6, %v710_v29, %v551_v24  ;;  %v740_v36 = vsel %vm732_vm6, %v707_v31, %v533_v30  ;;  %4472 = vmatpush3.bf16.msra.mxu0 %v4960_v55  ;;  %4282 = vmatpush3.bf16.msra.mxu1 %v4964_v6  ;;  %v712_v55 = vsel %vm699_vm5, %v679_v9, %v5364_v37  ;;  %v365_v29 = vmax.f32 %v5551_v51, 0.0 }
  0xac   : > { %v776_v20 = vsel %vm765_vm7, %v5533_v39, 0.0  ;;  %v773_v34 = vsel %vm765_vm7, %v740_v36, 0.0  ;;  %4473 = vmatprep.subr.bf16.mxu0 %v4962_v25  ;;  %4283 = vmatprep.subr.bf16.mxu1 %v4967_v61  ;;  %v678_v6 = vsel %vm666_vm4, %v358_v38, %v5246_v48  ;;  %v5046_v0 = vpack.c.bf16 %v740_v36, %v5460_v33  ;;  %v879_v45 = vld [vmem:[#allocation2 + $0x38] sm:$0xff] }
  0xad   : > { %852 = vst [vmem:[#allocation2 + $0x91] sm:$0xff] %v776_v20  ;;  %849 = vst [vmem:[#allocation2 + $0x69] sm:$0xff] %v773_v34  ;;  %v680_v9 = vsel %vm666_vm4, %v360_v40, %v5261_v56  ;;  %v332_v33 = vadd.f32 %v5346_v27, %v293_v49  ;;  %v4972_v56 = vld [vmem:[%s6248_s1 + $0x28] sm:$0xff]   ;;  %v335_v31 = vadd.f32 %v5346_v27, %v296_v1  ;;  %v263_v40 = vld [vmem:[%s5330_s11 + $0xd0] sm:$0xff] }
  0xae   : > { %v562_v54 = vpop.permute.xlu0 %561  ;;  %v544_v57 = vpop.permute.xlu1 %543  ;;  %5047 = vmatprep.mubr.msk.bf16.mxu1 %vm5465_vm8, %v5046_v0  ;;  %5050 = vmatmul.mubr.msk.bf16.gmra.mrb[4].mxu0 %vm5465_vm8, %v5046_v0  ;;  %v334_v41 = vadd.f32 %v5346_v27, %v295_v12  ;;  %v337_v20 = vadd.f32 %v5346_v27, %v298_v14  ;;  %v4966_v34 = vld [vmem:[%s6248_s1 + $0x168] sm:$0xff]   ;;  %v4974_v49 = vld [vmem:[%s6248_s1 + $0x30] sm:$0xff]   ;;  %v713_v43 = vsel %vm699_vm5, %v680_v9, %v5370_v50 }
  0xaf   : > { %v5570_v63 = vsel %vm732_vm6, %v712_v55, %v562_v54  ;;  %v742_v42 = vsel %vm732_vm6, %v709_v58, %v544_v57  ;;  %4474 = vmatpush3.bf16.msra.mxu0 %v4962_v25  ;;  %4284 = vmatpush3.bf16.msra.mxu1 %v4967_v61  ;;  %v711_v25 = vsel %vm699_vm5, %v678_v6, %v5370_v50  ;;  %v364_v44 = vmax.f32 %v332_v33, 0.0 }
  0xb0   : > { %v778_v48 = vsel %vm765_vm7, %v5570_v63, 0.0  ;;  %v775_v5 = vsel %vm765_vm7, %v742_v42, 0.0  ;;  %4475 = vmatprep.subr.bf16.mxu0 %v4963_v53  ;;  %4285 = vmatprep.subr.bf16.mxu1 %v4970_v47  ;;  %v5052_v30 = vpack.c.bf16 %v742_v42, %v5499_v2  ;;  %v297_v2 = vmul.f32 %v5341_v26, %v258_v16 }
  0xb1   : > { %854 = vst [vmem:[#allocation2 + $0xa9] sm:$0xff] %v778_v48  ;;  %851 = vst [vmem:[#allocation2 + $0x81] sm:$0xff] %v775_v5  ;;  %v716_v51 = vsel %vm699_vm5, %v683_v21, %v5364_v37  ;;  %v685_v57 = vsel %vm666_vm4, %v365_v29, %v5296_v8  ;;  %v367_v58 = vmax.f32 %v335_v31, 0.0  ;;  %v684_v62 = vsel %vm666_vm4, %v364_v44, %v5292_v7  ;;  %v4968_v48 = vld [vmem:[%s6248_s1 + $0x170] sm:$0xff]   ;;  %v262_v5 = vld [vmem:[%s5330_s11 + $0xc8] sm:$0xff] }
  0xb2   : > { %v573_v18 = vpop.permute.xlu0 %572  ;;  %v555_v46 = vpop.permute.xlu1 %554  ;;  %5053 = vmatmul.mubr.msk.bf16.gmra.mrb[8].mxu1 %vm5465_vm8, %v5052_v30  ;;  %5056 = vmatprep.mubr.msk.bf16.mxu0 %vm5465_vm8, %v5052_v30  ;;  %v302_v42 = vmul.f32 %v5341_v26, %v263_v40  ;;  %v369_v0 = vmax.f32 %v337_v20, 0.0  ;;  %v5652_v1 = vadd.f32 %v5346_v27, %v297_v2  ;;  %v4976_v7 = vld [vmem:[%s6248_s1 + $0x38] sm:$0xff]   ;;  %v715_v33 = vsel %vm699_vm5, %v682_v23, %v5370_v50  ;;  %v2340_v21 = vld [vmem:[#allocation2 + $0x22] sm:$0xff] }
  0xb3   : > { %v5603_v61 = vsel %vm732_vm6, %v714_v19, %v573_v18  ;;  %v744_v24 = vsel %vm732_vm6, %v711_v25, %v555_v46  ;;  %4476 = vmatpush3.bf16.msra.mxu0 %v4963_v53  ;;  %4286 = vmatpush3.bf16.msra.mxu1 %v4970_v47  ;;  %v300_v53 = vmul.f32 %v5341_v26, %v261_v32  ;;  %v2339_v25 = vld [vmem:[#allocation2 + $0x1a] sm:$0xff] }
  0xb4   : > { %v780_v38 = vsel %vm765_vm7, %v5603_v61, 0.0  ;;  %v777_v36 = vsel %vm765_vm7, %v744_v24, 0.0  ;;  %4477 = vmatprep.subr.bf16.mxu0 %v4965_v11  ;;  %4287 = vmatprep.subr.bf16.mxu1 %v4972_v56  ;;  %v299_v47 = vmul.f32 %v5341_v26, %v260_v3  ;;  %v5058_v59 = vpack.c.bf16 %v744_v24, %v5533_v39  ;;  %v5706_v40 = vld [vmem:[%s6248_s1 + $0x80] sm:$0xff]  }
  0xb5   : > { %856 = vst [vmem:[#allocation2 + $0xc1] sm:$0xff] %v780_v38  ;;  %853 = vst [vmem:[#allocation2 + $0x99] sm:$0xff] %v777_v36  ;;  %v366_v39 = vmax.f32 %v334_v41, 0.0  ;;  %v718_v12 = vsel %vm699_vm5, %v685_v57, %v5364_v37  ;;  %v339_v14 = vadd.f32 %v5346_v27, %v300_v53  ;;  %v687_v19 = vsel %vm666_vm4, %v367_v58, %v5304_v10  ;;  %v4969_v38 = vld [vmem:[%s6248_s1 + $0x178] sm:$0xff]   ;;  %v4971_v58 = vld [vmem:[%s6248_s1 + $0x180] sm:$0xff]  }
  0xb6   : > { %v566_v35 = vpop.permute.xlu1 %565  ;;  %v584_v4 = vpop.permute.xlu0 %583  ;;  %5059 = vmatprep.mubr.msk.bf16.mxu1 %vm5465_vm8, %v5058_v59  ;;  %5062 = vmatmul.mubr.msk.bf16.gmra.mrb[8].mxu0 %vm5465_vm8, %v5058_v59  ;;  %v5667_v16 = vadd.f32 %v5346_v27, %v299_v47  ;;  %v5684_v29 = vadd.f32 %v5346_v27, %v302_v42  ;;  %v301_v30 = vmul.f32 %v5341_v26, %v262_v5  ;;  %v368_v3 = vmax.f32 %v5652_v1, 0.0  ;;  %v2341_v1 = vld [vmem:[#allocation2 + $0x32] sm:$0xff] }
  0xb7   : > { %v746_v54 = vsel %vm732_vm6, %v713_v43, %v566_v35  ;;  %v5636_v55 = vsel %vm732_vm6, %v716_v51, %v584_v4  ;;  %4478 = vmatpush3.bf16.msra.mxu0 %v4965_v11  ;;  %4288 = vmatpush3.bf16.msra.mxu1 %v4972_v56  ;;  %v686_v31 = vsel %vm666_vm4, %v366_v39, %v5296_v8  ;;  %v371_v8 = vmax.f32 %v339_v14, 0.0  ;;  %v266_v14 = vld [vmem:[%s5330_s11 + $0xe8] sm:$0xff] }
  0xb8   : > { %v779_v6 = vsel %vm765_vm7, %v746_v54, 0.0  ;;  %v782_v60 = vsel %vm765_vm7, %v5636_v55, 0.0  ;;  %4479 = vmatprep.subr.bf16.mxu0 %v4966_v34  ;;  %4289 = vmatprep.subr.bf16.mxu1 %v4974_v49  ;;  %v5064_v46 = vpack.c.bf16 %v746_v54, %v5570_v63  ;;  %v265_v63 = vld [vmem:[%s5330_s11 + $0xe0] sm:$0xff]  ;;  %v689_v32 = vsel %vm666_vm4, %v369_v0, %v5313_v13  ;;  %v267_v54 = vld [vmem:[%s5330_s11 + $0xf0] sm:$0xff] }
  0xb9   : > { %855 = vst [vmem:[#allocation2 + $0xb1] sm:$0xff] %v779_v6  ;;  %858 = vst [vmem:[#allocation2 + $0xd9] sm:$0xff] %v782_v60  ;;  %v717_v44 = vsel %vm699_vm5, %v684_v62, %v5370_v50  ;;  %v720_v41 = vsel %vm699_vm5, %v687_v19, %v5364_v37  ;;  %v5700_v20 = vpack.c.bf16 %v2340_v21, %v2339_v25  ;;  %v370_v47 = vmax.f32 %v5667_v16, 0.0 }
  0xba   : > { %v577_v9 = vpop.permute.xlu1 %576  ;;  %v595_v11 = vpop.permute.xlu0 %594  ;;  %5065 = vmatmul.mubr.msk.bf16.gmra.mrb[12].mxu1 %vm5465_vm8, %v5064_v46  ;;  %5068 = vmatprep.mubr.msk.bf16.mxu0 %vm5465_vm8, %v5064_v46  ;;  %v304_v4 = vmul.f32 %v5341_v26, %v265_v63  ;;  %v340_v57 = vadd.f32 %v5346_v27, %v301_v30  ;;  %v719_v60 = vsel %vm699_vm5, %v686_v31, %v5370_v50 }
  0xbb   : > { %v748_v56 = vsel %vm732_vm6, %v715_v33, %v577_v9  ;;  %v5671_v18 = vsel %vm732_vm6, %v718_v12, %v595_v11  ;;  %4480 = vmatpush3.bf16.msra.mxu0 %v4966_v34  ;;  %4290 = vmatpush3.bf16.msra.mxu1 %v4974_v49  ;;  %v264_v34 = vld [vmem:[%s5330_s11 + $0xd8] sm:$0xff]  ;;  %v722_v42 = vsel %vm699_vm5, %v689_v32, %v5364_v37 }
  0xbc   : > { %v781_v23 = vsel %vm765_vm7, %v748_v56, 0.0  ;;  %v784_v24 = vsel %vm765_vm7, %v5671_v18, 0.0  ;;  %4481 = vmatprep.subr.bf16.mxu0 %v4968_v48  ;;  %4291 = vmatprep.subr.bf16.mxu1 %v4976_v7  ;;  %v5070_v43 = vpack.c.bf16 %v748_v56, %v5603_v61  ;;  %v373_v61 = vmax.f32 %v5684_v29, 0.0  ;;  %v2344_v11 = vld [vmem:[#allocation2 + $0x52] sm:$0xff] }
  0xbd   : > { %857 = vst [vmem:[#allocation2 + $0xc9] sm:$0xff] %v781_v23  ;;  %860 = vst [vmem:[#allocation2 + $0xf1] sm:$0xff] %v784_v24  ;;  %v303_v59 = vmul.f32 %v5341_v26, %v264_v34  ;;  %v688_v39 = vsel %vm666_vm4, %v368_v3, %v5304_v10  ;;  %v691_v0 = vsel %vm666_vm4, %v371_v8, %v5317_v15  ;;  %v2343_v10 = vld [vmem:[#allocation2 + $0x4a] sm:$0xff]  ;;  %v372_v46 = vmax.f32 %v340_v57, 0.0 }
  0xbe   : > { %v588_v36 = vpop.permute.xlu1 %587  ;;  %v606_v2 = vpop.permute.xlu0 %605  ;;  %5071 = vmatprep.mubr.msk.bf16.mxu1 %vm5465_vm8, %v5070_v43  ;;  %5074 = vmatmul.mubr.msk.bf16.gmra.mrb[12].mxu0 %vm5465_vm8, %v5070_v43  ;;  %v343_v33 = vadd.f32 %v5346_v27, %v304_v4  ;;  %v306_v12 = vmul.f32 %v5341_v26, %v267_v54  ;;  %v690_v19 = vsel %vm666_vm4, %v370_v47, %v5313_v13  ;;  %v4973_v23 = vld [vmem:[%s6248_s1 + $0x188] sm:$0xff]  }
  0xbf   : > { %v750_v49 = vsel %vm732_vm6, %v717_v44, %v588_v36  ;;  %v5710_v35 = vsel %vm732_vm6, %v720_v41, %v606_v2  ;;  %4482 = vmatpush3.bf16.msra.mxu0 %v4968_v48  ;;  %4485 = vmatprep.mubr.bf16.mxu0 %v5700_v20  ;;  %v2342_v48 = vld [vmem:[#allocation2 + $0x3a] sm:$0xff]  ;;  %v342_v21 = vadd.f32 %v5346_v27, %v303_v59  ;;  %v4975_v41 = vld [vmem:[%s6248_s1 + $0x190] sm:$0xff]  }
  0xc0   : > { %v783_v51 = vsel %vm765_vm7, %v750_v49, 0.0  ;;  %v786_v53 = vsel %vm765_vm7, %v5710_v35, 0.0  ;;  %4483 = vmatprep.subr.bf16.mxu0 %v4969_v38  ;;  %4292 = vmatpush3.bf16.msra.mxu1 %v4976_v7  ;;  %v5076_v9 = vpack.c.bf16 %v750_v49, %v5636_v55  ;;  %v693_v55 = vsel %vm666_vm4, %v373_v61, %v5323_v17  ;;  %v2346_v47 = vld [vmem:[#allocation2 + $0x6a] sm:$0xff]  ;;  %v2347_v59 = vld [vmem:[#allocation2 + $0x7a] sm:$0xff] }
  0xc1   : > { %859 = vst [vmem:[#allocation2 + $0xe1] sm:$0xff] %v783_v51  ;;  %862 = vst [vmem:[#allocation2 + $0x109] sm:$0xff] %v786_v53  ;;  %4325 = vmatprep.subr.bf16.mxu1 %v5706_v40  ;;  %v5756_v25 = vpack.c.bf16 %v2342_v48, %v2341_v1  ;;  %v721_v13 = vsel %vm699_vm5, %v688_v39, %v5370_v50  ;;  %v724_v30 = vsel %vm699_vm5, %v691_v0, %v5364_v37  ;;  %v2345_v53 = vld [vmem:[#allocation2 + $0x62] sm:$0xff] }
  0xc2   : > { %v599_v6 = vpop.permute.xlu1 %598  ;;  %v617_v62 = vpop.permute.xlu0 %616  ;;  %5077 = vmatmul.mubr.msk.bf16.gmra.mrb[16].mxu1 %vm5465_vm8, %v5076_v9  ;;  %v5766_v63 = vpack.c.bf16 %v2344_v11, %v2343_v10  ;;  %v305_v31 = vmul.f32 %v5341_v26, %v266_v14  ;;  %v345_v44 = vadd.f32 %v5346_v27, %v306_v12  ;;  %v723_v34 = vsel %vm699_vm5, %v690_v19, %v5370_v50 }
  0xc3   : > { %v752_v5 = vsel %vm732_vm6, %v719_v60, %v599_v6  ;;  %v5741_v7 = vsel %vm732_vm6, %v722_v42, %v617_v62  ;;  %4484 = vmatpush3.bf16.msra.mxu0 %v4969_v38  ;;  %v375_v38 = vmax.f32 %v343_v33, 0.0  ;;  %v726_v43 = vsel %vm699_vm5, %v693_v55, %v5364_v37  ;;  %v2348_v6 = vld [vmem:[#allocation2 + $0x82] sm:$0xff]  ;;  %v2349_v55 = vld [vmem:[#allocation2 + $0x92] sm:$0xff] }
  0xc4   : > { %v785_v16 = vsel %vm765_vm7, %v752_v5, 0.0  ;;  %v788_v56 = vsel %vm765_vm7, %v5741_v7, 0.0  ;;  %4517 = vmatprep.subr.bf16.mxu0 %v4971_v58  ;;  %v5079_v36 = vpack.c.bf16 %v752_v5, %v5671_v18  ;;  %v692_v18 = vsel %vm666_vm4, %v372_v46, %v5317_v15  ;;  %v2350_v46 = vld [vmem:[#allocation2 + $0x9a] sm:$0xff] }
  0xc5   : > { %861 = vst [vmem:[#allocation2 + $0xf9] sm:$0xff] %v785_v16  ;;  %864 = vst [vmem:[#allocation2 + $0x121] sm:$0xff] %v788_v56  ;;  %v374_v4 = vmax.f32 %v342_v21, 0.0  ;;  %v344_v51 = vadd.f32 %v5346_v27, %v305_v31  ;;  %v695_v54 = vsel %vm666_vm4, %v375_v38, %v5335_v22  ;;  %v377_v57 = vmax.f32 %v345_v44, 0.0  ;;  %v874_v38 = vld [vmem:[#allocation2] sm:$0xff] }
  0xc6   : > { %v610_v24 = vpop.permute.xlu1 %609  ;;  %v628_v29 = vpop.permute.xlu0 %627  ;;  %5080 = vmatprep.mubr.msk.bf16.mxu1 %vm5465_vm8, %v5079_v36  ;;  %4486 = vmatmul.mubr.bf16.vlgmr.msra.gmra.mrb[0].mxu0 %v5756_v25  ;;  %v5804_v62 = vpack.c.bf16 %v2346_v47, %v2345_v53  ;;  %v725_v39 = vsel %vm699_vm5, %v692_v18, %v5370_v50  ;;  %v728_v1 = vsel %vm699_vm5, %v695_v54, %v5364_v37  ;;  %v4985_v54 = vld [vmem:[%s6248_s1 + $0x1b8] sm:$0xff]  }
  0xc7   : > { %v754_v32 = vsel %vm732_vm6, %v721_v13, %v610_v24  ;;  %v5771_v3 = vsel %vm732_vm6, %v724_v30, %v628_v29  ;;  %4518 = vmatpush3.bf16.msra.mxu0 %v4971_v58  ;;  %4489 = vmatprep.mubr.bf16.mxu0 %v5766_v63  ;;  %v694_v48 = vsel %vm666_vm4, %v374_v4, %v5323_v17  ;;  %v376_v11 = vmax.f32 %v344_v51, 0.0  ;;  %v2351_v29 = vld [vmem:[#allocation2 + $0xaa] sm:$0xff]  ;;  %v2352_v30 = vld [vmem:[#allocation2 + $0xb2] sm:$0xff] }
  0xc8   : > { %v787_v2 = vsel %vm765_vm7, %v754_v32, 0.0  ;;  %v790_v26 = vsel %vm765_vm7, %v5771_v3, 0.0  ;;  %4519 = vmatprep.subr.bf16.mxu0 %v4973_v23  ;;  %v5082_v58 = vpack.c.bf16 %v754_v32, %v5710_v35  ;;  %v4977_v35 = vld [vmem:[%s6248_s1 + $0x198] sm:$0xff]   ;;  %v5815_v5 = vpack.c.bf16 %v2348_v6, %v2347_v59  ;;  %v2356_v47 = vld [vmem:[#allocation2 + $0xe2] sm:$0xff]  ;;  %v878_v6 = vld [vmem:[#allocation2 + $0x30] sm:$0xff] }
  0xc9   : > { %863 = vst [vmem:[#allocation2 + $0x111] sm:$0xff] %v787_v2  ;;  %866 = vst [vmem:[#allocation2 + $0x139] sm:$0xff] %v790_v26  ;;  %v697_v10 = vsel %vm666_vm4, %v377_v57, %v5350_v28  ;;  %v4979_v28 = vld [vmem:[%s6248_s1 + $0x1a0] sm:$0xff]   ;;  %v727_v16 = vsel %vm699_vm5, %v694_v48, %v5370_v50  ;;  %v696_v24 = vsel %vm666_vm4, %v376_v11, %v5335_v22  ;;  %v4981_v22 = vld [vmem:[%s6248_s1 + $0x1a8] sm:$0xff]  }
  0xca   : > { %v621_v8 = vpop.permute.xlu1 %620  ;;  %v639_v49 = vpop.permute.xlu0 %638  ;;  %5083 = vmatmul.mubr.msk.bf16.gmra.mrb[20].mxu1 %vm5465_vm8, %v5082_v58  ;;  %v730_v19 = vsel %vm699_vm5, %v697_v10, %v5364_v37  ;;  %v5844_v32 = vpack.c.bf16 %v2350_v46, %v2349_v55  ;;  %v729_v36 = vsel %vm699_vm5, %v696_v24, %v5370_v50  ;;  %v5851_v44 = vpack.c.bf16 %v2352_v30, %v2351_v29  ;;  %v4983_v50 = vld [vmem:[%s6248_s1 + $0x1b0] sm:$0xff]   ;;  %v2355_v53 = vld [vmem:[#allocation2 + $0xda] sm:$0xff]  ;;  %v883_v11 = vld [vmem:[#allocation2 + $0x68] sm:$0xff] }
  0xcb   : > { %v756_v15 = vsel %vm732_vm6, %v723_v34, %v621_v8  ;;  %v5794_v61 = vsel %vm732_vm6, %v726_v43, %v639_v49  ;;  %4520 = vmatpush3.bf16.msra.mxu0 %v4973_v23  ;;  %v2353_v49 = vld [vmem:[#allocation2 + $0xc2] sm:$0xff]  ;;  %v2354_v43 = vld [vmem:[#allocation2 + $0xca] sm:$0xff]  ;;  %v5876_v57 = vpack.c.bf16 %v2356_v47, %v2355_v53  ;;  %v876_v58 = vld [vmem:[#allocation2 + $0x18] sm:$0xff] }
  0xcc   : > { %v789_v27 = vsel %vm765_vm7, %v756_v15, 0.0  ;;  %v792_v60 = vsel %vm765_vm7, %v5794_v61, 0.0  ;;  %4521 = vmatprep.subr.bf16.mxu0 %v4975_v41  ;;  %v5085_v12 = vpack.c.bf16 %v756_v15, %v5741_v7  ;;  %v881_v10 = vld [vmem:[#allocation2 + $0x50] sm:$0xff]  ;;  %v4986_v46 = vld [vmem:[%s6248_s1 + $0xa0] sm:$0xff]   ;;  %v887_v24 = vld [vmem:[#allocation2 + $0x98] sm:$0xff] }
  0xcd   : > { %865 = vst [vmem:[#allocation2 + $0x129] sm:$0xff] %v789_v27  ;;  %868 = vst [vmem:[#allocation2 + $0x151] sm:$0xff] %v792_v60  ;;  %v4980_v27 = vld [vmem:[%s6248_s1 + $0x88] sm:$0xff]   ;;  %v5885_v60 = vpack.c.bf16 %v879_v45, %v878_v6  ;;  %v886_v30 = vld [vmem:[#allocation2 + $0x90] sm:$0xff] }
  0xce   : > { %v632_v42 = vpop.permute.xlu1 %631  ;;  %v650_v0 = vpop.permute.xlu0 %649  ;;  %5086 = vmatprep.mubr.msk.bf16.mxu1 %vm5465_vm8, %v5085_v12  ;;  %4490 = vmatmul.mubr.bf16.gmra.mrb[4].mxu0 %v5804_v62  ;;  %v880_v12 = vld [vmem:[#allocation2 + $0x48] sm:$0xff]  ;;  %v895_v45 = vld [vmem:[#allocation2 + $0xf8] sm:$0xff] }
  0xcf   : > { %v758_v9 = vsel %vm732_vm6, %v725_v39, %v632_v42  ;;  %v761_v33 = vsel %vm732_vm6, %v728_v1, %v650_v0  ;;  %4493 = vmatprep.mubr.bf16.mxu0 %v5815_v5  ;;  %4522 = vmatpush3.bf16.msra.mxu0 %v4975_v41  ;;  %v5860_v41 = vld [vmem:[#allocation2 + $0x8] sm:$0xff]  ;;  %v2358_v42 = vld [vmem:[#allocation2 + $0xfa] sm:$0xff] }
  0xd0   : > { %v791_v14 = vsel %vm765_vm7, %v758_v9, 0.0  ;;  %v794_v17 = vsel %vm765_vm7, %v761_v33, 0.0  ;;  %4523 = vmatprep.subr.bf16.mxu0 %v4977_v35  ;;  %v5088_v13 = vpack.c.bf16 %v758_v9, %v5771_v3  ;;  %v906_v8 = vpack.c.bf16 %v5860_v41, %v874_v38  ;;  %v5890_v39 = vld [vmem:[%s6248_s1 + $0x1c0] sm:$0xff]   ;;  %v2359_v0 = vld [vmem:[#allocation2 + $0x10a] sm:$0xff]  ;;  %v2360_v1 = vld [vmem:[#allocation2 + $0x112] sm:$0xff] }
  0xd1   : > { %867 = vst [vmem:[#allocation2 + $0x141] sm:$0xff] %v791_v14  ;;  %870 = vst [vmem:[#allocation2 + $0x169] sm:$0xff] %v794_v17  ;;  %v4982_v9 = vld [vmem:[%s6248_s1 + $0x90] sm:$0xff]   ;;  %v882_v14 = vld [vmem:[#allocation2 + $0x60] sm:$0xff] }
  0xd2   : > { %v643_v7 = vpop.permute.xlu1 %642  ;;  %v661_v56 = vpop.permute.xlu0 %660  ;;  %5089 = vmatmul.mubr.msk.bf16.gmra.mrb[24].mxu1 %vm5465_vm8, %v5088_v13  ;;  %v4984_v17 = vld [vmem:[%s6248_s1 + $0x98] sm:$0xff]  }
  0xd3   : > { %v760_v21 = vsel %vm732_vm6, %v727_v16, %v643_v7  ;;  %v763_v23 = vsel %vm732_vm6, %v730_v19, %v661_v56  ;;  %4524 = vmatpush3.bf16.msra.mxu0 %v4977_v35  ;;  %v2357_v35 = vld [vmem:[#allocation2 + $0xf2] sm:$0xff] }
  0xd4   : > { %v793_v31 = vsel %vm765_vm7, %v760_v21, 0.0  ;;  %v796_v37 = vsel %vm765_vm7, %v763_v23, 0.0  ;;  %4525 = vmatprep.subr.bf16.mxu0 %v4979_v28  ;;  %v5091_v26 = vpack.c.bf16 %v760_v21, %v5794_v61  ;;  %v5871_v61 = vpack.c.bf16 %v2354_v43, %v2353_v49  ;;  %v2361_v7 = vld [vmem:[#allocation2 + $0x122] sm:$0xff]  ;;  %v2362_v16 = vld [vmem:[#allocation2 + $0x12a] sm:$0xff]  ;;  %v884_v13 = vld [vmem:[#allocation2 + $0x78] sm:$0xff] }
  0xd5   : > { %869 = vst [vmem:[#allocation2 + $0x159] sm:$0xff] %v793_v31  ;;  %872 = vst [vmem:[#allocation2 + $0x181] sm:$0xff] %v796_v37  ;;  %v5895_v48 = vpack.c.bf16 %v2358_v42, %v2357_v35  ;;  %v5914_v55 = vpack.c.bf16 %v2362_v16, %v2361_v7  ;;  %v885_v23 = vld [vmem:[#allocation2 + $0x80] sm:$0xff]  ;;  %v4988_v31 = vld [vmem:[%s6248_s1 + $0xa8] sm:$0xff]   ;;  %v5928_v37 = vpack.c.bf16 %v887_v24, %v886_v30 }
  0xd6   : > { %v654_v3 = vpop.permute.xlu1 %653  ;;  %5092 = vmatprep.mubr.msk.bf16.mxu1 %vm5465_vm8, %v5091_v26  ;;  %4494 = vmatmul.mubr.bf16.gmra.mrb[8].mxu0 %v5844_v32  ;;  %v5923_v29 = vpack.c.bf16 %v885_v23, %v884_v13  ;;  %v4990_v26 = vld [vmem:[%s6248_s1 + $0xb0] sm:$0xff]   ;;  %v890_v43 = vld [vmem:[#allocation2 + $0xc0] sm:$0xff]  ;;  %v4989_v42 = vld [vmem:[%s6248_s1 + $0x1c8] sm:$0xff]  }
  0xd7   : > { %v762_v2 = vsel %vm732_vm6, %v729_v36, %v654_v3  ;;  %4497 = vmatprep.mubr.bf16.mxu0 %v5851_v44  ;;  %4526 = vmatpush3.bf16.msra.mxu0 %v4979_v28  ;;  %v5910_v28 = vpack.c.bf16 %v883_v11, %v882_v14  ;;  %v898_v11 = vld [vmem:[#allocation2 + $0x120] sm:$0xff]  ;;  %v900_v16 = vld [vmem:[#allocation2 + $0x138] sm:$0xff]  ;;  %v1422_v13 = vld [vmem:[#allocation2 + $0xa] sm:$0xff] }
  0xd8   : > { %v795_v18 = vsel %vm765_vm7, %v762_v2, 0.0  ;;  %4527 = vmatprep.subr.bf16.mxu0 %v4981_v22  ;;  %v5094_v51 = vpack.c.bf16 %v762_v2, %v761_v33  ;;  %v5900_v33 = vpack.c.bf16 %v2360_v1, %v2359_v0  ;;  %v2363_v56 = vld [vmem:[#allocation2 + $0x13a] sm:$0xff]  ;;  %v2364_v19 = vld [vmem:[#allocation2 + $0x142] sm:$0xff]  ;;  %v897_v0 = vld [vmem:[#allocation2 + $0x110] sm:$0xff] }
  0xd9   : > { %871 = vst [vmem:[#allocation2 + $0x171] sm:$0xff] %v795_v18  ;;  %v5919_v21 = vpack.c.bf16 %v2364_v19, %v2363_v56  ;;  %v899_v1 = vld [vmem:[#allocation2 + $0x128] sm:$0xff]  ;;  %v902_v19 = vld [vmem:[#allocation2 + $0x150] sm:$0xff] }
  0xda   : > { %v665_v34 = vpop.permute.xlu1 %664  ;;  %5095 = vmatmul.mubr.msk.bf16.gmra.mrb[28].mxu1 %vm5465_vm8, %v5094_v51  ;;  %v5974_v14 = vpack.c.bf16 %v899_v1, %v898_v11  ;;  %v1421_v24 = vld [vmem:[#allocation2 + $0x2] sm:$0xff]  ;;  %v5007_v1 = vld [vmem:[%s6248_s1 + $0x210] sm:$0xff]  }
  0xdb   : > { %v764_v4 = vsel %vm732_vm6, %v5375_v52, %v665_v34  ;;  %4293 = vmatprep.mubr.bf16.mxu1 %v906_v8  ;;  %4528 = vmatpush3.bf16.msra.mxu0 %v4981_v22  ;;  %v877_v52 = vld [vmem:[#allocation2 + $0x20] sm:$0xff]  ;;  %v889_v8 = vld [vmem:[#allocation2 + $0xb0] sm:$0xff]  ;;  %v888_v34 = vld [vmem:[#allocation2 + $0xa8] sm:$0xff] }
  0xdc   : > { %v797_v15 = vsel %vm765_vm7, %v764_v4, 0.0  ;;  %4529 = vmatprep.subr.bf16.mxu0 %v4983_v50  ;;  %v5880_v59 = vpack.c.bf16 %v877_v52, %v876_v58  ;;  %v2365_v38 = vld [vmem:[#allocation2 + $0x152] sm:$0xff]  ;;  %v2366_v22 = vld [vmem:[#allocation2 + $0x15a] sm:$0xff]  ;;  %v5941_v49 = vpack.c.bf16 %v889_v8, %v888_v34  ;;  %v4997_v30 = vld [vmem:[%s6248_s1 + $0x1e8] sm:$0xff]  }
  0xdd   : > { %873 = vst [vmem:[#allocation2 + $0x189] sm:$0xff] %v797_v15  ;;  %v5932_v2 = vpack.c.bf16 %v2366_v22, %v2365_v38  ;;  %v4992_v4 = vld [vmem:[%s6248_s1 + $0xb8] sm:$0xff]   ;;  %v893_v52 = vld [vmem:[#allocation2 + $0xe0] sm:$0xff]  ;;  %v904_v38 = vld [vmem:[#allocation2 + $0x168] sm:$0xff]  ;;  %v1453_v22 = vpack.c.bf16 %v1422_v13, %v1421_v24 }
  0xde   : > { %4498 = vmatmul.mubr.bf16.gmra.mrb[12].mxu0 %v5871_v61  ;;  %v892_v58 = vld [vmem:[#allocation2 + $0xd8] sm:$0xff]  ;;  %v4996_v8 = vld [vmem:[%s6248_s1 + $0xc8] sm:$0xff]   ;;  %v4998_v34 = vld [vmem:[%s6248_s1 + $0xd0] sm:$0xff]  }
  0xdf   : > { %4501 = vmatprep.mubr.bf16.mxu0 %v5876_v57  ;;  %4530 = vmatpush3.bf16.msra.mxu0 %v4983_v50  ;;  %v891_v50 = vld [vmem:[#allocation2 + $0xc8] sm:$0xff]  ;;  %v5956_v6 = vpack.c.bf16 %v893_v52, %v892_v58  ;;  %v903_v7 = vld [vmem:[#allocation2 + $0x158] sm:$0xff] }
  0xe0   : > { %4531 = vmatprep.subr.bf16.mxu0 %v4985_v54  ;;  %v2367_v3 = vld [vmem:[#allocation2 + $0x16a] sm:$0xff]  ;;  %v2368_v36 = vld [vmem:[#allocation2 + $0x172] sm:$0xff]  ;;  %v5946_v51 = vpack.c.bf16 %v891_v50, %v890_v43  ;;  %v5988_v23 = vpack.c.bf16 %v903_v7, %v902_v19  ;;  %v5003_v50 = vld [vmem:[%s6248_s1 + $0x200] sm:$0xff]  }
  0xe1   : > { %v5937_v18 = vpack.c.bf16 %v2368_v36, %v2367_v3  ;;  %v4999_v36 = vld [vmem:[%s6248_s1 + $0x1f0] sm:$0xff]   ;;  %v5004_v43 = vld [vmem:[%s6248_s1 + $0xe8] sm:$0xff]  }
  0xe2   : > { %4294 = vmatmul.mubr.bf16.vlgmr.msra.gmra.mrb[0].mxu1 %v5880_v59  ;;  %v2963_v7 = vld [vmem:[#allocation2 + $0xb1] sm:$0xff]  ;;  %v5011_v24 = vld [vmem:[%s6248_s1 + $0x228] sm:$0xff]  }
  0xe3   : > { %4297 = vmatprep.mubr.bf16.mxu1 %v5885_v60  ;;  %4326 = vmatpush3.bf16.msra.mxu1 %v5706_v40  ;;  %v5905_v40 = vpack.c.bf16 %v881_v10, %v880_v12  ;;  %v4991_v12 = vld [vmem:[%s6248_s1 + $0x1d0] sm:$0xff]  }
  0xe4   : > { %4327 = vmatprep.subr.bf16.mxu1 %v4980_v27  ;;  %4532 = vmatpush3.bf16.msra.mxu0 %v4985_v54  ;;  %v2369_v53 = vld [vmem:[#allocation2 + $0x182] sm:$0xff]  ;;  %v2370_v47 = vld [vmem:[#allocation2 + $0x18a] sm:$0xff] }
  0xe5   : > { %4565 = vmatprep.subr.bf16.mxu0 %v5890_v39  ;;  %v2386_v15 = vpack.c.bf16 %v2370_v47, %v2369_v53  ;;  %v5953_v54 = vld [vmem:[%s6248_s1 + $0xc0] sm:$0xff]   ;;  %v2676_v47 = vld [vmem:[#allocation2 + $0x198] sm:$0xff] }
  0xe6   : > { %4502 = vmatmul.mubr.bf16.gmra.mrb[16].mxu0 %v5895_v48 }
  0xe7   : > { %4505 = vmatprep.mubr.bf16.mxu0 %v5900_v33  ;;  %4328 = vmatpush3.bf16.msra.mxu1 %v4980_v27  ;;  %v894_v27 = vld [vmem:[#allocation2 + $0xf0] sm:$0xff] }
  0xe8   : > { %4329 = vmatprep.subr.bf16.mxu1 %v4982_v9  ;;  %v5959_v35 = vpack.c.bf16 %v895_v45, %v894_v27  ;;  %v6053_v45 = vld [vmem:[%s6248_s1 + $0x100] sm:$0xff]  }
  0xe9   : > { %v2956_v27 = vld [vmem:[#allocation2 + $0x61] sm:$0xff] }
  0xea   : > { %4298 = vmatmul.mubr.bf16.gmra.mrb[4].mxu1 %v5905_v40 }
  0xeb   : > { %4301 = vmatprep.mubr.bf16.mxu1 %v5910_v28  ;;  %4330 = vmatpush3.bf16.msra.mxu1 %v4982_v9  ;;  %v896_v9 = vld [vmem:[#allocation2 + $0x108] sm:$0xff] }
  0xec   : > { %4331 = vmatprep.subr.bf16.mxu1 %v4984_v17  ;;  %v5969_v10 = vpack.c.bf16 %v897_v0, %v896_v9  ;;  %v2958_v9 = vld [vmem:[#allocation2 + $0x79] sm:$0xff] }
  0xee   : > { %4506 = vmatmul.mubr.bf16.gmra.mrb[20].mxu0 %v5914_v55 }
  0xef   : > { %4509 = vmatprep.mubr.bf16.mxu0 %v5919_v21  ;;  %4332 = vmatpush3.bf16.msra.mxu1 %v4984_v17  ;;  %v901_v17 = vld [vmem:[#allocation2 + $0x140] sm:$0xff] }
  0xf0   : > { %4333 = vmatprep.subr.bf16.mxu1 %v4986_v46  ;;  %v5983_v56 = vpack.c.bf16 %v901_v17, %v900_v16  ;;  %v2962_v16 = vld [vmem:[#allocation2 + $0xa9] sm:$0xff] }
  0xf1   : > { %v2989_v19 = vpack.c.bf16 %v2963_v7, %v2962_v16  ;;  %v3271_v16 = vld [vmem:[#allocation2 + $0xca] sm:$0xff] }
  0xf2   : > { %4302 = vmatmul.mubr.bf16.gmra.mrb[8].mxu1 %v5923_v29 }
  0xf3   : > { %4305 = vmatprep.mubr.bf16.mxu1 %v5928_v37  ;;  %4334 = vmatpush3.bf16.msra.mxu1 %v4986_v46  ;;  %v4995_v46 = vld [vmem:[%s6248_s1 + $0x1e0] sm:$0xff]  }
  0xf4   : > { %4335 = vmatprep.subr.bf16.mxu1 %v4988_v31 }
  0xf6   : > { %4510 = vmatmul.mubr.bf16.gmra.mrb[24].mxu0 %v5932_v2 }
  0xf7   : > { %4513 = vmatprep.mubr.bf16.mxu0 %v5937_v18  ;;  %4336 = vmatpush3.bf16.msra.mxu1 %v4988_v31  ;;  %v905_v31 = vld [vmem:[#allocation2 + $0x170] sm:$0xff] }
  0xf8   : > { %4337 = vmatprep.subr.bf16.mxu1 %v4990_v26  ;;  %v5997_v3 = vpack.c.bf16 %v905_v31, %v904_v38  ;;  %v2966_v31 = vld [vmem:[#allocation2 + $0xd9] sm:$0xff] }
  0xfa   : > { %4306 = vmatmul.mubr.bf16.gmra.mrb[12].mxu1 %v5941_v49 }
  0xfb   : > { %4309 = vmatprep.mubr.bf16.mxu1 %v5946_v51  ;;  %4338 = vmatpush3.bf16.msra.mxu1 %v4990_v26  ;;  %v5001_v26 = vld [vmem:[%s6248_s1 + $0x1f8] sm:$0xff]  }
  0xfc   : > { %4339 = vmatprep.subr.bf16.mxu1 %v4992_v4 }
  0xfe   : > { %4514 = vmatmul.mubr.bf16.gmra.mrb[28].mxu0 %v2386_v15  ;;  %v2953_v15 = vld [vmem:[#allocation2 + $0x39] sm:$0xff] }
  0xff   : > { %4533 = vmatprep.mubr.bf16.mxu0 %v5885_v60  ;;  %4340 = vmatpush3.bf16.msra.mxu1 %v4992_v4  ;;  %v5006_v4 = vld [vmem:[%s6248_s1 + $0xf0] sm:$0xff]  }
 0x100   : > { %4373 = vmatprep.subr.bf16.mxu1 %v5953_v54 }
 0x102   : > { %4310 = vmatmul.mubr.bf16.gmra.mrb[16].mxu1 %v5956_v6 }
 0x103   : > { %4313 = vmatprep.mubr.bf16.mxu1 %v5959_v35 }
 0x106   : > { %4534 = vmatmul.mubr.bf16.vlgmr.msra.gmra.mrb[0].mxu0 %v5905_v40 }
 0x107   : > { %4566 = vmatpush3.bf16.msra.mxu0 %v5890_v39  ;;  %4537 = vmatprep.mubr.bf16.mxu0 %v5910_v28  ;;  %v4993_v39 = vld [vmem:[%s6248_s1 + $0x1d8] sm:$0xff]  }
 0x108   : > { %4567 = vmatprep.subr.bf16.mxu0 %v4989_v42 }
 0x10a   : > { %4314 = vmatmul.mubr.bf16.gmra.mrb[20].mxu1 %v5969_v10 }
 0x10b   : > { %4317 = vmatprep.mubr.bf16.mxu1 %v5974_v14  ;;  %4568 = vmatpush3.bf16.msra.mxu0 %v4989_v42  ;;  %v5005_v42 = vld [vmem:[%s6248_s1 + $0x208] sm:$0xff]  }
 0x10c   : > { %4569 = vmatprep.subr.bf16.mxu0 %v4991_v12 }
 0x10e   : > { %4538 = vmatmul.mubr.bf16.gmra.mrb[4].mxu0 %v5923_v29 }
 0x10f   : > { %4541 = vmatprep.mubr.bf16.mxu0 %v5928_v37  ;;  %4570 = vmatpush3.bf16.msra.mxu0 %v4991_v12  ;;  %v2960_v12 = vld [vmem:[#allocation2 + $0x91] sm:$0xff] }
 0x110   : > { %4571 = vmatprep.subr.bf16.mxu0 %v4993_v39 }
 0x112   : > { %4318 = vmatmul.mubr.bf16.gmra.mrb[24].mxu1 %v5983_v56 }
 0x113   : > { %4321 = vmatprep.mubr.bf16.mxu1 %v5988_v23  ;;  %4572 = vmatpush3.bf16.msra.mxu0 %v4993_v39  ;;  %v5009_v39 = vld [vmem:[%s6248_s1 + $0x218] sm:$0xff]  }
 0x114   : > { %4573 = vmatprep.subr.bf16.mxu0 %v4995_v46 }
 0x116   : > { %4542 = vmatmul.mubr.bf16.gmra.mrb[8].mxu0 %v5941_v49 }
 0x117   : > { %4545 = vmatprep.mubr.bf16.mxu0 %v5946_v51  ;;  %4574 = vmatpush3.bf16.msra.mxu0 %v4995_v46  ;;  %v2964_v46 = vld [vmem:[#allocation2 + $0xc1] sm:$0xff] }
 0x118   : > { %4575 = vmatprep.subr.bf16.mxu0 %v4997_v30 }
 0x11a   : > { %4322 = vmatmul.mubr.bf16.gmra.mrb[28].mxu1 %v5997_v3 }
 0x11b   : > { %4341 = vmatprep.mubr.bf16.mxu1 %v1453_v22  ;;  %4576 = vmatpush3.bf16.msra.mxu0 %v4997_v30  ;;  %v2967_v30 = vld [vmem:[#allocation2 + $0xe1] sm:$0xff]  ;;  %v2968_v22 = vld [vmem:[#allocation2 + $0xf1] sm:$0xff] }
 0x11c   : > { %4577 = vmatprep.subr.bf16.mxu0 %v4999_v36  ;;  %v6082_v38 = vpack.c.bf16 %v2967_v30, %v2966_v31  ;;  %v3279_v31 = vld [vmem:[#allocation2 + $0x12a] sm:$0xff] }
 0x11e   : > { %4546 = vmatmul.mubr.bf16.gmra.mrb[12].mxu0 %v5956_v6 }
 0x11f   : > { %4549 = vmatprep.mubr.bf16.mxu0 %v5959_v35  ;;  %4578 = vmatpush3.bf16.msra.mxu0 %v4999_v36  ;;  %v5013_v36 = vld [vmem:[%s6248_s1 + $0x238] sm:$0xff]  }
 0x120   : > { %4579 = vmatprep.subr.bf16.mxu0 %v5001_v26 }
 0x122   : > { %4342 = vmatmul.mubr.bf16.vlgmr.msra.gmra.mrb[0].mxu1 %v5700_v20  ;;  %v5000_v20 = vld [vmem:[%s6248_s1 + $0xd8] sm:$0xff]  }
 0x123   : > { %4345 = vmatprep.mubr.bf16.mxu1 %v5756_v25  ;;  %4374 = vmatpush3.bf16.msra.mxu1 %v5953_v54  ;;  %v5002_v25 = vld [vmem:[%s6248_s1 + $0xe0] sm:$0xff]   ;;  %v2952_v54 = vld [vmem:[#allocation2 + $0x31] sm:$0xff] }
 0x124   : > { %4375 = vmatprep.subr.bf16.mxu1 %v4996_v8  ;;  %4580 = vmatpush3.bf16.msra.mxu0 %v5001_v26  ;;  %v2984_v52 = vpack.c.bf16 %v2953_v15, %v2952_v54  ;;  %v2978_v15 = vld [vmem:[#allocation2 + $0x169] sm:$0xff] }
 0x125   : > { %4613 = vmatprep.subr.bf16.mxu0 %v5003_v50 }
 0x126   : > { %4550 = vmatmul.mubr.bf16.gmra.mrb[16].mxu0 %v5969_v10 }
 0x127   : > { %4553 = vmatprep.mubr.bf16.mxu0 %v5974_v14  ;;  %4376 = vmatpush3.bf16.msra.mxu1 %v4996_v8  ;;  %v2970_v8 = vld [vmem:[#allocation2 + $0x109] sm:$0xff] }
 0x128   : > { %4377 = vmatprep.subr.bf16.mxu1 %v4998_v34 }
 0x12a   : > { %4346 = vmatmul.mubr.bf16.gmra.mrb[4].mxu1 %v5766_v63  ;;  %v2675_v63 = vld [vmem:[#allocation2 + $0x188] sm:$0xff] }
 0x12b   : > { %4349 = vmatprep.mubr.bf16.mxu1 %v5804_v62  ;;  %4378 = vmatpush3.bf16.msra.mxu1 %v4998_v34  ;;  %v2674_v62 = vld [vmem:[#allocation2 + $0x180] sm:$0xff] }
 0x12c   : > { %4379 = vmatprep.subr.bf16.mxu1 %v5000_v20  ;;  %v6040_v53 = vpack.c.bf16 %v2675_v63, %v2674_v62  ;;  %v2972_v34 = vld [vmem:[#allocation2 + $0x121] sm:$0xff]  ;;  %v2974_v63 = vld [vmem:[#allocation2 + $0x139] sm:$0xff] }
 0x12e   : > { %4554 = vmatmul.mubr.bf16.gmra.mrb[20].mxu0 %v5983_v56 }
 0x12f   : > { %4557 = vmatprep.mubr.bf16.mxu0 %v5988_v23  ;;  %4380 = vmatpush3.bf16.msra.mxu1 %v5000_v20  ;;  %v5020_v20 = vld [vmem:[%s6248_s1 + $0x108] sm:$0xff]  }
 0x130   : > { %4381 = vmatprep.subr.bf16.mxu1 %v5002_v25 }
 0x132   : > { %4350 = vmatmul.mubr.bf16.gmra.mrb[8].mxu1 %v5815_v5  ;;  %v5008_v5 = vld [vmem:[%s6248_s1 + $0xf8] sm:$0xff]  }
 0x133   : > { %4353 = vmatprep.mubr.bf16.mxu1 %v5844_v32  ;;  %4382 = vmatpush3.bf16.msra.mxu1 %v5002_v25  ;;  %v2693_v32 = vpack.c.bf16 %v5860_v41, %v2676_v47  ;;  %v2957_v41 = vld [vmem:[#allocation2 + $0x69] sm:$0xff]  ;;  %v5022_v47 = vld [vmem:[%s6248_s1 + $0x118] sm:$0xff]  }
 0x134   : > { %4383 = vmatprep.subr.bf16.mxu1 %v5004_v43  ;;  %v2986_v0 = vpack.c.bf16 %v2957_v41, %v2956_v27  ;;  %v2983_v41 = vld [vmem:[#allocation2 + $0x1a1] sm:$0xff] }
 0x135   : > { %v3259_v27 = vld [vmem:[#allocation2 + $0x3a] sm:$0xff] }
 0x136   : > { %4558 = vmatmul.mubr.bf16.gmra.mrb[24].mxu0 %v5997_v3 }
 0x137   : > { %4561 = vmatprep.mubr.bf16.mxu0 %v6040_v53  ;;  %4384 = vmatpush3.bf16.msra.mxu1 %v5004_v43  ;;  %v2977_v43 = vld [vmem:[#allocation2 + $0x159] sm:$0xff] }
 0x138   : > { %4385 = vmatprep.subr.bf16.mxu1 %v5006_v4 }
 0x13a   : > { %4354 = vmatmul.mubr.bf16.gmra.mrb[12].mxu1 %v5851_v44  ;;  %v2955_v44 = vld [vmem:[#allocation2 + $0x51] sm:$0xff] }
 0x13b   : > { %4357 = vmatprep.mubr.bf16.mxu1 %v5871_v61  ;;  %4386 = vmatpush3.bf16.msra.mxu1 %v5006_v4  ;;  %v2954_v61 = vld [vmem:[#allocation2 + $0x49] sm:$0xff]  ;;  %v2976_v4 = vld [vmem:[#allocation2 + $0x151] sm:$0xff] }
 0x13c   : > { %4387 = vmatprep.subr.bf16.mxu1 %v5008_v5  ;;  %v2985_v58 = vpack.c.bf16 %v2955_v44, %v2954_v61 }
 0x13e   : > { %4562 = vmatmul.mubr.bf16.gmra.mrb[28].mxu0 %v2693_v32  ;;  %v2981_v32 = vld [vmem:[#allocation2 + $0x189] sm:$0xff] }
 0x13f   : > { %4581 = vmatprep.mubr.bf16.mxu0 %v2984_v52  ;;  %4388 = vmatpush3.bf16.msra.mxu1 %v5008_v5  ;;  %v6113_v5 = vpack.c.bf16 %v2977_v43, %v2976_v4  ;;  %v2980_v52 = vld [vmem:[#allocation2 + $0x181] sm:$0xff] }
 0x140   : > { %4661 = vmatprep.subr.bf16.mxu1 %v6053_v45  ;;  %v6127_v44 = vpack.c.bf16 %v2981_v32, %v2980_v52 }
 0x142   : > { %4358 = vmatmul.mubr.bf16.gmra.mrb[16].mxu1 %v5876_v57  ;;  %v2959_v57 = vld [vmem:[#allocation2 + $0x81] sm:$0xff] }
 0x143   : > { %4361 = vmatprep.mubr.bf16.mxu1 %v5895_v48  ;;  %v2961_v48 = vld [vmem:[#allocation2 + $0x99] sm:$0xff]  ;;  %v2987_v11 = vpack.c.bf16 %v2959_v57, %v2958_v9 }
 0x144   : > { %v2988_v17 = vpack.c.bf16 %v2961_v48, %v2960_v12  ;;  %v3261_v57 = vld [vmem:[#allocation2 + $0x52] sm:$0xff]  ;;  %v3263_v48 = vld [vmem:[#allocation2 + $0x6a] sm:$0xff]  ;;  %v3265_v12 = vld [vmem:[#allocation2 + $0x82] sm:$0xff] }
 0x146   : > { %4582 = vmatmul.mubr.bf16.vlgmr.msra.gmra.mrb[0].mxu0 %v2985_v58  ;;  %v3258_v58 = vld [vmem:[#allocation2 + $0x32] sm:$0xff] }
 0x147   : > { %4614 = vmatpush3.bf16.msra.mxu0 %v5003_v50  ;;  %4585 = vmatprep.mubr.bf16.mxu0 %v2986_v0  ;;  %v3290_v0 = vpack.c.bf16 %v3259_v27, %v3258_v58 }
 0x148   : > { %4615 = vmatprep.subr.bf16.mxu0 %v5005_v42 }
 0x14a   : > { %4362 = vmatmul.mubr.bf16.gmra.mrb[20].mxu1 %v5900_v33  ;;  %v5010_v33 = vld [vmem:[%s6248_s1 + $0x220] sm:$0xff]  }
 0x14b   : > { %4365 = vmatprep.mubr.bf16.mxu1 %v5914_v55  ;;  %4616 = vmatpush3.bf16.msra.mxu0 %v5005_v42  ;;  %v2965_v55 = vld [vmem:[#allocation2 + $0xc9] sm:$0xff]  ;;  %v5026_v42 = vld [vmem:[%s6248_s1 + $0x138] sm:$0xff]  }
 0x14c   : > { %4617 = vmatprep.subr.bf16.mxu0 %v5007_v1  ;;  %v2990_v13 = vpack.c.bf16 %v2965_v55, %v2964_v46  ;;  %v3269_v55 = vld [vmem:[#allocation2 + $0xb2] sm:$0xff] }
 0x14e   : > { %4586 = vmatmul.mubr.bf16.gmra.mrb[4].mxu0 %v2987_v11  ;;  %v3264_v11 = vld [vmem:[#allocation2 + $0x7a] sm:$0xff] }
 0x14f   : > { %4589 = vmatprep.mubr.bf16.mxu0 %v2988_v17  ;;  %4618 = vmatpush3.bf16.msra.mxu0 %v5007_v1  ;;  %v3260_v1 = vld [vmem:[#allocation2 + $0x4a] sm:$0xff]  ;;  %v3267_v17 = vld [vmem:[#allocation2 + $0x9a] sm:$0xff] }
 0x150   : > { %4619 = vmatprep.subr.bf16.mxu0 %v5009_v39  ;;  %v3291_v9 = vpack.c.bf16 %v3261_v57, %v3260_v1 }
 0x152   : > { %4366 = vmatmul.mubr.bf16.gmra.mrb[24].mxu1 %v5919_v21  ;;  %v5012_v21 = vld [vmem:[%s6248_s1 + $0x230] sm:$0xff]  }
 0x153   : > { %4369 = vmatprep.mubr.bf16.mxu1 %v5932_v2  ;;  %4620 = vmatpush3.bf16.msra.mxu0 %v5009_v39  ;;  %v2969_v2 = vld [vmem:[#allocation2 + $0xf9] sm:$0xff] }
 0x154   : > { %4621 = vmatprep.subr.bf16.mxu0 %v5010_v33  ;;  %v6087_v26 = vpack.c.bf16 %v2969_v2, %v2968_v22  ;;  %v3266_v39 = vld [vmem:[#allocation2 + $0x92] sm:$0xff] }
 0x155   : > { %v3294_v7 = vpack.c.bf16 %v3267_v17, %v3266_v39  ;;  %v3277_v2 = vld [vmem:[#allocation2 + $0x112] sm:$0xff] }
 0x156   : > { %4590 = vmatmul.mubr.bf16.gmra.mrb[8].mxu0 %v2989_v19 }
 0x157   : > { %4593 = vmatprep.mubr.bf16.mxu0 %v2990_v13  ;;  %4622 = vmatpush3.bf16.msra.mxu0 %v5010_v33  ;;  %v3293_v33 = vpack.c.bf16 %v3265_v12, %v3264_v11  ;;  %v3275_v13 = vld [vmem:[#allocation2 + $0xfa] sm:$0xff] }
 0x158   : > { %4623 = vmatprep.subr.bf16.mxu0 %v5011_v24 }
 0x15a   : > { %4370 = vmatmul.mubr.bf16.gmra.mrb[28].mxu1 %v5937_v18  ;;  %v2971_v18 = vld [vmem:[#allocation2 + $0x111] sm:$0xff] }
 0x15b   : > { %4389 = vmatprep.mubr.bf16.mxu1 %v5880_v59  ;;  %4624 = vmatpush3.bf16.msra.mxu0 %v5011_v24  ;;  %v2973_v59 = vld [vmem:[#allocation2 + $0x129] sm:$0xff]  ;;  %v6094_v50 = vpack.c.bf16 %v2971_v18, %v2970_v8 }
 0x15c   : > { %4625 = vmatprep.subr.bf16.mxu0 %v5012_v21  ;;  %v6099_v25 = vpack.c.bf16 %v2973_v59, %v2972_v34  ;;  %v3273_v24 = vld [vmem:[#allocation2 + $0xe2] sm:$0xff]  ;;  %v3283_v59 = vld [vmem:[#allocation2 + $0x15a] sm:$0xff] }
 0x15d   : > { %v3281_v18 = vld [vmem:[#allocation2 + $0x142] sm:$0xff] }
 0x15e   : > { %4594 = vmatmul.mubr.bf16.gmra.mrb[12].mxu0 %v6082_v38 }
 0x15f   : > { %4597 = vmatprep.mubr.bf16.mxu0 %v6087_v26  ;;  %4626 = vmatpush3.bf16.msra.mxu0 %v5012_v21 }
 0x160   : > { %4627 = vmatprep.subr.bf16.mxu0 %v5013_v36 }
 0x162   : > { %4390 = vmatmul.mubr.bf16.vlgmr.msra.gmra.mrb[0].mxu1 %v5885_v60  ;;  %v5021_v60 = vld [vmem:[%s6248_s1 + $0x110] sm:$0xff]  }
 0x163   : > { %4393 = vmatprep.mubr.bf16.mxu1 %v5905_v40  ;;  %4669 = vmatpush3.bf16.msra.mxu1 %v6053_v45  ;;  %v2975_v40 = vld [vmem:[#allocation2 + $0x141] sm:$0xff] }
 0x164   : > { %4662 = vmatprep.subr.bf16.mxu1 %v5020_v20  ;;  %4628 = vmatpush3.bf16.msra.mxu0 %v5013_v36  ;;  %v6108_v62 = vpack.c.bf16 %v2975_v40, %v2974_v63  ;;  %v5024_v45 = vld [vmem:[%s6248_s1 + $0x128] sm:$0xff]  }
 0x165   : > { %v3289_v63 = vld [vmem:[#allocation2 + $0x1a2] sm:$0xff] }
 0x166   : > { %4598 = vmatmul.mubr.bf16.gmra.mrb[16].mxu0 %v6094_v50 }
 0x167   : > { %4601 = vmatprep.mubr.bf16.mxu0 %v6099_v25  ;;  %4670 = vmatpush3.bf16.msra.mxu1 %v5020_v20  ;;  %v3285_v20 = vld [vmem:[#allocation2 + $0x172] sm:$0xff] }
 0x168   : > { %4663 = vmatprep.subr.bf16.mxu1 %v5021_v60 }
 0x16a   : > { %4394 = vmatmul.mubr.bf16.gmra.mrb[4].mxu1 %v5910_v28  ;;  %v5023_v28 = vld [vmem:[%s6248_s1 + $0x120] sm:$0xff]  }
 0x16b   : > { %4397 = vmatprep.mubr.bf16.mxu1 %v5923_v29  ;;  %4671 = vmatpush3.bf16.msra.mxu1 %v5021_v60  ;;  %v2979_v29 = vld [vmem:[#allocation2 + $0x171] sm:$0xff] }
 0x16c   : > { %4664 = vmatprep.subr.bf16.mxu1 %v5022_v47  ;;  %v6122_v54 = vpack.c.bf16 %v2979_v29, %v2978_v15  ;;  %v3287_v60 = vld [vmem:[#allocation2 + $0x18a] sm:$0xff] }
 0x16e   : > { %4602 = vmatmul.mubr.bf16.gmra.mrb[20].mxu0 %v6108_v62 }
 0x16f   : > { %4605 = vmatprep.mubr.bf16.mxu0 %v6113_v5  ;;  %4672 = vmatpush3.bf16.msra.mxu1 %v5022_v47 }
 0x170   : > { %4665 = vmatprep.subr.bf16.mxu1 %v5023_v28 }
 0x172   : > { %4398 = vmatmul.mubr.bf16.gmra.mrb[8].mxu1 %v5928_v37  ;;  %v2982_v37 = vld [vmem:[#allocation2 + $0x199] sm:$0xff] }
 0x173   : > { %4401 = vmatprep.mubr.bf16.mxu1 %v5941_v49  ;;  %4673 = vmatpush3.bf16.msra.mxu1 %v5023_v28  ;;  %v5025_v49 = vld [vmem:[%s6248_s1 + $0x130] sm:$0xff]   ;;  %v2999_v61 = vpack.c.bf16 %v2983_v41, %v2982_v37 }
 0x174   : > { %4666 = vmatprep.subr.bf16.mxu1 %v5024_v45 }
 0x176   : > { %4606 = vmatmul.mubr.bf16.gmra.mrb[24].mxu0 %v6122_v54 }
 0x177   : > { %4609 = vmatprep.mubr.bf16.mxu0 %v6127_v44  ;;  %4674 = vmatpush3.bf16.msra.mxu1 %v5024_v45 }
 0x178   : > { %4667 = vmatprep.subr.bf16.mxu1 %v5025_v49 }
 0x17a   : > { %4402 = vmatmul.mubr.bf16.gmra.mrb[12].mxu1 %v5946_v51  ;;  %v3262_v51 = vld [vmem:[#allocation2 + $0x62] sm:$0xff] }
 0x17b   : > { %4405 = vmatprep.mubr.bf16.mxu1 %v5956_v6  ;;  %4675 = vmatpush3.bf16.msra.mxu1 %v5025_v49  ;;  %v3292_v6 = vpack.c.bf16 %v3263_v48, %v3262_v51 }
 0x17c   : > { %4668 = vmatprep.subr.bf16.mxu1 %v5026_v42 }
 0x17e   : > { %4610 = vmatmul.mubr.bf16.gmra.mrb[28].mxu0 %v2999_v61 }
 0x17f   : > { %4629 = vmatprep.mubr.bf16.mxu0 %v3290_v0  ;;  %4676 = vmatpush3.bf16.msra.mxu1 %v5026_v42 }
 0x182   : > { %4406 = vmatmul.mubr.bf16.gmra.mrb[16].mxu1 %v5959_v35  ;;  %v3268_v35 = vld [vmem:[#allocation2 + $0xaa] sm:$0xff] }
 0x183   : > { %4409 = vmatprep.mubr.bf16.mxu1 %v5969_v10  ;;  %v3270_v10 = vld [vmem:[#allocation2 + $0xc2] sm:$0xff]  ;;  %v3295_v19 = vpack.c.bf16 %v3269_v55, %v3268_v35 }
 0x184   : > { %v3296_v46 = vpack.c.bf16 %v3271_v16, %v3270_v10 }
 0x186   : > { %4630 = vmatmul.mubr.bf16.vlgmr.msra.gmra.mrb[0].mxu0 %v3291_v9 }
 0x187   : > { %4633 = vmatprep.mubr.bf16.mxu0 %v3292_v6 }
 0x18a   : > { %4410 = vmatmul.mubr.bf16.gmra.mrb[20].mxu1 %v5974_v14  ;;  %v3272_v14 = vld [vmem:[#allocation2 + $0xda] sm:$0xff] }
 0x18b   : > { %4413 = vmatprep.mubr.bf16.mxu1 %v5983_v56  ;;  %v3274_v56 = vld [vmem:[#allocation2 + $0xf2] sm:$0xff]  ;;  %v3297_v21 = vpack.c.bf16 %v3273_v24, %v3272_v14 }
 0x18c   : > { %v3298_v30 = vpack.c.bf16 %v3275_v13, %v3274_v56 }
 0x18e   : > { %4634 = vmatmul.mubr.bf16.gmra.mrb[4].mxu0 %v3293_v33 }
 0x18f   : > { %4637 = vmatprep.mubr.bf16.mxu0 %v3294_v7 }
 0x192   : > { %4414 = vmatmul.mubr.bf16.gmra.mrb[24].mxu1 %v5988_v23  ;;  %v3276_v23 = vld [vmem:[#allocation2 + $0x10a] sm:$0xff] }
 0x193   : > { %4417 = vmatprep.mubr.bf16.mxu1 %v5997_v3  ;;  %v3278_v3 = vld [vmem:[#allocation2 + $0x122] sm:$0xff]  ;;  %v3299_v22 = vpack.c.bf16 %v3277_v2, %v3276_v23 }
 0x194   : > { %v3300_v36 = vpack.c.bf16 %v3279_v31, %v3278_v3 }
 0x196   : > { %4638 = vmatmul.mubr.bf16.gmra.mrb[8].mxu0 %v3295_v19 }
 0x197   : > { %4641 = vmatprep.mubr.bf16.mxu0 %v3296_v46 }
 0x19a   : > { %4418 = vmatmul.mubr.bf16.gmra.mrb[28].mxu1 %v6040_v53  ;;  %v3280_v53 = vld [vmem:[#allocation2 + $0x13a] sm:$0xff] }
 0x19b   : > { %4453 = vmatprep.mubr.bf16.mxu1 %v6082_v38  ;;  %v3282_v38 = vld [vmem:[#allocation2 + $0x152] sm:$0xff]  ;;  %v3301_v8 = vpack.c.bf16 %v3281_v18, %v3280_v53 }
 0x19c   : > { %v3302_v34 = vpack.c.bf16 %v3283_v59, %v3282_v38 }
 0x19e   : > { %4642 = vmatmul.mubr.bf16.gmra.mrb[12].mxu0 %v3297_v21 }
 0x19f   : > { %4645 = vmatprep.mubr.bf16.mxu0 %v3298_v30 }
 0x1a2   : > { %4454 = vmatmul.mubr.bf16.vlgmr.msra.gmra.mrb[16].mxu1 %v6087_v26  ;;  %v3284_v26 = vld [vmem:[#allocation2 + $0x16a] sm:$0xff] }
 0x1a3   : > { %4457 = vmatprep.mubr.bf16.mxu1 %v6094_v50  ;;  %v3286_v50 = vld [vmem:[#allocation2 + $0x182] sm:$0xff]  ;;  %v3303_v40 = vpack.c.bf16 %v3285_v20, %v3284_v26 }
 0x1a4   : > { %v3304_v43 = vpack.c.bf16 %v3287_v60, %v3286_v50 }
 0x1a6   : > { %4646 = vmatmul.mubr.bf16.gmra.mrb[16].mxu0 %v3299_v22 }
 0x1a7   : > { %4649 = vmatprep.mubr.bf16.mxu0 %v3300_v36 }
 0x1aa   : > { %4458 = vmatmul.mubr.bf16.gmra.mrb[20].mxu1 %v6099_v25  ;;  %v3288_v25 = vld [vmem:[#allocation2 + $0x19a] sm:$0xff] }
 0x1ab   : > { %4461 = vmatprep.mubr.bf16.mxu1 %v6108_v62  ;;  %v3305_v62 = vpack.c.bf16 %v3289_v63, %v3288_v25 }
 0x1ae   : > { %4650 = vmatmul.mubr.bf16.gmra.mrb[20].mxu0 %v3301_v8 }
 0x1af   : > { %4653 = vmatprep.mubr.bf16.mxu0 %v3302_v34 }
 0x1b2   : > { %4462 = vmatmul.mubr.bf16.gmra.mrb[24].mxu1 %v6113_v5 }
 0x1b3   : > { %4465 = vmatprep.mubr.bf16.mxu1 %v6122_v54 }
 0x1b6   : > { %4654 = vmatmul.mubr.bf16.gmra.mrb[24].mxu0 %v3303_v40 }
 0x1b7   : > { %4657 = vmatprep.mubr.bf16.mxu0 %v3304_v43 }
 0x1ba   : > { %4466 = vmatmul.mubr.bf16.gmra.mrb[28].mxu1 %v6127_v44 }
 0x1be   : > { %4658 = vmatmul.mubr.bf16.gmra.mrb[28].mxu0 %v3305_v62 }
 0x235   : > { %v4391_v4 = vpop.f32.mrb[0].mxu1 }
 0x236   : > { %v1874_v47 = vpop.f32.mrb[1].mxu1 }
 0x237   : > { %v4392_v28 = vpop.f32.mrb[2].mxu1 }
 0x238   : > { %v1877_v29 = vpop.f32.mrb[3].mxu1 }
 0x23d   : > { %v4395_v5 = vpop.f32.mrb[4].mxu1 }
 0x23e   : > { %v1890_v32 = vpop.f32.mrb[5].mxu1 }
 0x23f   : > { %v4396_v15 = vpop.f32.mrb[6].mxu1 }
 0x240   : > { %v1893_v52 = vpop.f32.mrb[7].mxu1 }
 0x245   : > { %v4399_v54 = vpop.f32.mrb[8].mxu1 }
 0x246   : > { %v1906_v45 = vpop.f32.mrb[9].mxu1 }
 0x247   : > { %v4400_v37 = vpop.f32.mrb[10].mxu1 }
 0x248   : > { %v6154_v41 = vpop.f32.mrb[11].mxu1 }
 0x24d   : > { %v6156_v49 = vpop.f32.mrb[12].mxu1 }
 0x24e   : > { %v6158_v61 = vpop.f32.mrb[13].mxu1 }
 0x24f   : > { %v6160_v44 = vpop.f32.mrb[14].mxu1 }
 0x250   : > { %v6162_v58 = vpop.f32.mrb[15].mxu1 }
 0x259   : > { %v4631_v27 = vpop.f32.mrb[0].mxu0 }
 0x25a   : > { %v4677_v42 = vadd.f32 %v4631_v27, %v4391_v4  ;;  %v3405_v0 = vpop.f32.mrb[1].mxu0 }
 0x25b   : > { %v4678_v1 = vadd.f32 %v3405_v0, %v1874_v47  ;;  %v4632_v57 = vpop.f32.mrb[2].mxu0 }
 0x25c   : > { %3566 = vst.msk [vmem:[%s6169_s10 + $0x10] sm:$0xff] %vm666_vm4, %v4677_v42  ;;  %v4679_v51 = vadd.f32 %v4632_v57, %v4392_v28  ;;  %v3408_v48 = vpop.f32.mrb[3].mxu0  ;;  %v3635_v39 = vmul.f32 %v4677_v42, %v4677_v42 }
 0x25d   : > { %3564 = vst.msk [vmem:[%s6169_s10] sm:$0xff] %vm666_vm4, %v4678_v1  ;;  %v4680_v9 = vadd.f32 %v3408_v48, %v1877_v29  ;;  %v3633_v6 = vmul.f32 %v4678_v1, %v4678_v1 }
 0x25e   : > { %3567 = vst.msk [vmem:[%s6169_s10 + $0x18] sm:$0xff] %vm666_vm4, %v4679_v51  ;;  %v3636_v10 = vmul.f32 %v4679_v51, %v4679_v51 }
 0x25f   : > { %3565 = vst.msk [vmem:[%s6169_s10 + $0x8] sm:$0xff] %vm666_vm4, %v4680_v9  ;;  %v3596_v11 = vadd.f32 %v4680_v9, %v4678_v1  ;;  %v3634_v12 = vmul.f32 %v4680_v9, %v4680_v9 }
 0x261   : > { %v3597_v17 = vadd.f32 %v4677_v42, %v3596_v11  ;;  %v3665_v33 = vadd.f32 %v3634_v12, %v3633_v6  ;;  %v4635_v7 = vpop.f32.mrb[4].mxu0 }
 0x262   : > { %v4681_v35 = vadd.f32 %v4635_v7, %v4395_v5  ;;  %v3421_v55 = vpop.f32.mrb[5].mxu0 }
 0x263   : > { %v3666_v16 = vadd.f32 %v3665_v33, %v3635_v39  ;;  %v4682_v19 = vadd.f32 %v3421_v55, %v1890_v32  ;;  %v3598_v46 = vadd.f32 %v4679_v51, %v3597_v17  ;;  %v4636_v14 = vpop.f32.mrb[6].mxu0 }
 0x264   : > { %3570 = vst.msk [vmem:[%s6169_s10 + $0x30] sm:$0xff] %vm666_vm4, %v4681_v35  ;;  %v4683_v24 = vadd.f32 %v4636_v14, %v4396_v15  ;;  %v3424_v56 = vpop.f32.mrb[7].mxu0  ;;  %v3639_v22 = vmul.f32 %v4681_v35, %v4681_v35 }
 0x265   : > { %3568 = vst.msk [vmem:[%s6169_s10 + $0x20] sm:$0xff] %vm666_vm4, %v4682_v19  ;;  %v3599_v13 = vadd.f32 %v4682_v19, %v3598_v46  ;;  %v3637_v21 = vmul.f32 %v4682_v19, %v4682_v19  ;;  %v3667_v30 = vadd.f32 %v3666_v16, %v3636_v10  ;;  %v4684_v23 = vadd.f32 %v3424_v56, %v1893_v52 }
 0x266   : > { %3571 = vst.msk [vmem:[%s6169_s10 + $0x38] sm:$0xff] %vm666_vm4, %v4683_v24  ;;  %v3640_v8 = vmul.f32 %v4683_v24, %v4683_v24 }
 0x267   : > { %v3668_v2 = vadd.f32 %v3667_v30, %v3637_v21  ;;  %3569 = vst.msk [vmem:[%s6169_s10 + $0x28] sm:$0xff] %vm666_vm4, %v4684_v23  ;;  %v3600_v3 = vadd.f32 %v4684_v23, %v3599_v13  ;;  %v3638_v31 = vmul.f32 %v4684_v23, %v4684_v23 }
 0x269   : > { %v3601_v36 = vadd.f32 %v4681_v35, %v3600_v3  ;;  %v3669_v53 = vadd.f32 %v3668_v2, %v3638_v31  ;;  %v4639_v18 = vpop.f32.mrb[8].mxu0 }
 0x26a   : > { %v4685_v38 = vadd.f32 %v4639_v18, %v4399_v54  ;;  %v3437_v59 = vpop.f32.mrb[9].mxu0 }
 0x26b   : > { %v3670_v34 = vadd.f32 %v3669_v53, %v3639_v22  ;;  %v4686_v26 = vadd.f32 %v3437_v59, %v1906_v45  ;;  %v3602_v20 = vadd.f32 %v4683_v24, %v3601_v36  ;;  %v4640_v50 = vpop.f32.mrb[10].mxu0 }
 0x26c   : > { %3574 = vst.msk [vmem:[%s6169_s10 + $0x50] sm:$0xff] %vm666_vm4, %v4685_v38  ;;  %v4687_v60 = vadd.f32 %v4640_v50, %v4400_v37  ;;  %v3440_v40 = vpop.f32.mrb[11].mxu0  ;;  %v3643_v29 = vmul.f32 %v4685_v38, %v4685_v38 }
 0x26d   : > { %3572 = vst.msk [vmem:[%s6169_s10 + $0x40] sm:$0xff] %vm666_vm4, %v4686_v26  ;;  %v3603_v43 = vadd.f32 %v4686_v26, %v3602_v20  ;;  %v3641_v25 = vmul.f32 %v4686_v26, %v4686_v26  ;;  %v3671_v63 = vadd.f32 %v3670_v34, %v3640_v8  ;;  %v4688_v62 = vadd.f32 %v3440_v40, %v6154_v41 }
 0x26e   : > { %3575 = vst.msk [vmem:[%s6169_s10 + $0x58] sm:$0xff] %vm666_vm4, %v4687_v60  ;;  %v3644_v45 = vmul.f32 %v4687_v60, %v4687_v60 }
 0x26f   : > { %v3672_v4 = vadd.f32 %v3671_v63, %v3641_v25  ;;  %3573 = vst.msk [vmem:[%s6169_s10 + $0x48] sm:$0xff] %vm666_vm4, %v4688_v62  ;;  %v3604_v47 = vadd.f32 %v4688_v62, %v3603_v43  ;;  %v3642_v28 = vmul.f32 %v4688_v62, %v4688_v62 }
 0x271   : > { %v3605_v5 = vadd.f32 %v4685_v38, %v3604_v47  ;;  %v3673_v32 = vadd.f32 %v3672_v4, %v3642_v28  ;;  %v4643_v15 = vpop.f32.mrb[12].mxu0 }
 0x272   : > { %v4689_v52 = vadd.f32 %v4643_v15, %v6156_v49  ;;  %v3453_v54 = vpop.f32.mrb[13].mxu0 }
 0x273   : > { %v3674_v37 = vadd.f32 %v3673_v32, %v3643_v29  ;;  %v4690_v41 = vadd.f32 %v3453_v54, %v6158_v61  ;;  %v3606_v27 = vadd.f32 %v4687_v60, %v3605_v5  ;;  %v4644_v42 = vpop.f32.mrb[14].mxu0 }
 0x274   : > { %3578 = vst.msk [vmem:[%s6169_s10 + $0x70] sm:$0xff] %vm666_vm4, %v4689_v52  ;;  %v4691_v0 = vadd.f32 %v4644_v42, %v6160_v44  ;;  %v3456_v1 = vpop.f32.mrb[15].mxu0  ;;  %v3647_v17 = vmul.f32 %v4689_v52, %v4689_v52 }
 0x275   : > { %3576 = vst.msk [vmem:[%s6169_s10 + $0x60] sm:$0xff] %vm666_vm4, %v4690_v41  ;;  %v3607_v57 = vadd.f32 %v4690_v41, %v3606_v27  ;;  %v3645_v51 = vmul.f32 %v4690_v41, %v4690_v41  ;;  %v3675_v48 = vadd.f32 %v3674_v37, %v3644_v45  ;;  %v4692_v49 = vadd.f32 %v3456_v1, %v6162_v58  ;;  %v4455_v9 = vpop.f32.mrb[16].mxu1 }
 0x276   : > { %3579 = vst.msk [vmem:[%s6169_s10 + $0x78] sm:$0xff] %vm666_vm4, %v4691_v0  ;;  %v2244_v6 = vpop.f32.mrb[17].mxu1  ;;  %v3648_v10 = vmul.f32 %v4691_v0, %v4691_v0 }
 0x277   : > { %v3676_v11 = vadd.f32 %v3675_v48, %v3645_v51  ;;  %3577 = vst.msk [vmem:[%s6169_s10 + $0x68] sm:$0xff] %vm666_vm4, %v4692_v49  ;;  %v3608_v61 = vadd.f32 %v4692_v49, %v3607_v57  ;;  %v3646_v12 = vmul.f32 %v4692_v49, %v4692_v49  ;;  %v4456_v39 = vpop.f32.mrb[18].mxu1 }
 0x278   : > { %v2247_v44 = vpop.f32.mrb[19].mxu1 }
 0x279   : > { %v3609_v33 = vadd.f32 %v4689_v52, %v3608_v61  ;;  %v3677_v7 = vadd.f32 %v3676_v11, %v3646_v12  ;;  %v4647_v35 = vpop.f32.mrb[16].mxu0 }
 0x27a   : > { %v4693_v55 = vadd.f32 %v4647_v35, %v4455_v9  ;;  %v3469_v58 = vpop.f32.mrb[17].mxu0 }
 0x27b   : > { %v3678_v16 = vadd.f32 %v3677_v7, %v3647_v17  ;;  %v4694_v19 = vadd.f32 %v3469_v58, %v2244_v6  ;;  %v3610_v46 = vadd.f32 %v4691_v0, %v3609_v33  ;;  %v4648_v14 = vpop.f32.mrb[18].mxu0 }
 0x27c   : > { %3582 = vst.msk [vmem:[%s6169_s10 + $0x90] sm:$0xff] %vm666_vm4, %v4693_v55  ;;  %v4695_v24 = vadd.f32 %v4648_v14, %v4456_v39  ;;  %v3472_v56 = vpop.f32.mrb[19].mxu0  ;;  %v3651_v38 = vmul.f32 %v4693_v55, %v4693_v55 }
 0x27d   : > { %3580 = vst.msk [vmem:[%s6169_s10 + $0x80] sm:$0xff] %vm666_vm4, %v4694_v19  ;;  %v3611_v13 = vadd.f32 %v4694_v19, %v3610_v46  ;;  %v3649_v21 = vmul.f32 %v4694_v19, %v4694_v19  ;;  %v3679_v30 = vadd.f32 %v3678_v16, %v3648_v10  ;;  %v4696_v23 = vadd.f32 %v3472_v56, %v2247_v44  ;;  %v4459_v2 = vpop.f32.mrb[20].mxu1 }
 0x27e   : > { %3583 = vst.msk [vmem:[%s6169_s10 + $0x98] sm:$0xff] %vm666_vm4, %v4695_v24  ;;  %v2260_v3 = vpop.f32.mrb[21].mxu1  ;;  %v3652_v50 = vmul.f32 %v4695_v24, %v4695_v24 }
 0x27f   : > { %v3680_v31 = vadd.f32 %v3679_v30, %v3649_v21  ;;  %3581 = vst.msk [vmem:[%s6169_s10 + $0x88] sm:$0xff] %vm666_vm4, %v4696_v23  ;;  %v3612_v22 = vadd.f32 %v4696_v23, %v3611_v13  ;;  %v3650_v36 = vmul.f32 %v4696_v23, %v4696_v23  ;;  %v4460_v53 = vpop.f32.mrb[22].mxu1 }
 0x280   : > { %v2263_v18 = vpop.f32.mrb[23].mxu1 }
 0x281   : > { %v3613_v59 = vadd.f32 %v4693_v55, %v3612_v22  ;;  %v3681_v8 = vadd.f32 %v3680_v31, %v3650_v36  ;;  %v4651_v34 = vpop.f32.mrb[20].mxu0 }
 0x282   : > { %v4697_v26 = vadd.f32 %v4651_v34, %v4459_v2  ;;  %v3485_v20 = vpop.f32.mrb[21].mxu0 }
 0x283   : > { %v3682_v60 = vadd.f32 %v3681_v8, %v3651_v38  ;;  %v4698_v40 = vadd.f32 %v3485_v20, %v2260_v3  ;;  %v3614_v43 = vadd.f32 %v4695_v24, %v3613_v59  ;;  %v4652_v25 = vpop.f32.mrb[22].mxu0 }
 0x284   : > { %3586 = vst.msk [vmem:[%s6169_s10 + $0xb0] sm:$0xff] %vm666_vm4, %v4697_v26  ;;  %v4699_v63 = vadd.f32 %v4652_v25, %v4460_v53  ;;  %v3488_v62 = vpop.f32.mrb[23].mxu0  ;;  %v3655_v41 = vmul.f32 %v4697_v26, %v4697_v26 }
 0x285   : > { %3584 = vst.msk [vmem:[%s6169_s10 + $0xa0] sm:$0xff] %vm666_vm4, %v4698_v40  ;;  %v3615_v4 = vadd.f32 %v4698_v40, %v3614_v43  ;;  %v3653_v47 = vmul.f32 %v4698_v40, %v4698_v40  ;;  %v3683_v28 = vadd.f32 %v3682_v60, %v3652_v50  ;;  %v4700_v29 = vadd.f32 %v3488_v62, %v2263_v18  ;;  %v4463_v5 = vpop.f32.mrb[24].mxu1 }
 0x286   : > { %3587 = vst.msk [vmem:[%s6169_s10 + $0xb8] sm:$0xff] %vm666_vm4, %v4699_v63  ;;  %v2276_v32 = vpop.f32.mrb[25].mxu1  ;;  %v3656_v51 = vmul.f32 %v4699_v63, %v4699_v63 }
 0x287   : > { %v3684_v15 = vadd.f32 %v3683_v28, %v3653_v47  ;;  %3585 = vst.msk [vmem:[%s6169_s10 + $0xa8] sm:$0xff] %vm666_vm4, %v4700_v29  ;;  %v3616_v52 = vadd.f32 %v4700_v29, %v3615_v4  ;;  %v3654_v54 = vmul.f32 %v4700_v29, %v4700_v29  ;;  %v4464_v45 = vpop.f32.mrb[26].mxu1 }
 0x288   : > { %v2279_v37 = vpop.f32.mrb[27].mxu1 }
 0x289   : > { %v3617_v27 = vadd.f32 %v4697_v26, %v3616_v52  ;;  %v3685_v42 = vadd.f32 %v3684_v15, %v3654_v54  ;;  %v4655_v0 = vpop.f32.mrb[24].mxu0 }
 0x28a   : > { %v4701_v1 = vadd.f32 %v4655_v0, %v4463_v5  ;;  %v3501_v57 = vpop.f32.mrb[25].mxu0 }
 0x28b   : > { %v3686_v48 = vadd.f32 %v3685_v42, %v3655_v41  ;;  %v4702_v49 = vadd.f32 %v3501_v57, %v2276_v32  ;;  %v3618_v9 = vadd.f32 %v4699_v63, %v3617_v27  ;;  %v4656_v6 = vpop.f32.mrb[26].mxu0 }
 0x28c   : > { %3590 = vst.msk [vmem:[%s6169_s10 + $0xd0] sm:$0xff] %vm666_vm4, %v4701_v1  ;;  %v4703_v11 = vadd.f32 %v4656_v6, %v4464_v45  ;;  %v3504_v61 = vpop.f32.mrb[27].mxu0  ;;  %v3659_v19 = vmul.f32 %v4701_v1, %v4701_v1 }
 0x28d   : > { %3588 = vst.msk [vmem:[%s6169_s10 + $0xc0] sm:$0xff] %vm666_vm4, %v4702_v49  ;;  %v3619_v12 = vadd.f32 %v4702_v49, %v3618_v9  ;;  %v3657_v39 = vmul.f32 %v4702_v49, %v4702_v49  ;;  %v3687_v44 = vadd.f32 %v3686_v48, %v3656_v51  ;;  %v4704_v17 = vadd.f32 %v3504_v61, %v2279_v37  ;;  %v4467_v33 = vpop.f32.mrb[28].mxu1 }
 0x28e   : > { %3591 = vst.msk [vmem:[%s6169_s10 + $0xd8] sm:$0xff] %vm666_vm4, %v4703_v11  ;;  %v2292_v7 = vpop.f32.mrb[29].mxu1  ;;  %v3660_v21 = vmul.f32 %v4703_v11, %v4703_v11 }
 0x28f   : > { %v3688_v35 = vadd.f32 %v3687_v44, %v3657_v39  ;;  %3589 = vst.msk [vmem:[%s6169_s10 + $0xc8] sm:$0xff] %vm666_vm4, %v4704_v17  ;;  %v3620_v55 = vadd.f32 %v4704_v17, %v3619_v12  ;;  %v3658_v58 = vmul.f32 %v4704_v17, %v4704_v17  ;;  %v4468_v10 = vpop.f32.mrb[30].mxu1 }
 0x290   : > { %v2295_v16 = vpop.f32.mrb[31].mxu1 }
 0x291   : > { %v3621_v46 = vadd.f32 %v4701_v1, %v3620_v55  ;;  %v3689_v14 = vadd.f32 %v3688_v35, %v3658_v58  ;;  %v4659_v24 = vpop.f32.mrb[28].mxu0 }
 0x292   : > { %v4705_v56 = vadd.f32 %v4659_v24, %v4467_v33  ;;  %v3517_v13 = vpop.f32.mrb[29].mxu0 }
 0x293   : > { %v3690_v30 = vadd.f32 %v3689_v14, %v3659_v19  ;;  %v4706_v23 = vadd.f32 %v3517_v13, %v2292_v7  ;;  %v3622_v2 = vadd.f32 %v4703_v11, %v3621_v46  ;;  %v4660_v3 = vpop.f32.mrb[30].mxu0 }
 0x294   : > { %3594 = vst.msk [vmem:[%s6169_s10 + $0xf0] sm:$0xff] %vm666_vm4, %v4705_v56  ;;  %v4707_v31 = vadd.f32 %v4660_v3, %v4468_v10  ;;  %v3520_v22 = vpop.f32.mrb[31].mxu0  ;;  %v3663_v26 = vmul.f32 %v4705_v56, %v4705_v56 }
 0x295   : > { %3592 = vst.msk [vmem:[%s6169_s10 + $0xe0] sm:$0xff] %vm666_vm4, %v4706_v23  ;;  %v3623_v36 = vadd.f32 %v4706_v23, %v3622_v2  ;;  %v3661_v53 = vmul.f32 %v4706_v23, %v4706_v23  ;;  %v3691_v18 = vadd.f32 %v3690_v30, %v3660_v21  ;;  %v4708_v38 = vadd.f32 %v3520_v22, %v2295_v16 }
 0x296   : > { %3595 = vst.msk [vmem:[%s6169_s10 + $0xf8] sm:$0xff] %vm666_vm4, %v4707_v31  ;;  %v3664_v60 = vmul.f32 %v4707_v31, %v4707_v31 }
 0x297   : > { %v3692_v59 = vadd.f32 %v3691_v18, %v3661_v53  ;;  %3593 = vst.msk [vmem:[%s6169_s10 + $0xe8] sm:$0xff] %vm666_vm4, %v4708_v38  ;;  %v3624_v8 = vadd.f32 %v4708_v38, %v3623_v36  ;;  %v3662_v34 = vmul.f32 %v4708_v38, %v4708_v38 }
 0x299   : > { %v3625_v20 = vadd.f32 %v4705_v56, %v3624_v8  ;;  %v3693_v50 = vadd.f32 %v3692_v59, %v3662_v34 }
 0x29b   : > { %v3626_v40 = vadd.f32 %v4707_v31, %v3625_v20  ;;  %v3694_v43 = vadd.f32 %v3693_v50, %v3663_v26 }
 0x29d   : > { %v3627_v25 = vrot.slane %v3626_v40, 4  ;;  %v3695_v63 = vadd.f32 %v3694_v43, %v3664_v60 }
 0x29f   : > { %v3628_v62 = vadd.f32 %v3627_v25, %v3626_v40  ;;  %v3696_v4 = vrot.slane %v3695_v63, 4 }
 0x2a1   : > { %v3629_v47 = vrot.slane %v3628_v62, 2  ;;  %v3697_v28 = vadd.f32 %v3696_v4, %v3695_v63 }
 0x2a3   : > { %v3630_v29 = vadd.f32 %v3629_v47, %v3628_v62  ;;  %v3698_v5 = vrot.slane %v3697_v28, 2 }
 0x2a5   : > { %v3631_v32 = vrot.slane %v3630_v29, 1  ;;  %v3699_v15 = vadd.f32 %v3698_v5, %v3697_v28 }
 0x2a7   : > { %v3700_v52 = vrot.slane %v3699_v15, 1  ;;  %v3632_v54 = vadd.f32 %v3631_v32, %v3630_v29 }
 0x2a9   : > { %v3701_v45 = vadd.f32 %v3700_v52, %v3699_v15 }
 0x2ab   : > { %v3703_v37 = vsel %vm3702_vm9, %v3632_v54, %v3701_v45 }
 0x2ac   : > { %3704 = vst [vmem:[%s235_s14] sm:$0x3] %v3703_v37 }
 0x2ad PF: > { %s16_s18 = sadd.s32 1, %s5102_s18  }
 0x2ae   : > { %p13_p4 = scmp.ge.s32.totalorder %s16_s18, 4  }
 0x2b0   :  { %15 = sbr.rel (!%p13_p4) target bundleno = 1 (0x1), region = 89 }

</bundles_post_ra>
